<compile_context>
chip_gen: v7x
topology: tpu7x:2x2x1
jax: 0.10.0
libtpu: 0.0.40
codegen_flags: <defaults>
</compile_context>

<pallas_src>
import functools
import math

import jax
import jax.numpy as jnp
from jax.experimental import pallas as pl
from jax.experimental.pallas import tpu as pltpu


def _round_up(x, m):
    return (x + m - 1) // m * m


# ----------------------------------------------------------------------------
# Pallas kernel
# ----------------------------------------------------------------------------
def _attention_critic_kernel(
    x_ref,      # [TB, K1]   packed [x_self | x_other_0 | ...], zero-padded to K1
    w1_ref,     # [K1, N1]   block-diag(fc1_self, fc1_others[0..n_o-1])
    b1_ref,     # [1, N1]
    w2_ref,     # [N1, N2]   [fc2_self | query_all | (key_all, value_all) per agent]
    b2_ref,     # [1, N2]
    rmask_ref,  # [1, N2]    1.0 where ReLU applies, 0.0 elsewhere
    w3s_ref,    # [128, 128] w3_self zero-padded
    w3o_ref,    # [128, 128] w3_others zero-padded
    wqh_ref,    # [1, 128]   q_out weight as a row, zero-padded
    bq_ref,     # [1, 1]     q_out bias
    q_ref,      # [TB, 1]    output
    *, n_others, n_heads, att_dim, H, compute_dtype,
):
    f32 = jnp.float32
    cd = compute_dtype

    # ---- fused layer 1: every fc1 in one block-diagonal matmul ----
    x = x_ref[...].astype(cd)
    h1 = jnp.maximum(
        jnp.dot(x, w1_ref[...].astype(cd), preferred_element_type=f32) + b1_ref[...],
        0.0)                                                        # [TB, N1]

    # ---- fused layer 2: fc2_self + all query/key/value extractors ----
    z2 = jnp.dot(h1.astype(cd), w2_ref[...].astype(cd),
                 preferred_element_type=f32) + b2_ref[...]          # [TB, N2]
    h2 = jnp.where(rmask_ref[...] > 0.5, jnp.maximum(z2, 0.0), z2)

    # column layout of h2 (all offsets are multiples of H = 128):
    #   [0:H)               x2_self (cols >= n_h1_self are exact zeros)
    #   [H:2H)              selectors (query heads concatenated)
    #   [2H+2H*i : +H)      keys of other-agent i   (heads concatenated)
    #   [3H+2H*i : +H)      values of other-agent i (heads concatenated)
    sel = h2[:, H:2 * H]

    # static per-head lane masks
    lane = jax.lax.broadcasted_iota(jnp.int32, (1, H), 1)
    head_masks = [
        jnp.logical_and(lane >= j * att_dim, lane < (j + 1) * att_dim).astype(f32)
        for j in range(n_heads)
    ]

    inv_sqrt_d = 1.0 / math.sqrt(att_dim)
    logits = []   # logits[i][j]: [TB, 1]
    vals = []
    for i in range(n_others):
        base = 2 * H + 2 * H * i
        keys_i = h2[:, base:base + H]
        vals.append(h2[:, base + H:base + 2 * H])
        prod = sel * keys_i                                         # VPU
        logits.append([
            jnp.sum(prod * head_masks[j], axis=-1, keepdims=True) * inv_sqrt_d
            for j in range(n_heads)
        ])

    # softmax over the "other agents" axis, per head ([TB,1] VPU/EUP ops)
    attn = [[None] * n_heads for _ in range(n_others)]
    for j in range(n_heads):
        m = logits[0][j]
        for i in range(1, n_others):
            m = jnp.maximum(m, logits[i][j])
        e = [jnp.exp(logits[i][j] - m) for i in range(n_others)]
        s = e[0]
        for i in range(1, n_others):
            s = s + e[i]
        inv_s = 1.0 / s
        for i in range(n_others):
            attn[i][j] = e[i] * inv_s

    # weighted sum of values -> x2_others [TB, H]
    x2_others = jnp.zeros_like(sel)
    for i in range(n_others):
        wmap = attn[i][0] * head_masks[0]
        for j in range(1, n_heads):
            wmap = wmap + attn[i][j] * head_masks[j]
        x2_others = x2_others + vals[i] * wmap

    # ---- layer 3 (two K=128 matmuls into the same N=128) + q head as VPU reduce ----
    x3 = jnp.maximum(
        jnp.dot(h2[:, 0:H].astype(cd), w3s_ref[...].astype(cd),
                preferred_element_type=f32)
        + jnp.dot(x2_others.astype(cd), w3o_ref[...].astype(cd),
                  preferred_element_type=f32),
        0.0)                                                        # [TB, 128]
    q = jnp.sum(x3 * wqh_ref[...], axis=-1, keepdims=True) + bq_ref[...]
    q_ref[...] = q.astype(q_ref.dtype)


# ----------------------------------------------------------------------------
# pallas_call wrapper: batch grid, weights VMEM-resident across grid steps
# ----------------------------------------------------------------------------
def _attention_critic_pallas(x, packed, *, n_others, n_heads, att_dim, H, tb,
                             compute_dtype):
    B, K1 = x.shape
    w1, b1, w2, b2, rmask, w3s, w3o, wqh, bq = packed
    N1 = w1.shape[1]
    N2 = w2.shape[1]

    Bp = _round_up(B, tb)
    if Bp != B:
        x = jnp.pad(x, ((0, Bp - B), (0, 0)))

    kernel = functools.partial(
        _attention_critic_kernel,
        n_others=n_others, n_heads=n_heads, att_dim=att_dim, H=H,
        compute_dtype=compute_dtype)

    q = pl.pallas_call(
        kernel,
        out_shape=jax.ShapeDtypeStruct((Bp, 1), jnp.float32),
        grid_spec=pltpu.PrefetchScalarGridSpec(
            num_scalar_prefetch=0,
            grid=(Bp // tb,),
            in_specs=[
                pl.BlockSpec((tb, K1), lambda i: (i, 0)),     # activations: tiled over batch
                pl.BlockSpec((K1, N1), lambda i: (0, 0)),     # weights: resident
                pl.BlockSpec((1, N1), lambda i: (0, 0)),
                pl.BlockSpec((N1, N2), lambda i: (0, 0)),
                pl.BlockSpec((1, N2), lambda i: (0, 0)),
                pl.BlockSpec((1, N2), lambda i: (0, 0)),
                pl.BlockSpec((H, H), lambda i: (0, 0)),
                pl.BlockSpec((H, H), lambda i: (0, 0)),
                pl.BlockSpec((1, H), lambda i: (0, 0)),
                pl.BlockSpec((1, 1), lambda i: (0, 0)),
            ],
            out_specs=pl.BlockSpec((tb, 1), lambda i: (i, 0)),
        ),
        compiler_params=pltpu.CompilerParams(
            dimension_semantics=("parallel",)),
    )(x, w1, b1, w2, b2, rmask, w3s, w3o, wqh, bq)
    return q[:B]


# ----------------------------------------------------------------------------
# Parameter packing: raw (PyTorch-layout) params -> fused block matrices
# ----------------------------------------------------------------------------
def pack_params(p, *, d_self, d_other, n_others, n_h1_self, n_h1_others, n_h2,
                n_heads, att_dim, K1):
    assert n_h1_others == n_heads * att_dim == 128
    assert n_h1_self <= 128 and n_h2 <= 128
    f32 = jnp.float32
    H = n_h1_others
    N1 = H + n_others * H           # [self(pad to 128) | enc_0 | enc_1 | ...]
    N2 = 2 * H + n_others * 2 * H   # [x2_self | selectors | (keys_i, vals_i) ...]

    w1 = jnp.zeros((K1, N1), f32)
    b1 = jnp.zeros((1, N1), f32)
    w1 = w1.at[:d_self, :n_h1_self].set(p["w1s"])
    b1 = b1.at[0, :n_h1_self].set(p["b1s"])
    for i in range(n_others):
        r = d_self + i * d_other
        c = H + i * H
        w1 = w1.at[r:r + d_other, c:c + H].set(p["w1o"][i])
        b1 = b1.at[0, c:c + H].set(p["b1o"][i])

    w2 = jnp.zeros((N1, N2), f32)
    b2 = jnp.zeros((1, N2), f32)
    rmask = jnp.zeros((1, N2), f32)
    # block 0: x2_self (ReLU, bias)
    w2 = w2.at[:n_h1_self, :n_h1_self].set(p["w2s"])
    b2 = b2.at[0, :n_h1_self].set(p["b2s"])
    rmask = rmask.at[0, 0:H].set(1.0)
    # block 1: selectors (all heads, no bias, no ReLU)
    wq_all = jnp.concatenate([p["wq_att"][j] for j in range(n_heads)], axis=1)
    w2 = w2.at[:n_h1_self, H:2 * H].set(wq_all)
    # per-other-agent key / value blocks
    wk_all = jnp.concatenate([p["wk"][j] for j in range(n_heads)], axis=1)
    wv_all = jnp.concatenate([p["wv"][j] for j in range(n_heads)], axis=1)
    bv_all = jnp.concatenate([p["bv"][j] for j in range(n_heads)], axis=0)
    for i in range(n_others):
        r = H + i * H
        ck = 2 * H + 2 * H * i
        cv = ck + H
        w2 = w2.at[r:r + H, ck:ck + H].set(wk_all)        # keys: no bias, no ReLU
        w2 = w2.at[r:r + H, cv:cv + H].set(wv_all)        # values: bias + ReLU
        b2 = b2.at[0, cv:cv + H].set(bv_all)
        rmask = rmask.at[0, cv:cv + H].set(1.0)

    w3s = jnp.zeros((H, H), f32).at[:n_h1_self, :n_h2].set(p["w3s"])
    w3o = jnp.zeros((H, H), f32).at[:n_h1_others, :n_h2].set(p["w3o"])
    wqh = jnp.zeros((1, H), f32).at[0, :n_h2].set(p["wq_out"][:, 0])
    bq = p["bq_out"].reshape(1, 1).astype(f32)
    return (w1, b1, w2, b2, rmask, w3s, w3o, wqh, bq)


# ----------------------------------------------------------------------------
# Module-level forward (stage=2) — matches Attention_Critic.forward
# ----------------------------------------------------------------------------
def attention_critic_forward(state_one, act_one, state_others, act_others, params, *,
                             max_action, n_h1_self=64, n_h1_others=128, n_h2=64,
                             n_heads=4, tb=128, compute_dtype=jnp.float32):
    n_others = state_others.shape[0]
    d_self = state_one.shape[-1] + act_one.shape[-1]
    d_other = state_others.shape[-1] + act_others.shape[-1]
    att_dim = n_h1_others // n_heads

    act_one = act_one / max_action
    act_others = act_others / max_action

    parts = [state_one, act_one]
    for i in range(n_others):
        parts.append(state_others[i])
        parts.append(act_others[i])
    x = jnp.concatenate(parts, axis=-1).astype(jnp.float32)

    K1 = _round_up(d_self + n_others * d_other, 128)
    if x.shape[-1] < K1:
        x = jnp.pad(x, ((0, 0), (0, K1 - x.shape[-1])))

    packed = pack_params(params, d_self=d_self, d_other=d_other, n_others=n_others,
                         n_h1_self=n_h1_self, n_h1_others=n_h1_others, n_h2=n_h2,
                         n_heads=n_heads, att_dim=att_dim, K1=K1)
    return _attention_critic_pallas(x, packed, n_others=n_others, n_heads=n_heads,
                                    att_dim=att_dim, H=n_h1_others, tb=tb,
                                    compute_dtype=compute_dtype)


# ----------------------------------------------------------------------------
# Pure-JAX reference mirroring the PyTorch forward (stage=2)
# ----------------------------------------------------------------------------
def attention_critic_ref(state_one, act_one, state_others, act_others, p, *,
                         max_action, n_heads, att_dim):
    PH = jax.lax.Precision.HIGHEST
    relu = jax.nn.relu
    act_one = act_one / max_action
    act_others = act_others / max_action

    x = jnp.concatenate([state_one, act_one], axis=-1)
    x1_self = relu(jnp.dot(x, p["w1s"], precision=PH) + p["b1s"])
    x2_self = relu(jnp.dot(x1_self, p["w2s"], precision=PH) + p["b2s"])
    x3_self = jnp.dot(x2_self, p["w3s"], precision=PH)

    n_o = state_others.shape[0]
    encs = []
    for i in range(n_o):
        inp = jnp.concatenate([state_others[i], act_others[i]], axis=-1)
        encs.append(relu(jnp.dot(inp, p["w1o"][i], precision=PH) + p["b1o"][i]))

    others_all_values = []
    for j in range(n_heads):
        keys = [jnp.dot(e, p["wk"][j], precision=PH) for e in encs]
        vals = [relu(jnp.dot(e, p["wv"][j], precision=PH) + p["bv"][j]) for e in encs]
        sel = jnp.dot(x1_self, p["wq_att"][j], precision=PH)
        K = jnp.stack(keys, axis=-1)                       # [B, att_dim, n_o]
        logits = jnp.einsum("bd,bdn->bn", sel, K, precision=PH)
        w = jax.nn.softmax(logits / math.sqrt(att_dim), axis=-1)
        V = jnp.stack(vals, axis=-1)                       # [B, att_dim, n_o]
        others_all_values.append(jnp.einsum("bdn,bn->bd", V, w, precision=PH))
    x2_others = jnp.concatenate(others_all_values, axis=-1)
    x3_others = jnp.dot(x2_others, p["w3o"], precision=PH)
    x3 = relu(x3_self + x3_others)
    return jnp.dot(x3, p["wq_out"], precision=PH) + p["bq_out"]


# ----------------------------------------------------------------------------
# Deterministic parameter init (PyTorch Linear default-style; w3_* ~ N(0,0.01)).
# Weights stored as [in, out] so all layers compute x @ W.
# ----------------------------------------------------------------------------
def init_params(key, *, d_self, d_other, n_others, n_h1_self=64, n_h1_others=128,
                n_h2=64, n_heads=4):
    att_dim = n_h1_others // n_heads
    keys = list(jax.random.split(key, 64))
    it = iter(keys)

    def uni(k, shape, fan_in):
        b = 1.0 / math.sqrt(fan_in)
        return jax.random.uniform(k, shape, jnp.float32, -b, b)

    p = {}
    p["w1s"] = uni(next(it), (d_self, n_h1_self), d_self)
    p["b1s"] = uni(next(it), (n_h1_self,), d_self)
    p["w2s"] = uni(next(it), (n_h1_self, n_h1_self), n_h1_self)
    p["b2s"] = uni(next(it), (n_h1_self,), n_h1_self)
    p["w3s"] = 0.01 * jax.random.normal(next(it), (n_h1_self, n_h2), jnp.float32)
    p["w1o"] = jnp.stack([uni(next(it), (d_other, n_h1_others), d_other)
                          for _ in range(n_others)])
    p["b1o"] = jnp.stack([uni(next(it), (n_h1_others,), d_other)
                          for _ in range(n_others)])
    p["wk"] = jnp.stack([uni(next(it), (n_h1_others, att_dim), n_h1_others)
                         for _ in range(n_heads)])
    p["wq_att"] = jnp.stack([uni(next(it), (n_h1_self, att_dim), n_h1_self)
                             for _ in range(n_heads)])
    p["wv"] = jnp.stack([uni(next(it), (n_h1_others, att_dim), n_h1_others)
                         for _ in range(n_heads)])
    p["bv"] = jnp.stack([uni(next(it), (att_dim,), n_h1_others)
                         for _ in range(n_heads)])
    p["w3o"] = 0.01 * jax.random.normal(next(it), (n_h1_others, n_h2), jnp.float32)
    p["wq_out"] = uni(next(it), (n_h2, 1), n_h2)
    p["bq_out"] = uni(next(it), (1,), n_h2)
    return p


if __name__ == "__main__":
    # Small deterministic problem consistent with the module (stage=2):
    #   n_agents=3, agent_id=0, obs=10 per agent, act=5 per agent,
    #   n_h1_self=64, n_h1_others=128, n_h2=64, attention_heads=4, batch=256.
    # TODO(synk): the original constructor sizes fc1_others with
    #   (sum(obs)+sum(act)-obs[id]+act[id])//(n_agents-1), which is inconsistent with
    #   what forward() actually feeds (obs_i+act_i); we size by the actual concat dim.
    n_agents, agent_id = 3, 0
    obs_shape = [10, 10, 10]
    action_shape = [5, 5, 5]
    n_h1_self, n_h1_others, n_h2, n_heads = 64, 128, 64, 4
    att_dim = n_h1_others // n_heads
    batch_size = 256
    max_action = 2.0

    n_others = n_agents - 1
    d_self = obs_shape[agent_id] + action_shape[agent_id]
    d_other = obs_shape[1] + action_shape[1]

    key = jax.random.PRNGKey(0)
    kp, kd = jax.random.split(key)
    params = init_params(kp, d_self=d_self, d_other=d_other, n_others=n_others,
                         n_h1_self=n_h1_self, n_h1_others=n_h1_others,
                         n_h2=n_h2, n_heads=n_heads)

    ks = jax.random.split(kd, 4)
    state_one = jax.random.normal(ks[0], (batch_size, obs_shape[agent_id]), jnp.float32)
    act_one = jax.random.normal(ks[1], (batch_size, action_shape[agent_id]), jnp.float32)
    state_others = jax.random.normal(ks[2], (n_others, batch_size, obs_shape[1]),
                                     jnp.float32)
    act_others = jax.random.normal(ks[3], (n_others, batch_size, action_shape[1]),
                                   jnp.float32)

    q = attention_critic_forward(state_one, act_one, state_others, act_others, params,
                                 max_action=max_action, n_h1_self=n_h1_self,
                                 n_h1_others=n_h1_others, n_h2=n_h2, n_heads=n_heads,
                                 tb=128, compute_dtype=jnp.float32)
    q = jax.block_until_ready(q)

    q_ref = attention_critic_ref(state_one, act_one, state_others, act_others, params,
                                 max_action=max_action, n_heads=n_heads,
                                 att_dim=att_dim)
    q_ref = jax.block_until_ready(q_ref)

    assert q.shape == (batch_size, 1), q.shape
    max_err = float(jnp.max(jnp.abs(q - q_ref)))
    assert jnp.allclose(q, q_ref, atol=1e-3, rtol=1e-3), f"max abs err = {max_err}"

    print("KERNEL_OK")
</pallas_src>

<mosaic_0001>
module attributes {stable_mosaic.version = 11 : i64} {
  func.func @_attention_critic_kernel(%arg0: i32, %arg1: memref<128x128xf32, #tpu.memory_space<vmem>>, %arg2: memref<128x384xf32, #tpu.memory_space<vmem>>, %arg3: memref<1x384xf32, #tpu.memory_space<vmem>>, %arg4: memref<384x768xf32, #tpu.memory_space<vmem>>, %arg5: memref<1x768xf32, #tpu.memory_space<vmem>>, %arg6: memref<1x768xf32, #tpu.memory_space<vmem>>, %arg7: memref<128x128xf32, #tpu.memory_space<vmem>>, %arg8: memref<128x128xf32, #tpu.memory_space<vmem>>, %arg9: memref<1x128xf32, #tpu.memory_space<vmem>>, %arg10: memref<1x1xf32, #tpu.memory_space<vmem>>, %arg11: memref<128x1xf32, #tpu.memory_space<vmem>>) attributes {dimension_semantics = [#tpu.dimension_semantics<parallel>], iteration_bounds = array<i64: 2>, scalar_prefetch = 0 : i64, scratch_operands = 0 : i64, tpu.core_type = #tpu.core_type<tc>, window_params = [{transform_indices = @transform_0, window_bounds = array<i64: 128, 128>}, {pipeline_mode = #tpu.pipeline_mode<synchronous>, transform_indices = @transform_1, window_bounds = array<i64: 128, 384>}, {pipeline_mode = #tpu.pipeline_mode<synchronous>, transform_indices = @transform_2, window_bounds = array<i64: 1, 384>}, {pipeline_mode = #tpu.pipeline_mode<synchronous>, transform_indices = @transform_3, window_bounds = array<i64: 384, 768>}, {pipeline_mode = #tpu.pipeline_mode<synchronous>, transform_indices = @transform_4, window_bounds = array<i64: 1, 768>}, {pipeline_mode = #tpu.pipeline_mode<synchronous>, transform_indices = @transform_5, window_bounds = array<i64: 1, 768>}, {pipeline_mode = #tpu.pipeline_mode<synchronous>, transform_indices = @transform_6, window_bounds = array<i64: 128, 128>}, {pipeline_mode = #tpu.pipeline_mode<synchronous>, transform_indices = @transform_7, window_bounds = array<i64: 128, 128>}, {pipeline_mode = #tpu.pipeline_mode<synchronous>, transform_indices = @transform_8, window_bounds = array<i64: 1, 128>}, {pipeline_mode = #tpu.pipeline_mode<synchronous>, transform_indices = @transform_9, window_bounds = array<i64: 1, 1>}, {transform_indices = @transform_10, window_bounds = array<i64: 128, 1>}]} {
    %c0 = arith.constant 0 : index
    %c0_0 = arith.constant 0 : index
    %0 = vector.load %arg1[%c0, %c0_0] : memref<128x128xf32, #tpu.memory_space<vmem>>, vector<128x128xf32>
    %c0_1 = arith.constant 0 : index
    %c0_2 = arith.constant 0 : index
    %1 = vector.load %arg2[%c0_1, %c0_2] : memref<128x384xf32, #tpu.memory_space<vmem>>, vector<128x384xf32>
    %cst = arith.constant dense<0.000000e+00> : vector<128x384xf32>
    %2 = tpu.matmul %0, %1, %cst {dimension_numbers = #tpu.dot_dimension_numbers<[1], [0], [0], [1], [0, 0, 1, 1], [], []>} : vector<128x128xf32>, vector<128x384xf32>, vector<128x384xf32> -> vector<128x384xf32>
    %c0_3 = arith.constant 0 : index
    %c0_4 = arith.constant 0 : index
    %3 = vector.load %arg3[%c0_3, %c0_4] : memref<1x384xf32, #tpu.memory_space<vmem>>, vector<1x384xf32>
    %4 = vector.broadcast %3 : vector<1x384xf32> to vector<128x384xf32>
    %5 = arith.addf %2, %4 : vector<128x384xf32>
    %cst_5 = arith.constant 0.000000e+00 : f32
    %6 = vector.broadcast %cst_5 : f32 to vector<128x384xf32>
    %7 = arith.maximumf %5, %6 : vector<128x384xf32>
    %c0_6 = arith.constant 0 : index
    %c0_7 = arith.constant 0 : index
    %8 = vector.load %arg4[%c0_6, %c0_7] : memref<384x768xf32, #tpu.memory_space<vmem>>, vector<384x768xf32>
    %cst_8 = arith.constant dense<0.000000e+00> : vector<128x768xf32>
    %9 = tpu.matmul %7, %8, %cst_8 {dimension_numbers = #tpu.dot_dimension_numbers<[1], [0], [0], [1], [0, 0, 1, 1], [], []>} : vector<128x384xf32>, vector<384x768xf32>, vector<128x768xf32> -> vector<128x768xf32>
    %c0_9 = arith.constant 0 : index
    %c0_10 = arith.constant 0 : index
    %10 = vector.load %arg5[%c0_9, %c0_10] : memref<1x768xf32, #tpu.memory_space<vmem>>, vector<1x768xf32>
    %11 = vector.broadcast %10 : vector<1x768xf32> to vector<128x768xf32>
    %12 = arith.addf %9, %11 : vector<128x768xf32>
    %c0_11 = arith.constant 0 : index
    %c0_12 = arith.constant 0 : index
    %13 = vector.load %arg6[%c0_11, %c0_12] : memref<1x768xf32, #tpu.memory_space<vmem>>, vector<1x768xf32>
    %cst_13 = arith.constant 5.000000e-01 : f32
    %14 = vector.broadcast %cst_13 : f32 to vector<1x768xf32>
    %15 = arith.cmpf ogt, %13, %14 : vector<1x768xf32>
    %cst_14 = arith.constant 0.000000e+00 : f32
    %16 = vector.broadcast %cst_14 : f32 to vector<128x768xf32>
    %17 = arith.maximumf %12, %16 : vector<128x768xf32>
    %18 = vector.shape_cast %15 : vector<1x768xi1> to vector<1x768xi1>
    %19 = vector.broadcast %18 : vector<1x768xi1> to vector<128x768xi1>
    %20 = arith.select %19, %17, %12 : vector<128x768xi1>, vector<128x768xf32>
    %21 = vector.extract_strided_slice %20 {offsets = [0, 128], sizes = [128, 128], strides = [1, 1]} : vector<128x768xf32> to vector<128x128xf32>
    %22 = tpu.iota {dimensions = array<i32: 1>} : vector<1x128xi32>
    %c0_i32 = arith.constant 0 : i32
    %23 = vector.broadcast %c0_i32 : i32 to vector<1x128xi32>
    %24 = arith.cmpi sge, %22, %23 : vector<1x128xi32>
    %c32_i32 = arith.constant 32 : i32
    %25 = vector.broadcast %c32_i32 : i32 to vector<1x128xi32>
    %26 = arith.cmpi slt, %22, %25 : vector<1x128xi32>
    %27 = arith.andi %24, %26 : vector<1x128xi1>
    %28 = arith.extui %27 : vector<1x128xi1> to vector<1x128xi32>
    %29 = arith.sitofp %28 : vector<1x128xi32> to vector<1x128xf32>
    %c32_i32_15 = arith.constant 32 : i32
    %30 = vector.broadcast %c32_i32_15 : i32 to vector<1x128xi32>
    %31 = arith.cmpi sge, %22, %30 : vector<1x128xi32>
    %c64_i32 = arith.constant 64 : i32
    %32 = vector.broadcast %c64_i32 : i32 to vector<1x128xi32>
    %33 = arith.cmpi slt, %22, %32 : vector<1x128xi32>
    %34 = arith.andi %31, %33 : vector<1x128xi1>
    %35 = arith.extui %34 : vector<1x128xi1> to vector<1x128xi32>
    %36 = arith.sitofp %35 : vector<1x128xi32> to vector<1x128xf32>
    %c64_i32_16 = arith.constant 64 : i32
    %37 = vector.broadcast %c64_i32_16 : i32 to vector<1x128xi32>
    %38 = arith.cmpi sge, %22, %37 : vector<1x128xi32>
    %c96_i32 = arith.constant 96 : i32
    %39 = vector.broadcast %c96_i32 : i32 to vector<1x128xi32>
    %40 = arith.cmpi slt, %22, %39 : vector<1x128xi32>
    %41 = arith.andi %38, %40 : vector<1x128xi1>
    %42 = arith.extui %41 : vector<1x128xi1> to vector<1x128xi32>
    %43 = arith.sitofp %42 : vector<1x128xi32> to vector<1x128xf32>
    %c96_i32_17 = arith.constant 96 : i32
    %44 = vector.broadcast %c96_i32_17 : i32 to vector<1x128xi32>
    %45 = arith.cmpi sge, %22, %44 : vector<1x128xi32>
    %c128_i32 = arith.constant 128 : i32
    %46 = vector.broadcast %c128_i32 : i32 to vector<1x128xi32>
    %47 = arith.cmpi slt, %22, %46 : vector<1x128xi32>
    %48 = arith.andi %45, %47 : vector<1x128xi1>
    %49 = arith.extui %48 : vector<1x128xi1> to vector<1x128xi32>
    %50 = arith.sitofp %49 : vector<1x128xi32> to vector<1x128xf32>
    %51 = vector.extract_strided_slice %20 {offsets = [0, 256], sizes = [128, 128], strides = [1, 1]} : vector<128x768xf32> to vector<128x128xf32>
    %52 = vector.extract_strided_slice %20 {offsets = [0, 384], sizes = [128, 128], strides = [1, 1]} : vector<128x768xf32> to vector<128x128xf32>
    %53 = arith.mulf %21, %51 : vector<128x128xf32>
    %54 = vector.broadcast %29 : vector<1x128xf32> to vector<128x128xf32>
    %55 = arith.mulf %53, %54 : vector<128x128xf32>
    %cst_18 = arith.constant dense<0.000000e+00> : vector<128xf32>
    %56 = vector.multi_reduction <add>, %55, %cst_18 [1] : vector<128x128xf32> to vector<128xf32>
    %57 = vector.shape_cast %56 : vector<128xf32> to vector<128x1xf32>
    %cst_19 = arith.constant 0.176776692 : f32
    %58 = vector.broadcast %cst_19 : f32 to vector<128x1xf32>
    %59 = arith.mulf %57, %58 : vector<128x1xf32>
    %60 = vector.broadcast %36 : vector<1x128xf32> to vector<128x128xf32>
    %61 = arith.mulf %53, %60 : vector<128x128xf32>
    %cst_20 = arith.constant dense<0.000000e+00> : vector<128xf32>
    %62 = vector.multi_reduction <add>, %61, %cst_20 [1] : vector<128x128xf32> to vector<128xf32>
    %63 = vector.shape_cast %62 : vector<128xf32> to vector<128x1xf32>
    %cst_21 = arith.constant 0.176776692 : f32
    %64 = vector.broadcast %cst_21 : f32 to vector<128x1xf32>
    %65 = arith.mulf %63, %64 : vector<128x1xf32>
    %66 = vector.broadcast %43 : vector<1x128xf32> to vector<128x128xf32>
    %67 = arith.mulf %53, %66 : vector<128x128xf32>
    %cst_22 = arith.constant dense<0.000000e+00> : vector<128xf32>
    %68 = vector.multi_reduction <add>, %67, %cst_22 [1] : vector<128x128xf32> to vector<128xf32>
    %69 = vector.shape_cast %68 : vector<128xf32> to vector<128x1xf32>
    %cst_23 = arith.constant 0.176776692 : f32
    %70 = vector.broadcast %cst_23 : f32 to vector<128x1xf32>
    %71 = arith.mulf %69, %70 : vector<128x1xf32>
    %72 = vector.broadcast %50 : vector<1x128xf32> to vector<128x128xf32>
    %73 = arith.mulf %53, %72 : vector<128x128xf32>
    %cst_24 = arith.constant dense<0.000000e+00> : vector<128xf32>
    %74 = vector.multi_reduction <add>, %73, %cst_24 [1] : vector<128x128xf32> to vector<128xf32>
    %75 = vector.shape_cast %74 : vector<128xf32> to vector<128x1xf32>
    %cst_25 = arith.constant 0.176776692 : f32
    %76 = vector.broadcast %cst_25 : f32 to vector<128x1xf32>
    %77 = arith.mulf %75, %76 : vector<128x1xf32>
    %78 = vector.extract_strided_slice %20 {offsets = [0, 512], sizes = [128, 128], strides = [1, 1]} : vector<128x768xf32> to vector<128x128xf32>
    %79 = vector.extract_strided_slice %20 {offsets = [0, 640], sizes = [128, 128], strides = [1, 1]} : vector<128x768xf32> to vector<128x128xf32>
    %80 = arith.mulf %21, %78 : vector<128x128xf32>
    %81 = vector.broadcast %29 : vector<1x128xf32> to vector<128x128xf32>
    %82 = arith.mulf %80, %81 : vector<128x128xf32>
    %cst_26 = arith.constant dense<0.000000e+00> : vector<128xf32>
    %83 = vector.multi_reduction <add>, %82, %cst_26 [1] : vector<128x128xf32> to vector<128xf32>
    %84 = vector.shape_cast %83 : vector<128xf32> to vector<128x1xf32>
    %cst_27 = arith.constant 0.176776692 : f32
    %85 = vector.broadcast %cst_27 : f32 to vector<128x1xf32>
    %86 = arith.mulf %84, %85 : vector<128x1xf32>
    %87 = vector.broadcast %36 : vector<1x128xf32> to vector<128x128xf32>
    %88 = arith.mulf %80, %87 : vector<128x128xf32>
    %cst_28 = arith.constant dense<0.000000e+00> : vector<128xf32>
    %89 = vector.multi_reduction <add>, %88, %cst_28 [1] : vector<128x128xf32> to vector<128xf32>
    %90 = vector.shape_cast %89 : vector<128xf32> to vector<128x1xf32>
    %cst_29 = arith.constant 0.176776692 : f32
    %91 = vector.broadcast %cst_29 : f32 to vector<128x1xf32>
    %92 = arith.mulf %90, %91 : vector<128x1xf32>
    %93 = vector.broadcast %43 : vector<1x128xf32> to vector<128x128xf32>
    %94 = arith.mulf %80, %93 : vector<128x128xf32>
    %cst_30 = arith.constant dense<0.000000e+00> : vector<128xf32>
    %95 = vector.multi_reduction <add>, %94, %cst_30 [1] : vector<128x128xf32> to vector<128xf32>
    %96 = vector.shape_cast %95 : vector<128xf32> to vector<128x1xf32>
    %cst_31 = arith.constant 0.176776692 : f32
    %97 = vector.broadcast %cst_31 : f32 to vector<128x1xf32>
    %98 = arith.mulf %96, %97 : vector<128x1xf32>
    %99 = vector.broadcast %50 : vector<1x128xf32> to vector<128x128xf32>
    %100 = arith.mulf %80, %99 : vector<128x128xf32>
    %cst_32 = arith.constant dense<0.000000e+00> : vector<128xf32>
    %101 = vector.multi_reduction <add>, %100, %cst_32 [1] : vector<128x128xf32> to vector<128xf32>
    %102 = vector.shape_cast %101 : vector<128xf32> to vector<128x1xf32>
    %cst_33 = arith.constant 0.176776692 : f32
    %103 = vector.broadcast %cst_33 : f32 to vector<128x1xf32>
    %104 = arith.mulf %102, %103 : vector<128x1xf32>
    %105 = arith.maximumf %59, %86 : vector<128x1xf32>
    %106 = arith.subf %59, %105 : vector<128x1xf32>
    %107 = math.exp %106 : vector<128x1xf32>
    %108 = arith.subf %86, %105 : vector<128x1xf32>
    %109 = math.exp %108 : vector<128x1xf32>
    %110 = arith.addf %107, %109 : vector<128x1xf32>
    %cst_34 = arith.constant 1.000000e+00 : f32
    %111 = vector.broadcast %cst_34 : f32 to vector<128x1xf32>
    %112 = arith.divf %111, %110 : vector<128x1xf32>
    %113 = arith.mulf %107, %112 : vector<128x1xf32>
    %114 = arith.mulf %109, %112 : vector<128x1xf32>
    %115 = arith.maximumf %65, %92 : vector<128x1xf32>
    %116 = arith.subf %65, %115 : vector<128x1xf32>
    %117 = math.exp %116 : vector<128x1xf32>
    %118 = arith.subf %92, %115 : vector<128x1xf32>
    %119 = math.exp %118 : vector<128x1xf32>
    %120 = arith.addf %117, %119 : vector<128x1xf32>
    %cst_35 = arith.constant 1.000000e+00 : f32
    %121 = vector.broadcast %cst_35 : f32 to vector<128x1xf32>
    %122 = arith.divf %121, %120 : vector<128x1xf32>
    %123 = arith.mulf %117, %122 : vector<128x1xf32>
    %124 = arith.mulf %119, %122 : vector<128x1xf32>
    %125 = arith.maximumf %71, %98 : vector<128x1xf32>
    %126 = arith.subf %71, %125 : vector<128x1xf32>
    %127 = math.exp %126 : vector<128x1xf32>
    %128 = arith.subf %98, %125 : vector<128x1xf32>
    %129 = math.exp %128 : vector<128x1xf32>
    %130 = arith.addf %127, %129 : vector<128x1xf32>
    %cst_36 = arith.constant 1.000000e+00 : f32
    %131 = vector.broadcast %cst_36 : f32 to vector<128x1xf32>
    %132 = arith.divf %131, %130 : vector<128x1xf32>
    %133 = arith.mulf %127, %132 : vector<128x1xf32>
    %134 = arith.mulf %129, %132 : vector<128x1xf32>
    %135 = arith.maximumf %77, %104 : vector<128x1xf32>
    %136 = arith.subf %77, %135 : vector<128x1xf32>
    %137 = math.exp %136 : vector<128x1xf32>
    %138 = arith.subf %104, %135 : vector<128x1xf32>
    %139 = math.exp %138 : vector<128x1xf32>
    %140 = arith.addf %137, %139 : vector<128x1xf32>
    %cst_37 = arith.constant 1.000000e+00 : f32
    %141 = vector.broadcast %cst_37 : f32 to vector<128x1xf32>
    %142 = arith.divf %141, %140 : vector<128x1xf32>
    %143 = arith.mulf %137, %142 : vector<128x1xf32>
    %144 = arith.mulf %139, %142 : vector<128x1xf32>
    %cst_38 = arith.constant 0.000000e+00 : f32
    %145 = vector.broadcast %cst_38 : f32 to vector<128x128xf32>
    %146 = vector.broadcast %113 : vector<128x1xf32> to vector<128x128xf32>
    %147 = vector.broadcast %29 : vector<1x128xf32> to vector<128x128xf32>
    %148 = arith.mulf %146, %147 : vector<128x128xf32>
    %149 = vector.broadcast %123 : vector<128x1xf32> to vector<128x128xf32>
    %150 = vector.broadcast %36 : vector<1x128xf32> to vector<128x128xf32>
    %151 = arith.mulf %149, %150 : vector<128x128xf32>
    %152 = arith.addf %148, %151 : vector<128x128xf32>
    %153 = vector.broadcast %133 : vector<128x1xf32> to vector<128x128xf32>
    %154 = vector.broadcast %43 : vector<1x128xf32> to vector<128x128xf32>
    %155 = arith.mulf %153, %154 : vector<128x128xf32>
    %156 = arith.addf %152, %155 : vector<128x128xf32>
    %157 = vector.broadcast %143 : vector<128x1xf32> to vector<128x128xf32>
    %158 = vector.broadcast %50 : vector<1x128xf32> to vector<128x128xf32>
    %159 = arith.mulf %157, %158 : vector<128x128xf32>
    %160 = arith.addf %156, %159 : vector<128x128xf32>
    %161 = arith.mulf %52, %160 : vector<128x128xf32>
    %162 = arith.addf %145, %161 : vector<128x128xf32>
    %163 = vector.broadcast %114 : vector<128x1xf32> to vector<128x128xf32>
    %164 = vector.broadcast %29 : vector<1x128xf32> to vector<128x128xf32>
    %165 = arith.mulf %163, %164 : vector<128x128xf32>
    %166 = vector.broadcast %124 : vector<128x1xf32> to vector<128x128xf32>
    %167 = vector.broadcast %36 : vector<1x128xf32> to vector<128x128xf32>
    %168 = arith.mulf %166, %167 : vector<128x128xf32>
    %169 = arith.addf %165, %168 : vector<128x128xf32>
    %170 = vector.broadcast %134 : vector<128x1xf32> to vector<128x128xf32>
    %171 = vector.broadcast %43 : vector<1x128xf32> to vector<128x128xf32>
    %172 = arith.mulf %170, %171 : vector<128x128xf32>
    %173 = arith.addf %169, %172 : vector<128x128xf32>
    %174 = vector.broadcast %144 : vector<128x1xf32> to vector<128x128xf32>
    %175 = vector.broadcast %50 : vector<1x128xf32> to vector<128x128xf32>
    %176 = arith.mulf %174, %175 : vector<128x128xf32>
    %177 = arith.addf %173, %176 : vector<128x128xf32>
    %178 = arith.mulf %79, %177 : vector<128x128xf32>
    %179 = arith.addf %162, %178 : vector<128x128xf32>
    %180 = vector.extract_strided_slice %20 {offsets = [0, 0], sizes = [128, 128], strides = [1, 1]} : vector<128x768xf32> to vector<128x128xf32>
    %c0_39 = arith.constant 0 : index
    %c0_40 = arith.constant 0 : index
    %181 = vector.load %arg7[%c0_39, %c0_40] : memref<128x128xf32, #tpu.memory_space<vmem>>, vector<128x128xf32>
    %cst_41 = arith.constant dense<0.000000e+00> : vector<128x128xf32>
    %182 = tpu.matmul %180, %181, %cst_41 {dimension_numbers = #tpu.dot_dimension_numbers<[1], [0], [0], [1], [0, 0, 1, 1], [], []>} : vector<128x128xf32>, vector<128x128xf32>, vector<128x128xf32> -> vector<128x128xf32>
    %c0_42 = arith.constant 0 : index
    %c0_43 = arith.constant 0 : index
    %183 = vector.load %arg8[%c0_42, %c0_43] : memref<128x128xf32, #tpu.memory_space<vmem>>, vector<128x128xf32>
    %cst_44 = arith.constant dense<0.000000e+00> : vector<128x128xf32>
    %184 = tpu.matmul %179, %183, %cst_44 {dimension_numbers = #tpu.dot_dimension_numbers<[1], [0], [0], [1], [0, 0, 1, 1], [], []>} : vector<128x128xf32>, vector<128x128xf32>, vector<128x128xf32> -> vector<128x128xf32>
    %185 = arith.addf %182, %184 : vector<128x128xf32>
    %cst_45 = arith.constant 0.000000e+00 : f32
    %186 = vector.broadcast %cst_45 : f32 to vector<128x128xf32>
    %187 = arith.maximumf %185, %186 : vector<128x128xf32>
    %c0_46 = arith.constant 0 : index
    %c0_47 = arith.constant 0 : index
    %188 = vector.load %arg9[%c0_46, %c0_47] : memref<1x128xf32, #tpu.memory_space<vmem>>, vector<1x128xf32>
    %189 = vector.broadcast %188 : vector<1x128xf32> to vector<128x128xf32>
    %190 = arith.mulf %187, %189 : vector<128x128xf32>
    %cst_48 = arith.constant dense<0.000000e+00> : vector<128xf32>
    %191 = vector.multi_reduction <add>, %190, %cst_48 [1] : vector<128x128xf32> to vector<128xf32>
    %192 = vector.shape_cast %191 : vector<128xf32> to vector<128x1xf32>
    %c0_49 = arith.constant 0 : index
    %c0_50 = arith.constant 0 : index
    %193 = vector.load %arg10[%c0_49, %c0_50] : memref<1x1xf32, #tpu.memory_space<vmem>>, vector<1x1xf32>
    %194 = vector.broadcast %193 : vector<1x1xf32> to vector<128x1xf32>
    %195 = arith.addf %192, %194 : vector<128x1xf32>
    %c0_51 = arith.constant 0 : index
    %c0_52 = arith.constant 0 : index
    %196 = vector.load %arg11[%c0_51, %c0_52] : memref<128x1xf32, #tpu.memory_space<vmem>>, vector<128x1xf32>
    tpu.vector_store %arg11[%c0_51, %c0_52], %195 {strides = array<i32>} : memref<128x1xf32, #tpu.memory_space<vmem>>, vector<128x1xf32>,
    return
  }
  func.func @transform_0(%arg0: i32) -> (i32, i32) {
    %c0_i32 = arith.constant 0 : i32
    %c0_i32_0 = arith.constant 0 : i32
    return %arg0, %c0_i32 : i32, i32
  }
  func.func @transform_1(%arg0: i32) -> (i32, i32) {
    %c0_i32 = arith.constant 0 : i32
    %c0_i32_0 = arith.constant 0 : i32
    %c0_i32_1 = arith.constant 0 : i32
    return %c0_i32, %c0_i32_0 : i32, i32
  }
  func.func @transform_2(%arg0: i32) -> (i32, i32) {
    %c0_i32 = arith.constant 0 : i32
    %c0_i32_0 = arith.constant 0 : i32
    %c0_i32_1 = arith.constant 0 : i32
    return %c0_i32, %c0_i32_0 : i32, i32
  }
  func.func @transform_3(%arg0: i32) -> (i32, i32) {
    %c0_i32 = arith.constant 0 : i32
    %c0_i32_0 = arith.constant 0 : i32
    %c0_i32_1 = arith.constant 0 : i32
    return %c0_i32, %c0_i32_0 : i32, i32
  }
  func.func @transform_4(%arg0: i32) -> (i32, i32) {
    %c0_i32 = arith.constant 0 : i32
    %c0_i32_0 = arith.constant 0 : i32
    %c0_i32_1 = arith.constant 0 : i32
    return %c0_i32, %c0_i32_0 : i32, i32
  }
  func.func @transform_5(%arg0: i32) -> (i32, i32) {
    %c0_i32 = arith.constant 0 : i32
    %c0_i32_0 = arith.constant 0 : i32
    %c0_i32_1 = arith.constant 0 : i32
    return %c0_i32, %c0_i32_0 : i32, i32
  }
  func.func @transform_6(%arg0: i32) -> (i32, i32) {
    %c0_i32 = arith.constant 0 : i32
    %c0_i32_0 = arith.constant 0 : i32
    %c0_i32_1 = arith.constant 0 : i32
    return %c0_i32, %c0_i32_0 : i32, i32
  }
  func.func @transform_7(%arg0: i32) -> (i32, i32) {
    %c0_i32 = arith.constant 0 : i32
    %c0_i32_0 = arith.constant 0 : i32
    %c0_i32_1 = arith.constant 0 : i32
    return %c0_i32, %c0_i32_0 : i32, i32
  }
  func.func @transform_8(%arg0: i32) -> (i32, i32) {
    %c0_i32 = arith.constant 0 : i32
    %c0_i32_0 = arith.constant 0 : i32
    %c0_i32_1 = arith.constant 0 : i32
    return %c0_i32, %c0_i32_0 : i32, i32
  }
  func.func @transform_9(%arg0: i32) -> (i32, i32) {
    %c0_i32 = arith.constant 0 : i32
    %c0_i32_0 = arith.constant 0 : i32
    %c0_i32_1 = arith.constant 0 : i32
    return %c0_i32, %c0_i32_0 : i32, i32
  }
  func.func @transform_10(%arg0: i32) -> (i32, i32) {
    %c0_i32 = arith.constant 0 : i32
    %c0_i32_0 = arith.constant 0 : i32
    return %arg0, %c0_i32 : i32, i32
  }
}

</mosaic_0001>

<bundles_post_ra>
// kernel: tpu_custom_call.1
= control target key start
LH: loop header
LB: loop body
LE: loop exit
PB: predicated region body
PF: predicated region fallthrough
CT: control target
= control target key end

     0   :  { %s9347_s0 = inlined_call_operand.hbm [shape: f32[256,128], index: 0, kind: input, shape index: {}]   ;;  %s9348_s1 = inlined_call_operand.hbm [shape: f32[128,384], index: 1, kind: input, shape index: {}]   ;;  %s9349_s2 = inlined_call_operand.hbm [shape: f32[1,384], index: 2, kind: input, shape index: {}]   ;;  %s9350_s3 = inlined_call_operand.hbm [shape: f32[384,768], index: 3, kind: input, shape index: {}]   ;;  %s9351_s4 = inlined_call_operand.hbm [shape: f32[1,768], index: 4, kind: input, shape index: {}]   ;;  %s9352_s5 = inlined_call_operand.hbm [shape: f32[1,768], index: 5, kind: input, shape index: {}]   ;;  %s9353_s6 = inlined_call_operand.hbm [shape: f32[128,128], index: 6, kind: input, shape index: {}]   ;;  %s9354_s7 = inlined_call_operand.hbm [shape: f32[128,128], index: 7, kind: input, shape index: {}]   ;;  %s9355_s8 = inlined_call_operand.hbm [shape: f32[1,128], index: 8, kind: input, shape index: {}]   ;;  %s9356_s9 = inlined_call_operand.<no memory space> [shape: f32[1,1], index: 9, kind: input, shape index: {}]   ;;  %s9357_s10 = inlined_call_operand.vmem [shape: f32[256,1], index: 10, kind: output, shape index: {}]  }
   0x1   :  { %9406 = sst [smem:[#allocation86_spill]] %s9357_s10  ;;  %v15_v0 = vstv %s9356_s9 }
   0x2   :  { %16 = vst [vmem:[#allocation2] sm:$0x1] %v15_v0 }
   0x3   :  { %17 = vsyncpa [#allocation4], 0 }
   0x4   :  { %19 = vsyncpa [#allocation4 + $0x1], 0 }
   0x5   :  { %20 = vsyncpa [#allocation6], 0 }
   0x6   :  { %21 = vsyncpa [#allocation9], 0 }
   0x7   :  { %22 = vsyncpa [#allocation12], 0 }
   0x8   :  { %23 = vsyncpa [#allocation15], 0  ;;  %s6469_s15 = smov 0   ;;  %s6471_s16 = smov 0  }
   0x9   :  { %s6473_s17 = smov 0   ;;  %s6475_s18 = smov 0  }
   0xa LB: > { %s6394_s9 = smov [#allocation5]   ;;  %s9358_s20 = sadd.s32 4294967295, %s6392_s18   ;;  %s6392_s18 = sphi %s6475_s18, %s9586_s18   ;;  %s6388_s17 = sphi %s6473_s17, %s9585_s17   ;;  %s6384_s16 = sphi %s6471_s16, %s9584_s16   ;;  %s6380_s15 = sphi %s6469_s15, %s9583_s15  }
   0xb   : > { %s287_s19 = sshll.u32 %s6394_s9, 4  ;;  %p4638_p0 = scmp.ge.s32.totalorder %s6392_s18, 1  ;;  %s6498_s19 = int_to_ptr.vmem [resolvable:$true] %s287_s19 }
   0xc   : > { %p6493_p1 = scmp.eq.s32.totalorder %s9358_s20, 0  ;;  %p275_p2 = scmp.lt.s32.totalorder %s6392_s18, 3 }
   0xd   : > { %s6395_s23 = smov [#allocation8]   ;;  %s6396_s26 = smov [#allocation11]  }
   0xe   : > { %s9407_s21 = scalar_select %p6493_p1, 1, 0 }
   0xf   : > { %p6500_p3 = pnand %p4638_p0, %p275_p2  ;;  %s311_s24 = sshll.u32 %s6395_s23, 4  ;;  %s6512_s24 = int_to_ptr.vmem [resolvable:$true] %s311_s24 }
  0x10   : > { %s6514_s27 = sshll.u32 %s6396_s26, 4  ;;  %s6088_s30 = scalar_lea.hbm %s9348_s1, 6144  ;;  %s337_s27 = int_to_ptr.vmem [resolvable:$true] %s6514_s27 }
  0x11   : > { %s9408_s22 = scalar_select %p6500_p3, 1, 0 }
  0x12   : > { %p5610_p4 = pneg %p6500_p3  ;;  %p6089_p6 = scmp.ne.s32.totalorder %s9348_s1, %s6088_s30 }
  0x13   : > { %p6095_p10 = scmp.lt.u32.totalorder %s6088_s30, %s9348_s1 }
  0x14   : > { %p6508_p5 = pnand %p5610_p4, %p6493_p1 }
  0x16   : > { %p6524_p7 = pneg %p6508_p5 }
  0x18   : > { %p6091_p8 = pnand %p6524_p7, %p6089_p6 }
  0x1a   : > { %p6092_p9 = pneg %p6091_p8 }
  0x1c   : > { %p6097_p11 = pnand %p6095_p10, %p6092_p9 }
  0x1e   : > { %6100 = shalt.err (!%p6097_p11)
}
  0x1f   : > { %s6101_s23 = scalar_lea.vmem %s6498_s19, 6144  ;;  %p6109_p2 = scmp.lt.s32.totalorder %s6498_s19, %s6498_s19 }
  0x20   : > { %p6102_p12 = scmp.ne.s32.totalorder %s6498_s19, %s6101_s23  ;;  %p6110_p4 = scmp.lt.s32.totalorder %s6101_s23, %s6101_s23 }
  0x22   : > { %p6104_p13 = pnand %p6102_p12, %p6524_p7  ;;  %p6111_p6 = por %p6110_p4, %p6109_p2 }
  0x24   : > { %p6105_p0 = pneg %p6104_p13 }
  0x26   : > { %p6112_p8 = pnand %p6111_p6, %p6105_p0 }
  0x28   : > { %6115 = shalt.err (!%p6112_p8)
}
  0x29   : > { %s6397_s26 = smov 384   ;;  %s6398_s28 = smov 24  }
  0x2a   : > { %5613 = dma.hbm_to_vmem [thread:$0]  (!%p6508_p5), %s9348_s1, 6144, %s6498_s19, [#allocation6], %s6397_s26, %s6397_s26, %s6398_s28  }
  0x2b   : > { %s6116_s14 = scalar_lea.hbm %s9350_s3, 36864 }
  0x2c   : > { %p6117_p9 = scmp.ne.s32.totalorder %s9350_s3, %s6116_s14  ;;  %p6123_p12 = scmp.lt.u32.totalorder %s6116_s14, %s9350_s3 }
  0x2e   : > { %p6119_p10 = pnand %p6117_p9, %p6524_p7 }
  0x30   : > { %p6120_p11 = pneg %p6119_p10 }
  0x32   : > { %p6125_p13 = pnand %p6123_p12, %p6120_p11 }
  0x34   : > { %6128 = shalt.err (!%p6125_p13)
}
  0x35   : > { %s6129_s19 = scalar_lea.vmem %s6512_s24, 36864  ;;  %p6137_p6 = scmp.lt.s32.totalorder %s6512_s24, %s6512_s24 }
  0x36   : > { %p6130_p0 = scmp.ne.s32.totalorder %s6512_s24, %s6129_s19  ;;  %p6138_p8 = scmp.lt.s32.totalorder %s6129_s19, %s6129_s19 }
  0x38   : > { %p6132_p2 = pnand %p6130_p0, %p6524_p7  ;;  %p6139_p9 = por %p6138_p8, %p6137_p6 }
  0x3a   : > { %p6133_p4 = pneg %p6132_p2 }
  0x3c   : > { %p6140_p10 = pnand %p6139_p9, %p6133_p4 }
  0x3e   : > { %6143 = shalt.err (!%p6140_p10)
}
  0x3f   : > { %s6399_s20 = smov 768   ;;  %s6400_s10 = smov 48  }
  0x40   : > { %5619 = dma.hbm_to_vmem [thread:$0]  (!%p6508_p5), %s9350_s3, 36864, %s6512_s24, [#allocation9], %s6399_s20, %s6399_s20, %s6400_s10  }
  0x41   : > { %s6144_s11 = scalar_lea.hbm %s9352_s5, 96 }
  0x42   : > { %p6145_p11 = scmp.ne.s32.totalorder %s9352_s5, %s6144_s11  ;;  %p6151_p0 = scmp.lt.u32.totalorder %s6144_s11, %s9352_s5 }
  0x44   : > { %p6147_p12 = pnand %p6145_p11, %p6524_p7 }
  0x46   : > { %p6148_p13 = pneg %p6147_p12 }
  0x48   : > { %p6153_p2 = pnand %p6151_p0, %p6148_p13 }
  0x4a   : > { %6156 = shalt.err (!%p6153_p2)
}
  0x4b   : > { %s6157_s19 = scalar_lea.vmem %s337_s27, 96  ;;  %p6165_p9 = scmp.lt.s32.totalorder %s337_s27, %s337_s27 }
  0x4c   : > { %p6158_p4 = scmp.ne.s32.totalorder %s337_s27, %s6157_s19  ;;  %p6166_p10 = scmp.lt.s32.totalorder %s6157_s19, %s6157_s19 }
  0x4e   : > { %p6160_p6 = pnand %p6158_p4, %p6524_p7  ;;  %p6167_p3 = por %p6166_p10, %p6165_p9 }
  0x50   : > { %p6161_p8 = pneg %p6160_p6 }
  0x52   : > { %p6168_p1 = pnand %p6167_p3, %p6161_p8 }
  0x54   : > { %6171 = shalt.err (!%p6168_p1)
}
  0x55   : > { %5625 = dma.hbm_to_vmem [thread:$0]  (!%p6508_p5), %s9352_s5, 96, %s337_s27, [#allocation12]  }
  0x56   : > { %s6401_s10 = smov [#allocation14]   ;;  %s6402_s28 = smov [#allocation7]  }
  0x57   : > { %s359_s26 = sshll.u32 %s6401_s10, 4  ;;  %s301_s29 = sshll.u32 %s6402_s28, 4  ;;  %s360_s26 = int_to_ptr.vmem [resolvable:$true] %s359_s26  ;;  %s302_s29 = int_to_ptr.vmem [resolvable:$true] %s301_s29 }
  0x58   : > { %s6172_s12 = scalar_lea.hbm %s9354_s7, 2048 }
  0x59   : > { %p6173_p1 = scmp.ne.s32.totalorder %s9354_s7, %s6172_s12  ;;  %p6179_p12 = scmp.lt.u32.totalorder %s6172_s12, %s9354_s7 }
  0x5b   : > { %p6175_p3 = pnand %p6173_p1, %p6524_p7 }
  0x5d   : > { %p6176_p11 = pneg %p6175_p3 }
  0x5f   : > { %p6181_p13 = pnand %p6179_p12, %p6176_p11 }
  0x61   : > { %6184 = shalt.err (!%p6181_p13)
}
  0x62   : > { %s6185_s27 = scalar_lea.vmem %s360_s26, 2048  ;;  %p6193_p6 = scmp.lt.s32.totalorder %s360_s26, %s360_s26 }
  0x63   : > { %p6186_p0 = scmp.ne.s32.totalorder %s360_s26, %s6185_s27  ;;  %p6194_p8 = scmp.lt.s32.totalorder %s6185_s27, %s6185_s27 }
  0x65   : > { %p6188_p2 = pnand %p6186_p0, %p6524_p7  ;;  %p6195_p9 = por %p6194_p8, %p6193_p6 }
  0x67   : > { %p6189_p4 = pneg %p6188_p2 }
  0x69   : > { %p6196_p10 = pnand %p6195_p9, %p6189_p4 }
  0x6b   : > { %6199 = shalt.err (!%p6196_p10)
}
  0x6c   : > { %s9362_s24 = smov 128   ;;  %s6404_s20 = smov 8  }
  0x6d   : > { %5631 = dma.hbm_to_vmem [thread:$0]  (!%p6508_p5), %s9354_s7, 2048, %s360_s26, [#allocation15], %s9362_s24, %s9362_s24, %s6404_s20  }
  0x6e   : > { %s6200_s12 = scalar_lea.hbm %s9349_s2, 48 }
  0x6f   : > { %p6201_p1 = scmp.ne.s32.totalorder %s9349_s2, %s6200_s12  ;;  %p6207_p12 = scmp.lt.u32.totalorder %s6200_s12, %s9349_s2 }
  0x71   : > { %p6203_p3 = pnand %p6201_p1, %p6524_p7 }
  0x73   : > { %p6204_p11 = pneg %p6203_p3 }
  0x75   : > { %p6209_p13 = pnand %p6207_p12, %p6204_p11 }
  0x77   : > { %6212 = shalt.err (!%p6209_p13)
}
  0x78   : > { %s6213_s27 = scalar_lea.vmem %s302_s29, 48  ;;  %s6220_s26 = scalar_lea.vmem %s302_s29, 64 }
  0x79   : > { %p6214_p0 = scmp.ne.s32.totalorder %s302_s29, %s6213_s27  ;;  %p6221_p6 = scmp.lt.s32.totalorder %s302_s29, %s302_s29 }
  0x7a   : > { %p6222_p8 = scmp.lt.s32.totalorder %s6220_s26, %s6213_s27 }
  0x7b   : > { %p6216_p2 = pnand %p6214_p0, %p6524_p7 }
  0x7c   : > { %p6223_p9 = por %p6222_p8, %p6221_p6 }
  0x7d   : > { %p6217_p4 = pneg %p6216_p2 }
  0x7f   : > { %p6224_p10 = pnand %p6223_p9, %p6217_p4 }
  0x81   : > { %6227 = shalt.err (!%p6224_p10)
}
  0x82   : > { %5616 = dma.hbm_to_vmem [thread:$0]  (!%p6508_p5), %s9349_s2, 48, %s302_s29, [#allocation6]  }
  0x83   : > { %s6405_s30 = smov [#allocation10]   ;;  %s6406_s12 = smov [#allocation13]  }
  0x84   : > { %s325_s11 = sshll.u32 %s6405_s30, 4  ;;  %s346_s14 = sshll.u32 %s6406_s12, 4  ;;  %s326_s11 = int_to_ptr.vmem [resolvable:$true] %s325_s11  ;;  %s347_s14 = int_to_ptr.vmem [resolvable:$true] %s346_s14 }
  0x85   : > { %s6228_s19 = scalar_lea.hbm %s9351_s4, 96 }
  0x86   : > { %p6229_p1 = scmp.ne.s32.totalorder %s9351_s4, %s6228_s19  ;;  %p6235_p12 = scmp.lt.u32.totalorder %s6228_s19, %s9351_s4 }
  0x88   : > { %p6231_p3 = pnand %p6229_p1, %p6524_p7 }
  0x8a   : > { %p6232_p11 = pneg %p6231_p3 }
  0x8c   : > { %p6237_p13 = pnand %p6235_p12, %p6232_p11 }
  0x8e   : > { %6240 = shalt.err (!%p6237_p13)
}
  0x8f   : > { %s6241_s29 = scalar_lea.vmem %s326_s11, 96  ;;  %p6249_p6 = scmp.lt.s32.totalorder %s326_s11, %s326_s11 }
  0x90   : > { %p6242_p0 = scmp.ne.s32.totalorder %s326_s11, %s6241_s29  ;;  %p6250_p8 = scmp.lt.s32.totalorder %s6241_s29, %s6241_s29 }
  0x92   : > { %p6244_p2 = pnand %p6242_p0, %p6524_p7  ;;  %p6251_p9 = por %p6250_p8, %p6249_p6 }
  0x94   : > { %p6245_p4 = pneg %p6244_p2 }
  0x96   : > { %p6252_p10 = pnand %p6251_p9, %p6245_p4 }
  0x98   : > { %6255 = shalt.err (!%p6252_p10)
}
  0x99   : > { %5622 = dma.hbm_to_vmem [thread:$0]  (!%p6508_p5), %s9351_s4, 96, %s326_s11, [#allocation9]  }
  0x9a   : > { %s6256_s9 = scalar_lea.hbm %s9353_s6, 2048 }
  0x9b   : > { %p6257_p1 = scmp.ne.s32.totalorder %s9353_s6, %s6256_s9  ;;  %p6263_p12 = scmp.lt.u32.totalorder %s6256_s9, %s9353_s6 }
  0x9d   : > { %p6259_p3 = pnand %p6257_p1, %p6524_p7 }
  0x9f   : > { %p6260_p11 = pneg %p6259_p3 }
  0xa1   : > { %p6265_p13 = pnand %p6263_p12, %p6260_p11 }
  0xa3   : > { %6268 = shalt.err (!%p6265_p13)
}
  0xa4   : > { %s6269_s10 = scalar_lea.vmem %s347_s14, 2048  ;;  %p6277_p6 = scmp.lt.s32.totalorder %s347_s14, %s347_s14 }
  0xa5   : > { %p6270_p0 = scmp.ne.s32.totalorder %s347_s14, %s6269_s10  ;;  %p6278_p8 = scmp.lt.s32.totalorder %s6269_s10, %s6269_s10 }
  0xa7   : > { %p6272_p2 = pnand %p6270_p0, %p6524_p7  ;;  %p6279_p9 = por %p6278_p8, %p6277_p6 }
  0xa9   : > { %p6273_p4 = pneg %p6272_p2 }
  0xab   : > { %p6280_p10 = pnand %p6279_p9, %p6273_p4 }
  0xad   : > { %6283 = shalt.err (!%p6280_p10)
}
  0xae   : > { %s9411_s11 = smov 128   ;;  %s6407_s30 = smov [#allocation16]  }
  0xaf   : > { %5628 = dma.hbm_to_vmem [thread:$0]  (!%p6508_p5), %s9353_s6, 2048, %s347_s14, [#allocation12], %s9411_s11, %s9411_s11, %s6404_s20  }
  0xb0   : > { %s373_s24 = sshll.u32 %s6407_s30, 4  ;;  %s6284_s23 = scalar_lea.hbm %s9355_s8, 16  ;;  %s374_s24 = int_to_ptr.vmem [resolvable:$true] %s373_s24 }
  0xb1   : > { %p6285_p1 = scmp.ne.s32.totalorder %s9355_s8, %s6284_s23  ;;  %p6291_p12 = scmp.lt.u32.totalorder %s6284_s23, %s9355_s8 }
  0xb3   : > { %p6287_p3 = pnand %p6285_p1, %p6524_p7 }
  0xb5   : > { %p6288_p11 = pneg %p6287_p3 }
  0xb7   : > { %p6293_p13 = pnand %p6291_p12, %p6288_p11 }
  0xb9   : > { %6296 = shalt.err (!%p6293_p13)
}
  0xba   : > { %s6297_s14 = scalar_lea.vmem %s374_s24, 16  ;;  %s6304_s29 = scalar_lea.vmem %s374_s24, 32 }
  0xbb   : > { %p6298_p0 = scmp.ne.s32.totalorder %s374_s24, %s6297_s14  ;;  %p6305_p6 = scmp.lt.s32.totalorder %s374_s24, %s374_s24 }
  0xbc   : > { %p6306_p8 = scmp.lt.s32.totalorder %s6304_s29, %s6297_s14 }
  0xbd   : > { %p6300_p2 = pnand %p6298_p0, %p6524_p7 }
  0xbe   : > { %p6307_p9 = por %p6306_p8, %p6305_p6 }
  0xbf   : > { %p6301_p4 = pneg %p6300_p2 }
  0xc1   : > { %p6308_p10 = pnand %p6307_p9, %p6301_p4 }
  0xc3   : > { %6311 = shalt.err (!%p6308_p10)
}
  0xc4   : > { %5634 = dma.hbm_to_vmem [thread:$0]  (!%p6508_p5), %s9355_s8, 16, %s374_s24, [#allocation15]  }
  0xc5   : > { %s6684_s13 = sadd.s32 1, %s6392_s18   ;;  %s36_s25 = sadd.s32 1, %s6388_s17 }
  0xc6   : > { %s33_s12 = ssub.s32 %s6392_s18, %s6684_s13  ;;  %p43_p7 = scmp.ne.s32.totalorder %s6388_s17, %s6384_s16 }
  0xc7   : > { %p34_p1 = scmp.eq.s32.totalorder %s33_s12, 0  ;;  %p44_p3 = scmp.eq.s32.totalorder %s6392_s18, 0 }
  0xc8   : > { %p49_p11 = scmp.ne.s32.totalorder %s6384_s16, %s6380_s15  ;;  %p5647_p12 = scmp.lt.s32.totalorder %s6392_s18, 2 }
  0xc9   : > { %s6696_s9 = scalar_select %p34_p1, %s6388_s17, %s36_s25  }
  0xca   : > { %p45_p13 = por %p44_p3, %p43_p7  ;;  %p9412_p0 = scmp.ne.s32.totalorder %s9407_s21, 0 }
  0xcb   : > { %s387_s19 = sand.u32 1, %s6388_s17   ;;  %s4671_s24 = sshll.u32 %s6392_s18, 11 }
  0xcc   : > { %p6700_p2 = por %p9412_p0, %p49_p11  ;;  %s4648_s27 = sshll.u32 %s387_s19, 7 }
  0xcd   : > { %s6709_s14 = scalar_lea.hbm %s9347_s0, %s4671_s24  ;;  %s391_s15 = scalar_lea.vmem [#allocation3], %s4648_s27 }
  0xce   : > { %s398_s29 = sshll.u32 %s391_s15, 4  ;;  %p6711_p5 = pnand %p5647_p12, %p45_p13  ;;  %s6715_s29 = int_to_ptr.vmem [resolvable:$true] %s398_s29 }
  0xcf   : > { %s6717_s30 = scalar_lea.sflag [#allocation4], %s387_s19  ;;  %s6312_s25 = scalar_lea.hbm %s6709_s14, 2048 }
  0xd0   : > { %p6313_p4 = scmp.ne.s32.totalorder %s6709_s14, %s6312_s25  ;;  %p6314_p6 = pneg %p6711_p5 }
  0xd1   : > { %s6317_s27 = scalar_lea.hbm %s9347_s0, 4096  ;;  %p6318_p10 = scmp.lt.u32.totalorder %s6709_s14, %s9347_s0 }
  0xd2   : > { %p6315_p8 = pnand %p6314_p6, %p6313_p4  ;;  %p6319_p7 = scmp.lt.u32.totalorder %s6317_s27, %s6312_s25 }
  0xd3   : > { %p6321_p3 = scmp.lt.u32.totalorder %s6312_s25, %s6709_s14 }
  0xd4   : > { %p6316_p9 = pneg %p6315_p8  ;;  %p6320_p1 = por %p6319_p7, %p6318_p10 }
  0xd6   : > { %p6322_p11 = por %p6321_p3, %p6320_p1 }
  0xd8   : > { %p6323_p12 = pnand %p6322_p11, %p6316_p9 }
  0xda   : > { %6326 = shalt.err (!%p6323_p12)
}
  0xdb   : > { %s6327_s19 = scalar_lea.vmem %s6715_s29, 2048  ;;  %s6408_s15 = smov [#allocation3]  }
  0xdc   : > { %p6328_p13 = scmp.ne.s32.totalorder %s6715_s29, %s6327_s19  ;;  %s6332_s12 = sshll.u32 %s6408_s15, 4  ;;  %s6333_s12 = int_to_ptr.vmem [resolvable:$false] %s6332_s12 }
  0xdd   : > { %s6334_s24 = scalar_lea.vmem %s6333_s12, 4096  ;;  %p6335_p8 = scmp.lt.s32.totalorder %s6715_s29, %s6333_s12 }
  0xde   : > { %p6330_p0 = pnand %p6328_p13, %p6314_p6  ;;  %p6336_p10 = scmp.lt.s32.totalorder %s6334_s24, %s6327_s19 }
  0xe0   : > { %p6331_p4 = pneg %p6330_p0  ;;  %p6337_p7 = por %p6336_p10, %p6335_p8 }
  0xe2   : > { %p6338_p1 = pnand %p6337_p7, %p6331_p4 }
  0xe4   : > { %6341 = shalt.err (!%p6338_p1)
}
  0xe5   : > { %5638 = dma.hbm_to_vmem [thread:$0]  (!%p6711_p5), %s6709_s14, 2048, %s6715_s29, %s6717_s30, %s9411_s11, %s9411_s11, %s6404_s20  }
  0xe6   : > { %p9415_p6 = scmp.ne.s32.totalorder %s9408_s22, 0 }
  0xe8   : > { %410 = sbr.rel (%p9415_p6) target bundleno = 1687 (0x697), region = 60 }
  0xef   : > { %s412_s25 = sand.u32 1, %s6384_s16  }
  0xf0   : > { %s4652_s27 = sshll.u32 %s412_s25, 7  ;;  %s413_s26 = scalar_lea.sflag [#allocation4], %s412_s25 }
  0xf1   : > { %s6751_s10 = scalar_lea.vmem [#allocation3], %s4652_s27 }
  0xf2   : > { %6359 = dma.done.wait (%p6700_p2), %s413_s26, 2048  }
  0xf3   : > { %6361 = vsyncadd (%p6700_p2), %s413_s26, 4294965248  ;;  %p9416_p9 = scmp.ne.s32.totalorder %s9407_s21, 0 }
  0xf5   : > { %6363 = dma.done.wait (%p9416_p9), [#allocation6], 6192  }
  0xf6   : > { %6365 = vsyncadd (%p9416_p9), [#allocation6], 4294961104 }
  0xf7   : > { %6367 = dma.done.wait (%p9416_p9), [#allocation9], 36960  }
  0xf8   : > { %6369 = vsyncadd (%p9416_p9), [#allocation9], 4294930336 }
  0xf9   : > { %6371 = dma.done.wait (%p9416_p9), [#allocation12], 2144  }
  0xfa   : > { %6373 = vsyncadd (%p9416_p9), [#allocation12], 4294965152 }
  0xfb   : > { %6375 = dma.done.wait (%p9416_p9), [#allocation15], 2064  }
  0xfc   : > { %6377 = vsyncadd (%p9416_p9), [#allocation15], 4294965232  ;;  %v9367_v1 = vmov 0.0   ;;  %v509_v2 = vld [vmem:[#allocation5 + $0x8] sm:$0xff]  ;;  %v512_v3 = vld [vmem:[#allocation5 + $0x20] sm:$0xff]  ;;  %s9581_s21 = sadd.s32 4294967295, %s6392_s18  }
  0xfd   : > { %637 = vmatprep.mubr.f32.mxu0 %v9367_v1  ;;  %v510_v4 = vld [vmem:[#allocation5 + $0x10] sm:$0xff]  ;;  %v4936_v5 = vpack.c.bf16 %v512_v3, %v509_v2  ;;  %v513_v6 = vld [vmem:[#allocation5 + $0x28] sm:$0xff]  ;;  %v508_v7 = vld [vmem:[#allocation5] sm:$0xff]  ;;  %s4661_s22 = sshll.u32 %s9581_s21, 4  ;;  %s9582_s14 = sld [smem:[#allocation86_spill]]  ;;  %vm4476_vm15 = vcmask 7168  }
  0xfe   : > { %v511_v8 = vld [vmem:[#allocation5 + $0x18] sm:$0xff]  ;;  %v4968_v9 = vpack.c.bf16 %v513_v6, %v510_v4  ;;  %v518_v12 = vld [vmem:[#allocation5 + $0x50] sm:$0xff]  ;;  %v516_v13 = vld [vmem:[#allocation5 + $0x40] sm:$0xff]  ;;  %p487_p2 = scmp.lt.s32.totalorder %s4661_s22, 31 }
  0xff   : > { %v4938_v10 = vpack.c.bf16 %v511_v8, %v508_v7  ;;  %v515_v11 = vld [vmem:[#allocation5 + $0x38] sm:$0xff]  ;;  %4937 = vmatprep.subr.bf16.mxu0 %v4936_v5  ;;  %v514_v16 = vld [vmem:[#allocation5 + $0x30] sm:$0xff]  ;;  %v517_v17 = vld [vmem:[#allocation5 + $0x48] sm:$0xff] }
 0x100   : > { %v4940_v14 = vpack.c.bf16 %v518_v12, %v515_v11  ;;  %v519_v15 = vld [vmem:[#allocation5 + $0x58] sm:$0xff]  ;;  %4969 = vmatprep.subr.bf16.mxu1 %v4968_v9  ;;  %v4942_v19 = vpack.c.bf16 %v517_v17, %v514_v16  ;;  %v521_v20 = vld [vmem:[#allocation5 + $0x68] sm:$0xff]  ;;  %v524_v21 = vld [vmem:[#allocation5 + $0x80] sm:$0xff]  ;;  %s9588_s22 = smov (!%p487_p2, %s4661_s22), 31 }
 0x101   : > { %4939 = vmatpush1.bf16.msra.mxu0 %v4938_v10  ;;  %v4972_v18 = vpack.c.bf16 %v519_v15, %v516_v13  ;;  %v522_v22 = vld [vmem:[#allocation5 + $0x70] sm:$0xff]  ;;  %4971 = vmatpush3.bf16.msra.mxu1 %v4968_v9  ;;  %v4944_v23 = vpack.c.bf16 %v524_v21, %v521_v20  ;;  %v525_v24 = vld [vmem:[#allocation5 + $0x88] sm:$0xff]  ;;  %v520_v25 = vld [vmem:[#allocation5 + $0x60] sm:$0xff]  ;;  %s4662_s20 = sshll.u32 %s9588_s22, 3 }
 0x102   : > { %4941 = vmatprep.subr.bf16.mxu0 %v4940_v14  ;;  %v523_v26 = vld [vmem:[#allocation5 + $0x78] sm:$0xff]  ;;  %v4976_v27 = vpack.c.bf16 %v525_v24, %v522_v22  ;;  %v530_v29 = vld [vmem:[#allocation5 + $0xb0] sm:$0xff]  ;;  %v528_v30 = vld [vmem:[#allocation5 + $0xa0] sm:$0xff] }
 0x103   : > { %4973 = vmatprep.subr.bf16.mxu1 %v4972_v18  ;;  %v527_v28 = vld [vmem:[#allocation5 + $0x98] sm:$0xff]  ;;  %v4946_v32 = vpack.c.bf16 %v523_v26, %v520_v25  ;;  %v526_v34 = vld [vmem:[#allocation5 + $0x90] sm:$0xff]  ;;  %v529_v35 = vld [vmem:[#allocation5 + $0xa8] sm:$0xff]  ;;  %s9276_s29 = scalar_lea.vmem %s9582_s14, %s4662_s20 }
 0x104   : > { %v531_v31 = vld [vmem:[#allocation5 + $0xb8] sm:$0xff]  ;;  %v4948_v33 = vpack.c.bf16 %v530_v29, %v527_v28  ;;  %v533_v37 = vld [vmem:[#allocation5 + $0xc8] sm:$0xff]  ;;  %v536_v38 = vld [vmem:[#allocation5 + $0xe0] sm:$0xff]  ;;  %v4950_v41 = vpack.c.bf16 %v529_v35, %v526_v34 }
 0x105   : > { %4943 = vmatpush1.bf16.msra.mxu0 %v4942_v19  ;;  %4975 = vmatpush3.bf16.msra.mxu1 %v4972_v18  ;;  %v4980_v36 = vpack.c.bf16 %v531_v31, %v528_v30  ;;  %v534_v39 = vld [vmem:[#allocation5 + $0xd0] sm:$0xff]  ;;  %v537_v40 = vld [vmem:[#allocation5 + $0xe8] sm:$0xff]  ;;  %v4952_v42 = vpack.c.bf16 %v536_v38, %v533_v37  ;;  %v532_v43 = vld [vmem:[#allocation5 + $0xc0] sm:$0xff] }
 0x106   : > { %4945 = vmatprep.subr.bf16.mxu0 %v4944_v23  ;;  %4977 = vmatprep.subr.bf16.mxu1 %v4976_v27  ;;  %v535_v44 = vld [vmem:[#allocation5 + $0xd8] sm:$0xff]  ;;  %v4984_v45 = vpack.c.bf16 %v537_v40, %v534_v39  ;;  %v542_v47 = vld [vmem:[#allocation5 + $0x110] sm:$0xff]  ;;  %v540_v48 = vld [vmem:[#allocation5 + $0x100] sm:$0xff] }
 0x107   : > { %v539_v46 = vld [vmem:[#allocation5 + $0xf8] sm:$0xff]  ;;  %v4954_v50 = vpack.c.bf16 %v535_v44, %v532_v43  ;;  %v492_v51 = vld [vmem:[%s6751_s10] sm:$0xff]  ;;  %v538_v53 = vld [vmem:[#allocation5 + $0xf0] sm:$0xff] }
 0x108   : > { %v543_v49 = vld [vmem:[#allocation5 + $0x118] sm:$0xff]  ;;  %v4956_v52 = vpack.c.bf16 %v542_v47, %v539_v46  ;;  %v541_v54 = vld [vmem:[#allocation5 + $0x108] sm:$0xff]  ;;  %v548_v57 = vld [vmem:[#allocation5 + $0x140] sm:$0xff]  ;;  %4800 = vmatprep.mubr.f32.mxu1 %v492_v51 }
 0x109   : > { %4947 = vmatpush1.bf16.msra.mxu0 %v4946_v32  ;;  %4979 = vmatpush3.bf16.msra.mxu1 %v4976_v27  ;;  %v4988_v55 = vpack.c.bf16 %v543_v49, %v540_v48  ;;  %v545_v56 = vld [vmem:[#allocation5 + $0x128] sm:$0xff]  ;;  %v546_v58 = vld [vmem:[#allocation5 + $0x130] sm:$0xff]  ;;  %v4958_v60 = vpack.c.bf16 %v541_v54, %v538_v53  ;;  %v544_v62 = vld [vmem:[#allocation5 + $0x120] sm:$0xff] }
 0x10a   : > { %4949 = vmatprep.subr.bf16.mxu0 %v4948_v33  ;;  %4981 = vmatprep.subr.bf16.mxu1 %v4980_v36  ;;  %v549_v59 = vld [vmem:[#allocation5 + $0x148] sm:$0xff]  ;;  %v4960_v61 = vpack.c.bf16 %v548_v57, %v545_v56  ;;  %v547_v63 = vld [vmem:[#allocation5 + $0x138] sm:$0xff]  ;;  %v554_v3 = vld [vmem:[#allocation5 + $0x170] sm:$0xff] }
 0x10b   : > { %v4992_v0 = vpack.c.bf16 %v549_v59, %v546_v58  ;;  %v551_v2 = vld [vmem:[#allocation5 + $0x158] sm:$0xff]  ;;  %v552_v4 = vld [vmem:[#allocation5 + $0x160] sm:$0xff]  ;;  %v4962_v6 = vpack.c.bf16 %v547_v63, %v544_v62  ;;  %v550_v8 = vld [vmem:[#allocation5 + $0x150] sm:$0xff] }
 0x10c   : > { %v555_v5 = vld [vmem:[#allocation5 + $0x178] sm:$0xff]  ;;  %v4964_v7 = vpack.c.bf16 %v554_v3, %v551_v2  ;;  %v553_v9 = vld [vmem:[#allocation5 + $0x168] sm:$0xff]  ;;  %v494_v20 = vld [vmem:[%s6751_s10 + $0x10] sm:$0xff] }
 0x10d   : > { %4951 = vmatpush1.bf16.msra.mxu0 %v4950_v41  ;;  %4983 = vmatpush3.bf16.msra.mxu1 %v4980_v36  ;;  %v4996_v10 = vpack.c.bf16 %v555_v5, %v552_v4  ;;  %v928_v11 = vld [vmem:[#allocation8 + $0x8] sm:$0xff]  ;;  %v934_v12 = vld [vmem:[#allocation8 + $0x38] sm:$0xff]  ;;  %v4966_v13 = vpack.c.bf16 %v553_v9, %v550_v8  ;;  %v927_v15 = vld [vmem:[#allocation8] sm:$0xff] }
 0x10e   : > { %4953 = vmatprep.subr.bf16.mxu0 %v4952_v42  ;;  %4985 = vmatprep.subr.bf16.mxu1 %v4984_v45  ;;  %v5000_v14 = vpack.c.bf16 %v934_v12, %v928_v11  ;;  %v933_v16 = vld [vmem:[#allocation8 + $0x30] sm:$0xff]  ;;  %v940_v17 = vld [vmem:[#allocation8 + $0x68] sm:$0xff]  ;;  %v946_v18 = vld [vmem:[#allocation8 + $0x98] sm:$0xff] }
 0x10f   : > { %v493_v19 = vld [vmem:[%s6751_s10 + $0x8] sm:$0xff]  ;;  %v5002_v22 = vpack.c.bf16 %v933_v16, %v927_v15  ;;  %v945_v24 = vld [vmem:[#allocation8 + $0x90] sm:$0xff]  ;;  %v1126_v25 = vld [vmem:[#allocation8 + $0x638] sm:$0xff]  ;;  %v5004_v26 = vpack.c.bf16 %v946_v18, %v940_v17 }
 0x110   : > { %v1120_v21 = vld [vmem:[#allocation8 + $0x608] sm:$0xff]  ;;  %v939_v23 = vld [vmem:[#allocation8 + $0x60] sm:$0xff]  ;;  %v1125_v30 = vld [vmem:[#allocation8 + $0x630] sm:$0xff] }
 0x111   : > { %4955 = vmatpush1.bf16.msra.mxu0 %v4954_v50  ;;  %4987 = vmatpush3.bf16.msra.mxu1 %v4984_v45  ;;  %v952_v27 = vld [vmem:[#allocation8 + $0xc8] sm:$0xff]  ;;  %v5064_v28 = vpack.c.bf16 %v1126_v25, %v1120_v21  ;;  %v1119_v29 = vld [vmem:[#allocation8 + $0x600] sm:$0xff]  ;;  %v958_v31 = vld [vmem:[#allocation8 + $0xf8] sm:$0xff]  ;;  %v5006_v38 = vpack.c.bf16 %v945_v24, %v939_v23 }
 0x112   : > { %4957 = vmatprep.subr.bf16.mxu0 %v4956_v52  ;;  %4989 = vmatprep.subr.bf16.mxu1 %v4988_v55  ;;  %v5066_v32 = vpack.c.bf16 %v1125_v30, %v1119_v29  ;;  %v1132_v33 = vld [vmem:[#allocation8 + $0x668] sm:$0xff]  ;;  %v1138_v34 = vld [vmem:[#allocation8 + $0x698] sm:$0xff]  ;;  %v1131_v35 = vld [vmem:[#allocation8 + $0x660] sm:$0xff]  ;;  %v5008_v40 = vpack.c.bf16 %v958_v31, %v952_v27 }
 0x113   : > { %v495_v36 = vld [vmem:[%s6751_s10 + $0x18] sm:$0xff]  ;;  %v6780_v37 = vld [vmem:[%s6751_s10 + $0x20] sm:$0xff]  ;;  %v964_v43 = vld [vmem:[#allocation8 + $0x128] sm:$0xff]  ;;  %v5068_v44 = vpack.c.bf16 %v1138_v34, %v1132_v33 }
 0x114   : > { %v1137_v39 = vld [vmem:[#allocation8 + $0x690] sm:$0xff]  ;;  %v951_v41 = vld [vmem:[#allocation8 + $0xc0] sm:$0xff]  ;;  %v970_v45 = vld [vmem:[#allocation8 + $0x158] sm:$0xff] }
 0x115   : > { %4959 = vmatpush1.bf16.msra.mxu0 %v4958_v60  ;;  %4991 = vmatpush3.bf16.msra.mxu1 %v4988_v55  ;;  %v957_v42 = vld [vmem:[#allocation8 + $0xf0] sm:$0xff]  ;;  %v5070_v46 = vpack.c.bf16 %v1137_v39, %v1131_v35  ;;  %v1144_v47 = vld [vmem:[#allocation8 + $0x6c8] sm:$0xff]  ;;  %v1150_v48 = vld [vmem:[#allocation8 + $0x6f8] sm:$0xff]  ;;  %v5012_v54 = vpack.c.bf16 %v970_v45, %v964_v43 }
 0x116   : > { %4961 = vmatprep.subr.bf16.mxu0 %v4960_v61  ;;  %4993 = vmatprep.subr.bf16.mxu1 %v4992_v0  ;;  %v1143_v49 = vld [vmem:[#allocation8 + $0x6c0] sm:$0xff]  ;;  %v1149_v50 = vld [vmem:[#allocation8 + $0x6f0] sm:$0xff]  ;;  %v5010_v53 = vpack.c.bf16 %v957_v42, %v951_v41  ;;  %v976_v57 = vld [vmem:[#allocation8 + $0x188] sm:$0xff]  ;;  %v5072_v58 = vpack.c.bf16 %v1150_v48, %v1144_v47 }
 0x117   : > { %v6788_v52 = vld [vmem:[%s6751_s10 + $0x30] sm:$0xff]  ;;  %v963_v55 = vld [vmem:[#allocation8 + $0x120] sm:$0xff]  ;;  %v982_v59 = vld [vmem:[#allocation8 + $0x1b8] sm:$0xff]  ;;  %v5074_v60 = vpack.c.bf16 %v1149_v50, %v1143_v49 }
 0x118   : > { %v969_v56 = vld [vmem:[#allocation8 + $0x150] sm:$0xff]  ;;  %v1156_v61 = vld [vmem:[#allocation8 + $0x728] sm:$0xff]  ;;  %v1162_v62 = vld [vmem:[#allocation8 + $0x758] sm:$0xff]  ;;  %v5016_v5 = vpack.c.bf16 %v982_v59, %v976_v57 }
 0x119   : > { %4963 = vmatpush1.bf16.msra.mxu0 %v4962_v6  ;;  %4995 = vmatpush3.bf16.msra.mxu1 %v4992_v0  ;;  %v1155_v63 = vld [vmem:[#allocation8 + $0x720] sm:$0xff]  ;;  %v1161_v0 = vld [vmem:[#allocation8 + $0x750] sm:$0xff]  ;;  %v5014_v4 = vpack.c.bf16 %v969_v56, %v963_v55  ;;  %v988_v8 = vld [vmem:[#allocation8 + $0x1e8] sm:$0xff]  ;;  %v5076_v9 = vpack.c.bf16 %v1162_v62, %v1156_v61 }
 0x11a   : > { %4965 = vmatprep.subr.bf16.mxu0 %v4964_v7  ;;  %4997 = vmatprep.subr.bf16.mxu1 %v4996_v10  ;;  %v6794_v2 = vld [vmem:[%s6751_s10 + $0x38] sm:$0xff]  ;;  %v6797_v3 = vld [vmem:[%s6751_s10 + $0x40] sm:$0xff]  ;;  %v5078_v11 = vpack.c.bf16 %v1161_v0, %v1155_v63  ;;  %v1168_v12 = vld [vmem:[#allocation8 + $0x788] sm:$0xff] }
 0x11b   : > { %v975_v6 = vld [vmem:[#allocation8 + $0x180] sm:$0xff]  ;;  %v981_v7 = vld [vmem:[#allocation8 + $0x1b0] sm:$0xff]  ;;  %v1006_v24 = vld [vmem:[#allocation8 + $0x278] sm:$0xff] }
 0x11c   : > { %v1173_v15 = vld [vmem:[#allocation8 + $0x7b0] sm:$0xff]  ;;  %v6803_v16 = vld [vmem:[%s6751_s10 + $0x48] sm:$0xff]  ;;  %v5018_v18 = vpack.c.bf16 %v981_v7, %v975_v6  ;;  %v1186_v27 = vld [vmem:[#allocation8 + $0x818] sm:$0xff] }
 0x11d   : > { %4967 = vmatpush1.bf16.msra.mxu0 %v4966_v13  ;;  %4999 = vmatpush3.bf16.msra.mxu1 %v4996_v10  ;;  %v994_v10 = vld [vmem:[#allocation8 + $0x218] sm:$0xff]  ;;  %v6806_v17 = vld [vmem:[%s6751_s10 + $0x50] sm:$0xff]  ;;  %v999_v34 = vld [vmem:[#allocation8 + $0x240] sm:$0xff] }
 0x11e   : > { %5001 = vmatprep.subr.bf16.mxu0 %v5000_v14  ;;  %5065 = vmatprep.subr.bf16.mxu1 %v5064_v28  ;;  %v1174_v13 = vld [vmem:[#allocation8 + $0x7b8] sm:$0xff]  ;;  %v1167_v14 = vld [vmem:[#allocation8 + $0x780] sm:$0xff]  ;;  %v993_v21 = vld [vmem:[#allocation8 + $0x210] sm:$0xff] }
 0x11f   : > { %v5080_v23 = vpack.c.bf16 %v1174_v13, %v1168_v12  ;;  %v5082_v25 = vpack.c.bf16 %v1173_v15, %v1167_v14  ;;  %v1179_v28 = vld [vmem:[#allocation8 + $0x7e0] sm:$0xff]  ;;  %v1185_v29 = vld [vmem:[#allocation8 + $0x810] sm:$0xff]  ;;  %v1198_v41 = vld [vmem:[#allocation8 + $0x878] sm:$0xff] }
 0x120   : > { %638 = vmatmul.mubr.f32.vlgmr.msra.gmra.mrb[0].mxu0 %v492_v51  ;;  %4801 = vmatmul.mubr.f32.vlgmr.msra.gmra.mrb[0].mxu1 %v493_v19  ;;  %v6785_v51 = vld [vmem:[%s6751_s10 + $0x28] sm:$0xff]  ;;  %v6813_v30 = vld [vmem:[%s6751_s10 + $0x58] sm:$0xff]  ;;  %v6816_v31 = vld [vmem:[%s6751_s10 + $0x60] sm:$0xff]  ;;  %v5086_v39 = vpack.c.bf16 %v1185_v29, %v1179_v28 }
 0x121   : > { %643 = vmatprep.mubr.f32.mxu0 %v9367_v1  ;;  %4803 = vmatprep.mubr.f32.mxu1 %v494_v20  ;;  %v1005_v35 = vld [vmem:[#allocation8 + $0x270] sm:$0xff]  ;;  %v1191_v42 = vld [vmem:[#allocation8 + $0x840] sm:$0xff]  ;;  %v1072_v14 = vld [vmem:[#allocation8 + $0x488] sm:$0xff] }
 0x122   : > { %5003 = vmatpush1.bf16.msra.mxu0 %v5002_v22  ;;  %5067 = vmatpush1.bf16.msra.mxu1 %v5066_v32  ;;  %v1000_v22 = vld [vmem:[#allocation8 + $0x248] sm:$0xff]  ;;  %v1197_v43 = vld [vmem:[#allocation8 + $0x870] sm:$0xff]  ;;  %v5026_v45 = vpack.c.bf16 %v1005_v35, %v999_v34  ;;  %v1011_v48 = vld [vmem:[#allocation8 + $0x2a0] sm:$0xff] }
 0x123   : > { %5005 = vmatprep.subr.bf16.mxu0 %v5004_v26  ;;  %5069 = vmatprep.subr.bf16.mxu1 %v5068_v44  ;;  %v1180_v26 = vld [vmem:[#allocation8 + $0x7e8] sm:$0xff]  ;;  %v5024_v33 = vpack.c.bf16 %v1006_v24, %v1000_v22  ;;  %v1017_v49 = vld [vmem:[#allocation8 + $0x2d0] sm:$0xff]  ;;  %v1035_v63 = vld [vmem:[#allocation8 + $0x360] sm:$0xff] }
 0x124   : > { %644 = vmatmul.mubr.f32.gmra.mrb[2].mxu0 %v493_v19  ;;  %4804 = vmatmul.mubr.f32.gmra.mrb[2].mxu1 %v495_v36  ;;  %v5020_v19 = vpack.c.bf16 %v994_v10, %v988_v8  ;;  %v6823_v44 = vld [vmem:[%s6751_s10 + $0x68] sm:$0xff]  ;;  %v6833_v55 = vld [vmem:[%s6751_s10 + $0x78] sm:$0xff]  ;;  %v5030_v56 = vpack.c.bf16 %v1017_v49, %v1011_v48 }
 0x125   : > { %649 = vmatprep.mubr.f32.mxu0 %v9367_v1  ;;  %4806 = vmatprep.mubr.f32.mxu1 %v6780_v37  ;;  %v1029_v59 = vld [vmem:[#allocation8 + $0x330] sm:$0xff]  ;;  %v1047_v7 = vld [vmem:[#allocation8 + $0x3c0] sm:$0xff]  ;;  %v1066_v10 = vld [vmem:[#allocation8 + $0x458] sm:$0xff] }
 0x126   : > { %5007 = vmatpush1.bf16.msra.mxu0 %v5006_v38  ;;  %5071 = vmatpush1.bf16.msra.mxu1 %v5070_v46  ;;  %v1018_v38 = vld [vmem:[#allocation8 + $0x2d8] sm:$0xff]  ;;  %v6826_v46 = vld [vmem:[%s6751_s10 + $0x70] sm:$0xff]  ;;  %v1059_v12 = vld [vmem:[#allocation8 + $0x420] sm:$0xff] }
 0x127   : > { %5009 = vmatprep.subr.bf16.mxu0 %v5008_v40  ;;  %5073 = vmatprep.subr.bf16.mxu1 %v5072_v58  ;;  %v1192_v40 = vld [vmem:[#allocation8 + $0x848] sm:$0xff]  ;;  %v1023_v58 = vld [vmem:[#allocation8 + $0x300] sm:$0xff]  ;;  %v1041_v0 = vld [vmem:[#allocation8 + $0x390] sm:$0xff] }
 0x128   : > { %650 = vmatmul.mubr.f32.gmra.mrb[4].mxu0 %v494_v20  ;;  %4807 = vmatmul.mubr.f32.gmra.mrb[4].mxu1 %v6785_v51  ;;  %v987_v20 = vld [vmem:[#allocation8 + $0x1e0] sm:$0xff]  ;;  %v5088_v50 = vpack.c.bf16 %v1198_v41, %v1192_v40  ;;  %v5034_v61 = vpack.c.bf16 %v1029_v59, %v1023_v58  ;;  %v1053_v8 = vld [vmem:[#allocation8 + $0x3f0] sm:$0xff]  ;;  %v1078_v15 = vld [vmem:[#allocation8 + $0x4b8] sm:$0xff] }
 0x129   : > { %655 = vmatprep.mubr.f32.mxu0 %v9367_v1  ;;  %4809 = vmatprep.mubr.f32.mxu1 %v6788_v52  ;;  %v5022_v32 = vpack.c.bf16 %v993_v21, %v987_v20  ;;  %v1065_v13 = vld [vmem:[#allocation8 + $0x450] sm:$0xff]  ;;  %v1084_v21 = vld [vmem:[#allocation8 + $0x4e8] sm:$0xff]  ;;  %v1090_v22 = vld [vmem:[#allocation8 + $0x518] sm:$0xff] }
 0x12a   : > { %5011 = vmatpush1.bf16.msra.mxu0 %v5010_v53  ;;  %5075 = vmatpush1.bf16.msra.mxu1 %v5074_v60  ;;  %v1030_v53 = vld [vmem:[#allocation8 + $0x338] sm:$0xff]  ;;  %v1077_v20 = vld [vmem:[#allocation8 + $0x4b0] sm:$0xff]  ;;  %v1083_v24 = vld [vmem:[#allocation8 + $0x4e0] sm:$0xff] }
 0x12b   : > { %5013 = vmatprep.subr.bf16.mxu0 %v5012_v54  ;;  %5077 = vmatprep.subr.bf16.mxu1 %v5076_v9  ;;  %v5090_v54 = vpack.c.bf16 %v1197_v43, %v1191_v42  ;;  %v1042_v60 = vld [vmem:[#allocation8 + $0x398] sm:$0xff]  ;;  %v1060_v9 = vld [vmem:[#allocation8 + $0x428] sm:$0xff]  ;;  %v1107_v40 = vld [vmem:[#allocation8 + $0x5a0] sm:$0xff] }
 0x12c   : > { %656 = vmatmul.mubr.f32.gmra.mrb[6].mxu0 %v495_v36  ;;  %4810 = vmatmul.mubr.f32.gmra.mrb[6].mxu1 %v6794_v2  ;;  %v1012_v36 = vld [vmem:[#allocation8 + $0x2a8] sm:$0xff]  ;;  %v1210_v34 = vld [vmem:[#allocation8 + $0x8d8] sm:$0xff]  ;;  %v1113_v41 = vld [vmem:[#allocation8 + $0x5d0] sm:$0xff] }
 0x12d   : > { %661 = vmatprep.mubr.f32.mxu0 %v9367_v1  ;;  %4812 = vmatprep.mubr.f32.mxu1 %v6797_v3  ;;  %v5028_v47 = vpack.c.bf16 %v1018_v38, %v1012_v36  ;;  %v1108_v35 = vld [vmem:[#allocation8 + $0x5a8] sm:$0xff]  ;;  %v1114_v36 = vld [vmem:[#allocation8 + $0x5d8] sm:$0xff]  ;;  %v1203_v38 = vld [vmem:[#allocation8 + $0x8a0] sm:$0xff]  ;;  %v5062_v43 = vpack.c.bf16 %v1113_v41, %v1107_v40 }
 0x12e   : > { %5015 = vmatpush1.bf16.msra.mxu0 %v5014_v4  ;;  %5079 = vmatpush1.bf16.msra.mxu1 %v5078_v11  ;;  %v1048_v4 = vld [vmem:[#allocation8 + $0x3c8] sm:$0xff]  ;;  %v5042_v11 = vpack.c.bf16 %v1053_v8, %v1047_v7  ;;  %v1209_v42 = vld [vmem:[#allocation8 + $0x8d0] sm:$0xff]  ;;  %v938_v49 = vld [vmem:[#allocation8 + $0x58] sm:$0xff] }
 0x12f   : > { %5017 = vmatprep.subr.bf16.mxu0 %v5016_v5  ;;  %5081 = vmatprep.subr.bf16.mxu1 %v5080_v23  ;;  %v1054_v5 = vld [vmem:[#allocation8 + $0x3f8] sm:$0xff]  ;;  %v932_v48 = vld [vmem:[#allocation8 + $0x28] sm:$0xff]  ;;  %v959_v40 = vld [vmem:[#allocation8 + $0x100] sm:$0xff] }
 0x130   : > { %662 = vmatmul.mubr.f32.gmra.mrb[8].mxu0 %v6780_v37  ;;  %4813 = vmatmul.mubr.f32.gmra.mrb[8].mxu1 %v6803_v16  ;;  %v5084_v37 = vpack.c.bf16 %v1186_v27, %v1180_v26  ;;  %v5040_v6 = vpack.c.bf16 %v1054_v5, %v1048_v4  ;;  %v1096_v26 = vld [vmem:[#allocation8 + $0x548] sm:$0xff]  ;;  %v1102_v27 = vld [vmem:[#allocation8 + $0x578] sm:$0xff] }
 0x131   : > { %667 = vmatprep.mubr.f32.mxu0 %v9367_v1  ;;  %4815 = vmatprep.mubr.f32.mxu1 %v6806_v17  ;;  %v5056_v29 = vpack.c.bf16 %v1102_v27, %v1096_v26  ;;  %v948_v7 = vld [vmem:[#allocation8 + $0xa8] sm:$0xff]  ;;  %v949_v26 = vld [vmem:[#allocation8 + $0xb0] sm:$0xff] }
 0x132   : > { %5019 = vmatpush1.bf16.msra.mxu0 %v5018_v18  ;;  %5083 = vmatpush1.bf16.msra.mxu1 %v5082_v25  ;;  %v5046_v18 = vpack.c.bf16 %v1065_v13, %v1059_v12  ;;  %v1089_v25 = vld [vmem:[#allocation8 + $0x510] sm:$0xff] }
 0x133   : > { %5021 = vmatprep.subr.bf16.mxu0 %v5020_v19  ;;  %5085 = vmatprep.subr.bf16.mxu1 %v5084_v37  ;;  %v1071_v19 = vld [vmem:[#allocation8 + $0x480] sm:$0xff]  ;;  %v5054_v28 = vpack.c.bf16 %v1089_v25, %v1083_v24 }
 0x134   : > { %668 = vmatmul.mubr.f32.gmra.mrb[10].mxu0 %v6785_v51  ;;  %4816 = vmatmul.mubr.f32.gmra.mrb[10].mxu1 %v6813_v30  ;;  %v1024_v51 = vld [vmem:[#allocation8 + $0x308] sm:$0xff]  ;;  %v5050_v23 = vpack.c.bf16 %v1077_v20, %v1071_v19  ;;  %v947_v19 = vld [vmem:[#allocation8 + $0xa0] sm:$0xff] }
 0x135   : > { %673 = vmatprep.mubr.f32.mxu0 %v9367_v1  ;;  %4818 = vmatprep.mubr.f32.mxu1 %v6816_v31  ;;  %v5032_v57 = vpack.c.bf16 %v1030_v53, %v1024_v51  ;;  %v9364_v51 = vlaneseq  ;;  %v943_v25 = vld [vmem:[#allocation8 + $0x80] sm:$0xff] }
 0x136   : > { %5023 = vmatpush1.bf16.msra.mxu0 %v5022_v32  ;;  %5087 = vmatpush1.bf16.msra.mxu1 %v5086_v39  ;;  %v1101_v32 = vld [vmem:[#allocation8 + $0x570] sm:$0xff]  ;;  %v5060_v39 = vpack.c.bf16 %v1114_v36, %v1108_v35 }
 0x137   : > { %5025 = vmatprep.subr.bf16.mxu0 %v5024_v33  ;;  %5089 = vmatprep.subr.bf16.mxu1 %v5088_v50  ;;  %v5192_v50 = vpack.c.bf16 %v938_v49, %v932_v48  ;;  %v6855_v53 = vshrl.u32 %v9364_v51, 7  ;;  %v1033_v51 = vld [vmem:[#allocation8 + $0x350] sm:$0xff] }
 0x138   : > { %674 = vmatmul.mubr.f32.gmra.mrb[12].mxu0 %v6788_v52  ;;  %4819 = vmatmul.mubr.f32.gmra.mrb[12].mxu1 %v6823_v44  ;;  %v1036_v52 = vld [vmem:[#allocation8 + $0x368] sm:$0xff] }
 0x139   : > { %679 = vmatprep.mubr.f32.mxu0 %v9367_v1  ;;  %4821 = vmatprep.mubr.f32.mxu1 %v6826_v46  ;;  %v5036_v62 = vpack.c.bf16 %v1042_v60, %v1036_v52  ;;  %9417 = vst [vmem:[#allocation22_spill] sm:$0xff] %v6855_v53 }
 0x13a   : > { %5027 = vmatpush1.bf16.msra.mxu0 %v5026_v45  ;;  %5091 = vmatpush1.bf16.msra.mxu1 %v5090_v54  ;;  %v930_v45 = vld [vmem:[#allocation8 + $0x18] sm:$0xff]  ;;  %v6858_v54 = vsub.s32 0, %v6855_v53 }
 0x13b   : > { %5029 = vmatprep.subr.bf16.mxu0 %v5028_v47 }
 0x13c   : > { %680 = vmatmul.mubr.f32.gmra.mrb[14].mxu0 %v6794_v2  ;;  %4822 = vmatmul.mubr.f32.gmra.mrb[14].mxu1 %v6833_v55  ;;  %v5038_v2 = vpack.c.bf16 %v1041_v0, %v1035_v63  ;;  %9418 = vst [vmem:[#allocation23_spill] sm:$0xff] %v6858_v54  ;;  %v931_v63 = vld [vmem:[#allocation8 + $0x20] sm:$0xff] }
 0x13d   : > { %685 = vmatprep.mubr.f32.mxu0 %v9367_v1  ;;  %1472 = vmatprep.mubr.f32.mxu1 %v9367_v1 }
 0x13e   : > { %5031 = vmatpush1.bf16.msra.mxu0 %v5030_v56  ;;  %v6861_v56 = vsub.s32 1, %v6855_v53 }
 0x13f   : > { %5033 = vmatprep.subr.bf16.mxu0 %v5032_v57  ;;  %v6864_v57 = vsub.s32 2, %v6855_v53  ;;  %v9426_v53 = vmov 0.0  }
 0x140   : > { %686 = vmatmul.mubr.f32.gmra.mrb[16].mxu0 %v6797_v3  ;;  %v5044_v3 = vpack.c.bf16 %v1066_v10, %v1060_v9  ;;  %9419 = vst [vmem:[#allocation24_spill] sm:$0xff] %v6861_v56 }
 0x141   : > { %691 = vmatprep.mubr.f32.mxu0 %v9367_v1  ;;  %9420 = vst [vmem:[#allocation25_spill] sm:$0xff] %v6864_v57 }
 0x142   : > { %5035 = vmatpush1.bf16.msra.mxu0 %v5034_v61  ;;  %v929_v61 = vld [vmem:[#allocation8 + $0x10] sm:$0xff] }
 0x143   : > { %5037 = vmatprep.subr.bf16.mxu0 %v5036_v62  ;;  %v935_v62 = vld [vmem:[#allocation8 + $0x40] sm:$0xff] }
 0x144   : > { %692 = vmatmul.mubr.f32.gmra.mrb[18].mxu0 %v6803_v16  ;;  %v5048_v16 = vpack.c.bf16 %v1078_v15, %v1072_v14  ;;  %v5098_v14 = vpack.c.bf16 %v935_v62, %v929_v61  ;;  %v972_v61 = vld [vmem:[#allocation8 + $0x168] sm:$0xff] }
 0x145   : > { %697 = vmatprep.mubr.f32.mxu0 %v9367_v1 }
 0x146   : > { %5039 = vmatpush1.bf16.msra.mxu0 %v5038_v2  ;;  %v937_v2 = vld [vmem:[#allocation8 + $0x50] sm:$0xff] }
 0x147   : > { %5041 = vmatprep.subr.bf16.mxu0 %v5040_v6  ;;  %v942_v6 = vld [vmem:[#allocation8 + $0x78] sm:$0xff]  ;;  %v5194_v15 = vpack.c.bf16 %v937_v2, %v931_v63  ;;  %v968_v63 = vld [vmem:[#allocation8 + $0x148] sm:$0xff] }
 0x148   : > { %698 = vmatmul.mubr.f32.gmra.mrb[20].mxu0 %v6806_v17  ;;  %v5052_v17 = vpack.c.bf16 %v1090_v22, %v1084_v21 }
 0x149   : > { %703 = vmatprep.mubr.f32.mxu0 %v9367_v1 }
 0x14a   : > { %5043 = vmatpush1.bf16.msra.mxu0 %v5042_v11  ;;  %v944_v11 = vld [vmem:[#allocation8 + $0x88] sm:$0xff] }
 0x14b   : > { %5045 = vmatprep.subr.bf16.mxu0 %v5044_v3  ;;  %v950_v3 = vld [vmem:[#allocation8 + $0xb8] sm:$0xff] }
 0x14c   : > { %704 = vmatmul.mubr.f32.gmra.mrb[22].mxu0 %v6813_v30  ;;  %v1095_v30 = vld [vmem:[#allocation8 + $0x540] sm:$0xff] }
 0x14d   : > { %709 = vmatprep.mubr.f32.mxu0 %v9367_v1  ;;  %v5058_v33 = vpack.c.bf16 %v1101_v32, %v1095_v30  ;;  %v954_v30 = vld [vmem:[#allocation8 + $0xd8] sm:$0xff]  ;;  %v960_v32 = vld [vmem:[#allocation8 + $0x108] sm:$0xff] }
 0x14e   : > { %5047 = vmatpush1.bf16.msra.mxu0 %v5046_v18  ;;  %v5100_v18 = vpack.c.bf16 %v948_v7, %v942_v6  ;;  %v965_v7 = vld [vmem:[#allocation8 + $0x130] sm:$0xff] }
 0x14f   : > { %5049 = vmatprep.subr.bf16.mxu0 %v5048_v16  ;;  %v941_v16 = vld [vmem:[#allocation8 + $0x70] sm:$0xff] }
 0x150   : > { %710 = vmatmul.mubr.f32.gmra.mrb[24].mxu0 %v6816_v31  ;;  %v1204_v31 = vld [vmem:[#allocation8 + $0x8a8] sm:$0xff] }
 0x151   : > { %715 = vmatprep.mubr.f32.mxu0 %v9367_v1  ;;  %v5092_v37 = vpack.c.bf16 %v1210_v34, %v1204_v31  ;;  %v956_v31 = vld [vmem:[#allocation8 + $0xe8] sm:$0xff]  ;;  %v962_v34 = vld [vmem:[#allocation8 + $0x118] sm:$0xff] }
 0x152   : > { %5051 = vmatpush1.bf16.msra.mxu0 %v5050_v23 }
 0x153   : > { %5053 = vmatprep.subr.bf16.mxu0 %v5052_v17  ;;  %5093 = vmatprep.subr.bf16.mxu1 %v5092_v37  ;;  %v5102_v37 = vpack.c.bf16 %v947_v19, %v941_v16 }
 0x154   : > { %716 = vmatmul.mubr.f32.gmra.mrb[26].mxu0 %v6823_v44  ;;  %v5094_v44 = vpack.c.bf16 %v1209_v42, %v1203_v38  ;;  %v5198_v38 = vpack.c.bf16 %v949_v26, %v943_v25  ;;  %v980_v25 = vld [vmem:[#allocation8 + $0x1a8] sm:$0xff]  ;;  %v986_v26 = vld [vmem:[#allocation8 + $0x1d8] sm:$0xff] }
 0x155   : > { %721 = vmatprep.mubr.f32.mxu0 %v9367_v1 }
 0x156   : > { %5055 = vmatpush1.bf16.msra.mxu0 %v5054_v28  ;;  %5095 = vmatpush1.bf16.msra.mxu1 %v5094_v44 }
 0x157   : > { %5057 = vmatprep.subr.bf16.mxu0 %v5056_v29  ;;  %v5196_v29 = vpack.c.bf16 %v950_v3, %v944_v11 }
 0x158   : > { %722 = vmatmul.mubr.f32.gmra.mrb[28].mxu0 %v6826_v46  ;;  %v936_v46 = vld [vmem:[#allocation8 + $0x48] sm:$0xff] }
 0x159   : > { %727 = vmatprep.mubr.f32.mxu0 %v9367_v1  ;;  %v5096_v47 = vpack.c.bf16 %v936_v46, %v930_v45  ;;  %v5104_v45 = vpack.c.bf16 %v960_v32, %v954_v30  ;;  %v955_v46 = vld [vmem:[#allocation8 + $0xe0] sm:$0xff]  ;;  %v977_v32 = vld [vmem:[#allocation8 + $0x190] sm:$0xff] }
 0x15a   : > { %5059 = vmatpush1.bf16.msra.mxu0 %v5058_v33 }
 0x15b   : > { %5061 = vmatprep.subr.bf16.mxu0 %v5060_v39  ;;  %5097 = vmatprep.subr.bf16.mxu1 %v5096_v47  ;;  %v953_v39 = vld [vmem:[#allocation8 + $0xd0] sm:$0xff] }
 0x15c   : > { %728 = vmatmul.mubr.f32.gmra.mrb[30].mxu0 %v6833_v55  ;;  %v556_v55 = vld [vmem:[#allocation7] sm:$0x7]  ;;  %v961_v47 = vld [vmem:[#allocation8 + $0x110] sm:$0xff]  ;;  %v5106_v2 = vpack.c.bf16 %v959_v40, %v953_v39  ;;  %v979_v39 = vld [vmem:[#allocation8 + $0x1a0] sm:$0xff] }
 0x15d   : > { %v6867_v58 = vrot.slane %v556_v55, %v6858_v54  ;;  %v6870_v59 = vrot.slane %v556_v55, %v6861_v56  ;;  %v6873_v52 = vrot.slane %v556_v55, %v6864_v57  ;;  %v5202_v6 = vpack.c.bf16 %v961_v47, %v955_v46  ;;  %v985_v40 = vld [vmem:[#allocation8 + $0x1d0] sm:$0xff]  ;;  %v990_v46 = vld [vmem:[#allocation8 + $0x1f8] sm:$0xff]  ;;  %v996_v47 = vld [vmem:[#allocation8 + $0x228] sm:$0xff] }
 0x15e   : > { %5063 = vmatpush1.bf16.msra.mxu0 %v5062_v43  ;;  %v1039_v57 = vld [vmem:[#allocation8 + $0x380] sm:$0xff]  ;;  %v1057_v54 = vld [vmem:[#allocation8 + $0x410] sm:$0xff] }
 0x15f   : > { %5193 = vmatprep.subr.bf16.mxu0 %v5192_v50  ;;  %v5200_v50 = vpack.c.bf16 %v962_v34, %v956_v31  ;;  %v1055_v56 = vld [vmem:[#allocation8 + $0x400] sm:$0xff] }
 0x1f3   : > { %v639_v60 = vpop.f32.mrb[0].mxu0  ;;  %v4802_v4 = vpop.f32.mrb[0].mxu1 }
 0x1f4   : > { %v640_v0 = vadd.f32 %v639_v60, %v6867_v58  ;;  %v641_v5 = vpop.f32.mrb[1].mxu0  ;;  %v800_v9 = vpop.f32.mrb[1].mxu1  ;;  %v806_v21 = vadd.f32 %v4802_v4, %v6873_v52  ;;  %v966_v60 = vld [vmem:[#allocation8 + $0x138] sm:$0xff] }
 0x1f5   : > { %v642_v8 = vadd.f32 %v641_v5, %v6870_v59  ;;  %v801_v10 = vadd.f32 %v800_v9, %v6873_v52  ;;  %v5108_v3 = vpack.c.bf16 %v972_v61, %v966_v60  ;;  %v998_v60 = vld [vmem:[#allocation8 + $0x238] sm:$0xff] }
 0x1f6   : > { %v6880_v20 = vmax.f32 %v640_v0, 0.0  ;;  %v6893_v41 = vmax.f32 %v806_v21, 0.0  ;;  %v974_v0 = vld [vmem:[#allocation8 + $0x178] sm:$0xff] }
 0x1f7   : > { %v6878_v12 = vmax.f32 %v642_v8, 0.0  ;;  %v645_v13 = vpop.f32.mrb[2].mxu0  ;;  %v6883_v22 = vmax.f32 %v801_v10, 0.0  ;;  %v4805_v24 = vpop.f32.mrb[2].mxu1  ;;  %v5204_v19 = vpack.c.bf16 %v974_v0, %v968_v63  ;;  %v978_v21 = vld [vmem:[#allocation8 + $0x198] sm:$0xff] }
 0x1f8   : > { %v646_v23 = vadd.f32 %v645_v13, %v6867_v58  ;;  %v647_v17 = vpop.f32.mrb[3].mxu0  ;;  %v810_v28 = vpop.f32.mrb[3].mxu1  ;;  %v816_v9 = vadd.f32 %v4805_v24, %v6873_v52  ;;  %v971_v13 = vld [vmem:[#allocation8 + $0x160] sm:$0xff] }
 0x1f9   : > { %v648_v27 = vadd.f32 %v647_v17, %v6870_v59  ;;  %1311 = vmatprep.mubr.f32.mxu0 %v6878_v12  ;;  %1473 = vmatmul.mubr.f32.vlgmr.msra.gmra.mrb[16].mxu1 %v6883_v22  ;;  %v811_v33 = vadd.f32 %v810_v28, %v6873_v52 }
 0x1fa   : > { %1312 = vmatmul.mubr.f32.vlgmr.msra.gmra.mrb[32].mxu0 %v6880_v20  ;;  %5099 = vmatpush1.bf16.msra.mxu1 %v5098_v14  ;;  %v6895_v42 = vmax.f32 %v646_v23, 0.0  ;;  %v967_v14 = vld [vmem:[#allocation8 + $0x140] sm:$0xff]  ;;  %v984_v23 = vld [vmem:[#allocation8 + $0x1c8] sm:$0xff]  ;;  %v6925_v31 = vmax.f32 %v816_v9, 0.0 }
 0x1fb   : > { %v6891_v35 = vmax.f32 %v648_v27, 0.0  ;;  %5195 = vmatpush1.bf16.msra.mxu0 %v5194_v15  ;;  %v651_v36 = vpop.f32.mrb[4].mxu0  ;;  %1478 = vmatprep.mubr.f32.mxu1 %v9367_v1  ;;  %v6899_v48 = vpop.f32.mrb[4].mxu1  ;;  %v6903_v62 = vmax.f32 %v811_v33, 0.0  ;;  %v973_v15 = vld [vmem:[#allocation8 + $0x170] sm:$0xff]  ;;  %v983_v33 = vld [vmem:[#allocation8 + $0x1c0] sm:$0xff] }
 0x1fc   : > { %v652_v43 = vadd.f32 %v651_v36, %v6867_v58  ;;  %v653_v44 = vpop.f32.mrb[5].mxu0  ;;  %5101 = vmatprep.subr.bf16.mxu1 %v5100_v18  ;;  %5197 = vmatprep.subr.bf16.mxu0 %v5196_v29  ;;  %v820_v55 = vpop.f32.mrb[5].mxu1  ;;  %v5110_v29 = vpack.c.bf16 %v971_v13, %v965_v7  ;;  %v5206_v30 = vpack.c.bf16 %v973_v15, %v967_v14  ;;  %v991_v13 = vld [vmem:[#allocation8 + $0x200] sm:$0xff]  ;;  %v997_v14 = vld [vmem:[#allocation8 + $0x230] sm:$0xff] }
 0x1fd   : > { %v654_v49 = vadd.f32 %v653_v44, %v6870_v59  ;;  %1317 = vmatprep.mubr.f32.mxu0 %v6891_v35  ;;  %1479 = vmatmul.mubr.f32.gmra.mrb[18].mxu1 %v6893_v41  ;;  %v821_v24 = vadd.f32 %v820_v55, %v6873_v52  ;;  %v992_v55 = vld [vmem:[#allocation8 + $0x208] sm:$0xff]  ;;  %v5114_v0 = vpack.c.bf16 %v983_v33, %v977_v32  ;;  %v1001_v33 = vld [vmem:[#allocation8 + $0x250] sm:$0xff] }
 0x1fe   : > { %1318 = vmatmul.mubr.f32.gmra.mrb[34].mxu0 %v6895_v42  ;;  %5103 = vmatpush1.bf16.msra.mxu1 %v5102_v37  ;;  %v6909_v8 = vmax.f32 %v652_v43, 0.0  ;;  %v826_v7 = vadd.f32 %v6899_v48, %v6873_v52  ;;  %v1008_v48 = vld [vmem:[#allocation8 + $0x288] sm:$0xff]  ;;  %v5214_v32 = vpack.c.bf16 %v997_v14, %v991_v13  ;;  %v1013_v13 = vld [vmem:[#allocation8 + $0x2b0] sm:$0xff] }
 0x1ff   : > { %v6907_v4 = vmax.f32 %v654_v49, 0.0  ;;  %5199 = vmatpush1.bf16.msra.mxu0 %v5198_v38  ;;  %v657_v5 = vpop.f32.mrb[6].mxu0  ;;  %1484 = vmatprep.mubr.f32.mxu1 %v9367_v1  ;;  %v6914_v18 = vpop.f32.mrb[6].mxu1  ;;  %v5112_v38 = vpack.c.bf16 %v984_v23, %v978_v21  ;;  %v1002_v21 = vld [vmem:[#allocation8 + $0x258] sm:$0xff] }
 0x200   : > { %v658_v10 = vadd.f32 %v657_v5, %v6867_v58  ;;  %v659_v11 = vpop.f32.mrb[7].mxu0  ;;  %5105 = vmatprep.subr.bf16.mxu1 %v5104_v45  ;;  %5201 = vmatprep.subr.bf16.mxu0 %v5200_v50  ;;  %v6918_v17 = vpop.f32.mrb[7].mxu1  ;;  %v5208_v45 = vpack.c.bf16 %v986_v26, %v980_v25  ;;  %v6937_v50 = vmax.f32 %v821_v24, 0.0  ;;  %v5210_v5 = vpack.c.bf16 %v985_v40, %v979_v39  ;;  %v1004_v25 = vld [vmem:[#allocation8 + $0x268] sm:$0xff]  ;;  %v1010_v26 = vld [vmem:[#allocation8 + $0x298] sm:$0xff] }
 0x201   : > { %v660_v16 = vadd.f32 %v659_v11, %v6870_v59  ;;  %1323 = vmatprep.mubr.f32.mxu0 %v6907_v4  ;;  %1485 = vmatmul.mubr.f32.gmra.mrb[20].mxu1 %v6903_v62  ;;  %v5116_v11 = vpack.c.bf16 %v996_v47, %v990_v46  ;;  %v831_v24 = vadd.f32 %v6918_v17, %v6873_v52 }
 0x202   : > { %1324 = vmatmul.mubr.f32.gmra.mrb[36].mxu0 %v6909_v8  ;;  %5107 = vmatpush1.bf16.msra.mxu1 %v5106_v2  ;;  %v6927_v34 = vmax.f32 %v658_v10, 0.0  ;;  %v989_v2 = vld [vmem:[#allocation8 + $0x1f0] sm:$0xff]  ;;  %v5120_v17 = vpack.c.bf16 %v1008_v48, %v1002_v21 }
 0x203   : > { %v6923_v27 = vmax.f32 %v660_v16, 0.0  ;;  %5203 = vmatpush1.bf16.msra.mxu0 %v5202_v6  ;;  %v663_v28 = vpop.f32.mrb[8].mxu0  ;;  %1490 = vmatprep.mubr.f32.mxu1 %v9367_v1  ;;  %v6931_v43 = vpop.f32.mrb[8].mxu1 }
 0x204   : > { %v664_v36 = vadd.f32 %v663_v28, %v6867_v58  ;;  %v665_v37 = vpop.f32.mrb[9].mxu0  ;;  %5109 = vmatprep.subr.bf16.mxu1 %v5108_v3  ;;  %5205 = vmatprep.subr.bf16.mxu0 %v5204_v19  ;;  %v6935_v49 = vpop.f32.mrb[9].mxu1  ;;  %v995_v3 = vld [vmem:[#allocation8 + $0x220] sm:$0xff]  ;;  %v5212_v19 = vpack.c.bf16 %v998_v60, %v992_v55  ;;  %v5216_v55 = vpack.c.bf16 %v1010_v26, %v1004_v25  ;;  %v1014_v60 = vld [vmem:[#allocation8 + $0x2b8] sm:$0xff]  ;;  %v1021_v26 = vld [vmem:[#allocation8 + $0x2f0] sm:$0xff] }
 0x205   : > { %v666_v44 = vadd.f32 %v665_v37, %v6870_v59  ;;  %1329 = vmatprep.mubr.f32.mxu0 %v6923_v27  ;;  %1491 = vmatmul.mubr.f32.gmra.mrb[22].mxu1 %v6925_v31  ;;  %v6961_v37 = vmax.f32 %v826_v7, 0.0  ;;  %v1022_v7 = vld [vmem:[#allocation8 + $0x2f8] sm:$0xff]  ;;  %v1015_v25 = vld [vmem:[#allocation8 + $0x2c0] sm:$0xff] }
 0x206   : > { %1330 = vmatmul.mubr.f32.gmra.mrb[38].mxu0 %v6927_v34  ;;  %5111 = vmatpush1.bf16.msra.mxu1 %v5110_v29  ;;  %v6943_v6 = vmax.f32 %v664_v36, 0.0  ;;  %v1007_v36 = vld [vmem:[#allocation8 + $0x280] sm:$0xff] }
 0x207   : > { %v6941_v61 = vmax.f32 %v666_v44, 0.0  ;;  %5207 = vmatpush1.bf16.msra.mxu0 %v5206_v30  ;;  %v669_v63 = vpop.f32.mrb[10].mxu0  ;;  %1496 = vmatprep.mubr.f32.mxu1 %v9367_v1  ;;  %v6949_v15 = vpop.f32.mrb[10].mxu1  ;;  %v5118_v30 = vpack.c.bf16 %v995_v3, %v989_v2  ;;  %9421 = vst [vmem:[#allocation26_spill] sm:$0xff] %v6961_v37  ;;  %v1003_v44 = vld [vmem:[#allocation8 + $0x260] sm:$0xff]  ;;  %v1016_v2 = vld [vmem:[#allocation8 + $0x2c8] sm:$0xff] }
 0x208   : > { %v670_v9 = vadd.f32 %v669_v63, %v6867_v58  ;;  %v671_v10 = vpop.f32.mrb[11].mxu0  ;;  %5113 = vmatprep.subr.bf16.mxu1 %v5112_v38  ;;  %5209 = vmatprep.subr.bf16.mxu0 %v5208_v45  ;;  %v6953_v23 = vpop.f32.mrb[11].mxu1  ;;  %v1009_v45 = vld [vmem:[#allocation8 + $0x290] sm:$0xff]  ;;  %v1020_v63 = vld [vmem:[#allocation8 + $0x2e8] sm:$0xff] }
 0x209   : > { %v672_v16 = vadd.f32 %v671_v10, %v6870_v59  ;;  %1335 = vmatprep.mubr.f32.mxu0 %v6941_v61  ;;  %1497 = vmatmul.mubr.f32.gmra.mrb[24].mxu1 %v6937_v50  ;;  %v5218_v3 = vpack.c.bf16 %v1009_v45, %v1003_v44  ;;  %v5124_v48 = vpack.c.bf16 %v1020_v63, %v1014_v60  ;;  %v1025_v60 = vld [vmem:[#allocation8 + $0x310] sm:$0xff] }
 0x20a   : > { %1336 = vmatmul.mubr.f32.gmra.mrb[40].mxu0 %v6943_v6  ;;  %5115 = vmatpush1.bf16.msra.mxu1 %v5114_v0  ;;  %v6963_v38 = vmax.f32 %v670_v9, 0.0 }
 0x20b   : > { %v6959_v28 = vmax.f32 %v672_v16, 0.0  ;;  %5211 = vmatpush1.bf16.msra.mxu0 %v5210_v5  ;;  %v675_v29 = vpop.f32.mrb[12].mxu0  ;;  %1502 = vmatprep.mubr.f32.mxu1 %v9367_v1  ;;  %v6967_v46 = vpop.f32.mrb[12].mxu1  ;;  %v6973_v5 = vmax.f32 %v831_v24, 0.0  ;;  %v836_v16 = vadd.f32 %v6914_v18, %v6873_v52  ;;  %v1019_v24 = vld [vmem:[#allocation8 + $0x2e0] sm:$0xff]  ;;  %v1032_v18 = vld [vmem:[#allocation8 + $0x348] sm:$0xff] }
 0x20c   : > { %v676_v39 = vadd.f32 %v675_v29, %v6867_v58  ;;  %v677_v40 = vpop.f32.mrb[13].mxu0  ;;  %5117 = vmatprep.subr.bf16.mxu1 %v5116_v11  ;;  %5213 = vmatprep.subr.bf16.mxu0 %v5212_v19  ;;  %v6971_v0 = vpop.f32.mrb[13].mxu1  ;;  %v5122_v11 = vpack.c.bf16 %v1007_v36, %v1001_v33  ;;  %v1026_v33 = vld [vmem:[#allocation8 + $0x318] sm:$0xff] }
 0x20d   : > { %v678_v47 = vadd.f32 %v677_v40, %v6870_v59  ;;  %1341 = vmatprep.mubr.f32.mxu0 %v6959_v28  ;;  %9422 = vst [vmem:[#allocation27_spill] sm:$0xff] %v6973_v5  ;;  %1503 = vmatmul.mubr.f32.gmra.mrb[26].mxu1 %v6961_v37  ;;  %v1028_v40 = vld [vmem:[#allocation8 + $0x328] sm:$0xff]  ;;  %v6997_v63 = vmax.f32 %v836_v16, 0.0  ;;  %v1105_v37 = vld [vmem:[#allocation8 + $0x590] sm:$0xff] }
 0x20e   : > { %1342 = vmatmul.mubr.f32.gmra.mrb[42].mxu0 %v6963_v38  ;;  %5119 = vmatpush1.bf16.msra.mxu1 %v5118_v30  ;;  %v6979_v14 = vmax.f32 %v676_v39, 0.0  ;;  %v841_v39 = vadd.f32 %v6935_v49, %v6873_v52  ;;  %v5128_v49 = vpack.c.bf16 %v1032_v18, %v1026_v33  ;;  %v1044_v16 = vld [vmem:[#allocation8 + $0x3a8] sm:$0xff] }
 0x20f   : > { %v6977_v9 = vmax.f32 %v678_v47, 0.0  ;;  %5215 = vmatpush1.bf16.msra.mxu0 %v5214_v32  ;;  %v681_v10 = vpop.f32.mrb[14].mxu0  ;;  %1508 = vmatprep.mubr.f32.mxu1 %v9367_v1  ;;  %v6985_v29 = vpop.f32.mrb[14].mxu1  ;;  %v5220_v32 = vpack.c.bf16 %v1022_v7, %v1016_v2  ;;  %v5126_v47 = vpack.c.bf16 %v1019_v24, %v1013_v13  ;;  %9423 = vst [vmem:[#allocation28_spill] sm:$0xff] %v6997_v63  ;;  %v1038_v13 = vld [vmem:[#allocation8 + $0x378] sm:$0xff]  ;;  %v1040_v24 = vld [vmem:[#allocation8 + $0x388] sm:$0xff] }
 0x210   : > { %v682_v19 = vadd.f32 %v681_v10, %v6867_v58  ;;  %v683_v21 = vpop.f32.mrb[15].mxu0  ;;  %5121 = vmatprep.subr.bf16.mxu1 %v5120_v17  ;;  %5217 = vmatprep.subr.bf16.mxu0 %v5216_v55  ;;  %v6989_v36 = vpop.f32.mrb[15].mxu1  ;;  %v1034_v17 = vld [vmem:[#allocation8 + $0x358] sm:$0xff]  ;;  %v5222_v55 = vpack.c.bf16 %v1021_v26, %v1015_v25 }
 0x211   : > { %v684_v30 = vadd.f32 %v683_v21, %v6870_v59  ;;  %1347 = vmatprep.mubr.f32.mxu0 %v6977_v9  ;;  %1509 = vmatmul.mubr.f32.gmra.mrb[28].mxu1 %v6973_v5  ;;  %v1031_v21 = vld [vmem:[#allocation8 + $0x340] sm:$0xff] }
 0x212   : > { %1348 = vmatmul.mubr.f32.gmra.mrb[44].mxu0 %v6979_v14  ;;  %5123 = vmatpush1.bf16.msra.mxu1 %v5122_v11  ;;  %v6999_v2 = vmax.f32 %v682_v19, 0.0  ;;  %v7005_v19 = vmax.f32 %v841_v39, 0.0  ;;  %v5130_v33 = vpack.c.bf16 %v1031_v21, %v1025_v60  ;;  %v846_v39 = vadd.f32 %v6931_v43, %v6873_v52  ;;  %v1050_v60 = vld [vmem:[#allocation8 + $0x3d8] sm:$0xff]  ;;  %v1103_v5 = vld [vmem:[#allocation8 + $0x580] sm:$0xff] }
 0x213   : > { %v6995_v44 = vmax.f32 %v684_v30, 0.0  ;;  %5219 = vmatpush1.bf16.msra.mxu0 %v5218_v3  ;;  %v687_v45 = vpop.f32.mrb[16].mxu0  ;;  %1514 = vmatprep.mubr.f32.mxu1 %v9367_v1  ;;  %v1027_v30 = vld [vmem:[#allocation8 + $0x320] sm:$0xff]  ;;  %v5224_v3 = vpack.c.bf16 %v1034_v17, %v1028_v40  ;;  %v851_v43 = vadd.f32 %v6953_v23, %v6873_v52  ;;  %v1058_v21 = vld [vmem:[#allocation8 + $0x418] sm:$0xff] }
 0x214   : > { %v688_v7 = vadd.f32 %v687_v45, %v6867_v58  ;;  %v689_v10 = vpop.f32.mrb[17].mxu0  ;;  %5125 = vmatprep.subr.bf16.mxu1 %v5124_v48  ;;  %5221 = vmatprep.subr.bf16.mxu0 %v5220_v32  ;;  %9424 = vst [vmem:[#allocation29_spill] sm:$0xff] %v7005_v19  ;;  %v1046_v48 = vld [vmem:[#allocation8 + $0x3b8] sm:$0xff]  ;;  %v5226_v18 = vpack.c.bf16 %v1033_v51, %v1027_v30  ;;  %v1037_v45 = vld [vmem:[#allocation8 + $0x370] sm:$0xff] }
 0x215   : > { %v690_v11 = vadd.f32 %v689_v10, %v6870_v59  ;;  %1353 = vmatprep.mubr.f32.mxu0 %v6995_v44  ;;  %1515 = vmatmul.mubr.f32.gmra.mrb[30].mxu1 %v6997_v63  ;;  %v5132_v10 = vpack.c.bf16 %v1044_v16, %v1038_v13  ;;  %v5228_v51 = vpack.c.bf16 %v1046_v48, %v1040_v24  ;;  %v7025_v24 = vmax.f32 %v846_v39, 0.0  ;;  %v1081_v63 = vld [vmem:[#allocation8 + $0x4d0] sm:$0xff] }
 0x216   : > { %1354 = vmatmul.mubr.f32.gmra.mrb[46].mxu0 %v6999_v2  ;;  %5127 = vmatpush1.bf16.msra.mxu1 %v5126_v47  ;;  %v7011_v32 = vmax.f32 %v688_v7, 0.0  ;;  %v1045_v47 = vld [vmem:[#allocation8 + $0x3b0] sm:$0xff]  ;;  %v1056_v7 = vld [vmem:[#allocation8 + $0x408] sm:$0xff]  ;;  %v7033_v39 = vmax.f32 %v851_v43, 0.0  ;;  %v856_v43 = vadd.f32 %v6949_v15, %v6873_v52  ;;  %v861_v15 = vadd.f32 %v6971_v0, %v6873_v52 }
 0x217   : > { %v7009_v25 = vmax.f32 %v690_v11, 0.0  ;;  %5223 = vmatpush1.bf16.msra.mxu0 %v5222_v55  ;;  %v693_v26 = vpop.f32.mrb[18].mxu0  ;;  %1520 = vmatprep.mubr.f32.mxu1 %v9367_v1  ;;  %v1043_v11 = vld [vmem:[#allocation8 + $0x3a0] sm:$0xff]  ;;  %9425 = vst [vmem:[#allocation30_spill] sm:$0xff] %v7025_v24  ;;  %v5136_v23 = vpack.c.bf16 %v1056_v7, %v1050_v60  ;;  %v1061_v7 = vld [vmem:[#allocation8 + $0x430] sm:$0xff] }
 0x218   : > { %v694_v40 = vadd.f32 %v693_v26, %v6867_v58  ;;  %v695_v17 = vpop.f32.mrb[19].mxu0  ;;  %5129 = vmatprep.subr.bf16.mxu1 %v5128_v49  ;;  %5225 = vmatprep.subr.bf16.mxu0 %v5224_v3  ;;  %v1052_v49 = vld [vmem:[#allocation8 + $0x3e8] sm:$0xff]  ;;  %v5134_v16 = vpack.c.bf16 %v1043_v11, %v1037_v45  ;;  %v5230_v26 = vpack.c.bf16 %v1045_v47, %v1039_v57  ;;  %v1049_v3 = vld [vmem:[#allocation8 + $0x3d0] sm:$0xff] }
 0x219   : > { %v696_v55 = vadd.f32 %v695_v17, %v6870_v59  ;;  %1359 = vmatprep.mubr.f32.mxu0 %v7009_v25  ;;  %1521 = vmatmul.mubr.f32.gmra.mrb[32].mxu1 %v7005_v19  ;;  %v5232_v57 = vpack.c.bf16 %v1058_v21, %v1052_v49  ;;  %v1068_v45 = vld [vmem:[#allocation8 + $0x468] sm:$0xff]  ;;  %9427 = vst [vmem:[#allocation31_spill] sm:$0xff] %v7033_v39  ;;  %v1079_v19 = vld [vmem:[#allocation8 + $0x4c0] sm:$0xff] }
 0x21a   : > { %1360 = vmatmul.mubr.f32.gmra.mrb[48].mxu0 %v7011_v32  ;;  %5131 = vmatpush1.bf16.msra.mxu1 %v5130_v33  ;;  %v7027_v48 = vmax.f32 %v694_v40, 0.0  ;;  %v1064_v40 = vld [vmem:[#allocation8 + $0x448] sm:$0xff] }
 0x21b   : > { %v7023_v30 = vmax.f32 %v696_v55, 0.0  ;;  %5227 = vmatpush1.bf16.msra.mxu0 %v5226_v18  ;;  %v699_v13 = vpop.f32.mrb[20].mxu0  ;;  %1526 = vmatprep.mubr.f32.mxu1 %v9426_v53  ;;  %v1051_v55 = vld [vmem:[#allocation8 + $0x3e0] sm:$0xff]  ;;  %v1062_v18 = vld [vmem:[#allocation8 + $0x438] sm:$0xff] }
 0x21c   : > { %v700_v17 = vadd.f32 %v699_v13, %v6867_v58  ;;  %v701_v1 = vpop.f32.mrb[21].mxu0  ;;  %5133 = vmatprep.subr.bf16.mxu1 %v5132_v10  ;;  %5229 = vmatprep.subr.bf16.mxu0 %v5228_v51  ;;  %v1070_v10 = vld [vmem:[#allocation8 + $0x478] sm:$0xff]  ;;  %v5234_v60 = vpack.c.bf16 %v1057_v54, %v1051_v55  ;;  %v5140_v13 = vpack.c.bf16 %v1068_v45, %v1062_v18 }
 0x21d   : > { %v702_v33 = vadd.f32 %v701_v1, %v6870_v59  ;;  %1365 = vmatprep.mubr.f32.mxu0 %v7023_v30  ;;  %1527 = vmatmul.mubr.f32.gmra.mrb[34].mxu1 %v7025_v24  ;;  %v5138_v1 = vpack.c.bf16 %v1055_v56, %v1049_v3  ;;  %v1063_v24 = vld [vmem:[#allocation8 + $0x440] sm:$0xff]  ;;  %v5236_v54 = vpack.c.bf16 %v1070_v10, %v1064_v40  ;;  %v1074_v56 = vld [vmem:[#allocation8 + $0x498] sm:$0xff]  ;;  %v1080_v3 = vld [vmem:[#allocation8 + $0x4c8] sm:$0xff]  ;;  %v7053_v40 = vmax.f32 %v856_v43, 0.0 }
 0x21e   : > { %1366 = vmatmul.mubr.f32.gmra.mrb[50].mxu0 %v7027_v48  ;;  %5135 = vmatpush1.bf16.msra.mxu1 %v5134_v16  ;;  %v7039_v51 = vmax.f32 %v700_v17, 0.0  ;;  %v1069_v16 = vld [vmem:[#allocation8 + $0x470] sm:$0xff]  ;;  %v1076_v17 = vld [vmem:[#allocation8 + $0x4a8] sm:$0xff]  ;;  %v5144_v0 = vpack.c.bf16 %v1080_v3, %v1074_v56  ;;  %v7061_v43 = vmax.f32 %v861_v15, 0.0  ;;  %v866_v15 = vadd.f32 %v6967_v46, %v6873_v52 }
 0x21f   : > { %v7037_v11 = vmax.f32 %v702_v33, 0.0  ;;  %5231 = vmatpush1.bf16.msra.mxu0 %v5230_v26  ;;  %v705_v47 = vpop.f32.mrb[22].mxu0  ;;  %1532 = vmatprep.mubr.f32.mxu1 %v9426_v53  ;;  %v1067_v33 = vld [vmem:[#allocation8 + $0x460] sm:$0xff]  ;;  %9428 = vst [vmem:[#allocation32_spill] sm:$0xff] %v7053_v40  ;;  %v1085_v3 = vld [vmem:[#allocation8 + $0x4f0] sm:$0xff]  ;;  %v871_v46 = vadd.f32 %v6989_v36, %v6873_v52 }
 0x220   : > { %v706_v49 = vadd.f32 %v705_v47, %v6867_v58  ;;  %v707_v21 = vpop.f32.mrb[23].mxu0  ;;  %5137 = vmatprep.subr.bf16.mxu1 %v5136_v23  ;;  %5233 = vmatprep.subr.bf16.mxu0 %v5232_v57  ;;  %v1082_v23 = vld [vmem:[#allocation8 + $0x4d8] sm:$0xff]  ;;  %v5142_v45 = vpack.c.bf16 %v1067_v33, %v1061_v7  ;;  %v5238_v47 = vpack.c.bf16 %v1069_v16, %v1063_v24  ;;  %v1073_v57 = vld [vmem:[#allocation8 + $0x490] sm:$0xff]  ;;  %v1092_v7 = vld [vmem:[#allocation8 + $0x528] sm:$0xff] }
 0x221   : > { %v708_v26 = vadd.f32 %v707_v21, %v6870_v59  ;;  %1371 = vmatprep.mubr.f32.mxu0 %v7037_v11  ;;  %1533 = vmatmul.mubr.f32.gmra.mrb[36].mxu1 %v7033_v39  ;;  %v5240_v24 = vpack.c.bf16 %v1082_v23, %v1076_v17  ;;  %9429 = vst [vmem:[#allocation33_spill] sm:$0xff] %v7061_v43 }
 0x222   : > { %1372 = vmatmul.mubr.f32.gmra.mrb[52].mxu0 %v7039_v51  ;;  %5139 = vmatpush1.bf16.msra.mxu1 %v5138_v1  ;;  %v7055_v10 = vmax.f32 %v706_v49, 0.0  ;;  %v1088_v49 = vld [vmem:[#allocation8 + $0x508] sm:$0xff] }
 0x223   : > { %v7051_v55 = vmax.f32 %v708_v26, 0.0  ;;  %5235 = vmatpush1.bf16.msra.mxu0 %v5234_v60  ;;  %v711_v18 = vpop.f32.mrb[24].mxu0  ;;  %1538 = vmatprep.mubr.f32.mxu1 %v9426_v53  ;;  %v1075_v26 = vld [vmem:[#allocation8 + $0x4a0] sm:$0xff]  ;;  %v1086_v60 = vld [vmem:[#allocation8 + $0x4f8] sm:$0xff] }
 0x224   : > { %v712_v21 = vadd.f32 %v711_v18, %v6867_v58  ;;  %v713_v39 = vpop.f32.mrb[25].mxu0  ;;  %5141 = vmatprep.subr.bf16.mxu1 %v5140_v13  ;;  %5237 = vmatprep.subr.bf16.mxu0 %v5236_v54  ;;  %v1094_v13 = vld [vmem:[#allocation8 + $0x538] sm:$0xff]  ;;  %v5242_v56 = vpack.c.bf16 %v1081_v63, %v1075_v26  ;;  %v5148_v18 = vpack.c.bf16 %v1092_v7, %v1086_v60 }
 0x225   : > { %v714_v1 = vadd.f32 %v713_v39, %v6870_v59  ;;  %1377 = vmatprep.mubr.f32.mxu0 %v7051_v55  ;;  %1539 = vmatmul.mubr.f32.gmra.mrb[38].mxu1 %v7053_v40  ;;  %v5146_v39 = vpack.c.bf16 %v1079_v19, %v1073_v57  ;;  %v1087_v40 = vld [vmem:[#allocation8 + $0x500] sm:$0xff]  ;;  %v5244_v63 = vpack.c.bf16 %v1094_v13, %v1088_v49  ;;  %v1098_v19 = vld [vmem:[#allocation8 + $0x558] sm:$0xff]  ;;  %v1104_v57 = vld [vmem:[#allocation8 + $0x588] sm:$0xff]  ;;  %v7081_v49 = vmax.f32 %v866_v15, 0.0 }
 0x226   : > { %1378 = vmatmul.mubr.f32.gmra.mrb[54].mxu0 %v7055_v10  ;;  %5143 = vmatpush1.bf16.msra.mxu1 %v5142_v45  ;;  %v7067_v54 = vmax.f32 %v712_v21, 0.0  ;;  %v1093_v45 = vld [vmem:[#allocation8 + $0x530] sm:$0xff]  ;;  %v1100_v21 = vld [vmem:[#allocation8 + $0x568] sm:$0xff]  ;;  %v5152_v36 = vpack.c.bf16 %v1104_v57, %v1098_v19  ;;  %v7089_v15 = vmax.f32 %v871_v46, 0.0 }
 0x227   : > { %v7065_v33 = vmax.f32 %v714_v1, 0.0  ;;  %5239 = vmatpush1.bf16.msra.mxu0 %v5238_v47  ;;  %v717_v16 = vpop.f32.mrb[26].mxu0  ;;  %1544 = vmatprep.mubr.f32.mxu1 %v9426_v53  ;;  %v1091_v1 = vld [vmem:[#allocation8 + $0x520] sm:$0xff] }
 0x228   : > { %v718_v17 = vadd.f32 %v717_v16, %v6867_v58  ;;  %v719_v23 = vpop.f32.mrb[27].mxu0  ;;  %5145 = vmatprep.subr.bf16.mxu1 %v5144_v0  ;;  %5241 = vmatprep.subr.bf16.mxu0 %v5240_v24  ;;  %v1106_v0 = vld [vmem:[#allocation8 + $0x598] sm:$0xff]  ;;  %v5150_v7 = vpack.c.bf16 %v1091_v1, %v1085_v3  ;;  %v5246_v16 = vpack.c.bf16 %v1093_v45, %v1087_v40  ;;  %v1097_v24 = vld [vmem:[#allocation8 + $0x550] sm:$0xff]  ;;  %v1116_v3 = vld [vmem:[#allocation8 + $0x5e8] sm:$0xff] }
 0x229   : > { %v720_v47 = vadd.f32 %v719_v23, %v6870_v59  ;;  %1383 = vmatprep.mubr.f32.mxu0 %v7065_v33  ;;  %1545 = vmatmul.mubr.f32.gmra.mrb[40].mxu1 %v7061_v43  ;;  %v5248_v40 = vpack.c.bf16 %v1106_v0, %v1100_v21 }
 0x22a   : > { %1384 = vmatmul.mubr.f32.gmra.mrb[56].mxu0 %v7067_v54  ;;  %5147 = vmatpush1.bf16.msra.mxu1 %v5146_v39  ;;  %v7083_v13 = vmax.f32 %v718_v17, 0.0  ;;  %v1112_v17 = vld [vmem:[#allocation8 + $0x5c8] sm:$0xff] }
 0x22b   : > { %v7079_v26 = vmax.f32 %v720_v47, 0.0  ;;  %5243 = vmatpush1.bf16.msra.mxu0 %v5242_v56  ;;  %v723_v60 = vpop.f32.mrb[28].mxu0  ;;  %1550 = vmatprep.mubr.f32.mxu1 %v9426_v53  ;;  %v1099_v47 = vld [vmem:[#allocation8 + $0x560] sm:$0xff]  ;;  %v1110_v56 = vld [vmem:[#allocation8 + $0x5b8] sm:$0xff] }
 0x22c   : > { %v724_v23 = vadd.f32 %v723_v60, %v6867_v58  ;;  %v725_v43 = vpop.f32.mrb[29].mxu0  ;;  %5149 = vmatprep.subr.bf16.mxu1 %v5148_v18  ;;  %5245 = vmatprep.subr.bf16.mxu0 %v5244_v63  ;;  %v1118_v18 = vld [vmem:[#allocation8 + $0x5f8] sm:$0xff]  ;;  %v5250_v19 = vpack.c.bf16 %v1105_v37, %v1099_v47  ;;  %v876_v63 = vadd.f32 %v6985_v29, %v6873_v52  ;;  %v1109_v60 = vld [vmem:[#allocation8 + $0x5b0] sm:$0xff]  ;;  %v1124_v52 = vld [vmem:[#allocation8 + $0x628] sm:$0xff] }
 0x22d   : > { %v726_v39 = vadd.f32 %v725_v43, %v6870_v59  ;;  %1389 = vmatprep.mubr.f32.mxu0 %v7079_v26  ;;  %1551 = vmatmul.mubr.f32.gmra.mrb[42].mxu1 %v7081_v49  ;;  %v5154_v43 = vpack.c.bf16 %v1103_v5, %v1097_v24  ;;  %v5156_v0 = vpack.c.bf16 %v1116_v3, %v1110_v56  ;;  %v1111_v5 = vld [vmem:[#allocation8 + $0x5c0] sm:$0xff]  ;;  %v1122_v24 = vld [vmem:[#allocation8 + $0x618] sm:$0xff]  ;;  %v1121_v56 = vld [vmem:[#allocation8 + $0x610] sm:$0xff] }
 0x22e   : > { %1390 = vmatmul.mubr.f32.gmra.mrb[58].mxu0 %v7083_v13  ;;  %5151 = vmatpush1.bf16.msra.mxu1 %v5150_v7  ;;  %v7095_v57 = vmax.f32 %v724_v23, 0.0  ;;  %v5252_v37 = vpack.c.bf16 %v1118_v18, %v1112_v17  ;;  %v1130_v29 = vld [vmem:[#allocation8 + $0x658] sm:$0xff]  ;;  %v1127_v3 = vld [vmem:[#allocation8 + $0x640] sm:$0xff] }
 0x22f   : > { %v7093_v1 = vmax.f32 %v726_v39, 0.0  ;;  %5247 = vmatpush1.bf16.msra.mxu0 %v5246_v16  ;;  %v729_v45 = vpop.f32.mrb[30].mxu0  ;;  %1556 = vmatprep.mubr.f32.mxu1 %v9426_v53  ;;  %v1115_v39 = vld [vmem:[#allocation8 + $0x5e0] sm:$0xff]  ;;  %v1117_v16 = vld [vmem:[#allocation8 + $0x5f0] sm:$0xff]  ;;  %v5256_v18 = vpack.c.bf16 %v1130_v29, %v1124_v52 }
 0x230   : > { %v730_v46 = vadd.f32 %v729_v45, %v6867_v58  ;;  %v731_v21 = vpop.f32.mrb[31].mxu0  ;;  %5153 = vmatprep.subr.bf16.mxu1 %v5152_v36  ;;  %5249 = vmatprep.subr.bf16.mxu0 %v5248_v40  ;;  %v1128_v58 = vld [vmem:[#allocation8 + $0x648] sm:$0xff]  ;;  %v5158_v36 = vpack.c.bf16 %v1115_v39, %v1109_v60  ;;  %v5254_v40 = vpack.c.bf16 %v1117_v16, %v1111_v5  ;;  %v1134_v45 = vld [vmem:[#allocation8 + $0x678] sm:$0xff]  ;;  %v1133_v39 = vld [vmem:[#allocation8 + $0x670] sm:$0xff] }
 0x231   : > { %v732_v7 = vadd.f32 %v731_v21, %v6870_v59  ;;  %1395 = vmatprep.mubr.f32.mxu0 %v7093_v1  ;;  %1557 = vmatmul.mubr.f32.gmra.mrb[44].mxu1 %v7089_v15  ;;  %v7107_v59 = vmax.f32 %v876_v63, 0.0  ;;  %v5160_v17 = vpack.c.bf16 %v1128_v58, %v1122_v24  ;;  %v1140_v21 = vld [vmem:[#allocation8 + $0x6a8] sm:$0xff]  ;;  %v5162_v63 = vpack.c.bf16 %v1127_v3, %v1121_v56  ;;  %v1146_v5 = vld [vmem:[#allocation8 + $0x6d8] sm:$0xff]  ;;  %v1135_v58 = vld [vmem:[#allocation8 + $0x680] sm:$0xff] }
 0x232   : > { %1396 = vmatmul.mubr.f32.gmra.mrb[60].mxu0 %v7095_v57  ;;  %5155 = vmatpush1.bf16.msra.mxu1 %v5154_v43  ;;  %v7109_v47 = vmax.f32 %v730_v46, 0.0  ;;  %v1123_v43 = vld [vmem:[#allocation8 + $0x620] sm:$0xff]  ;;  %v1136_v46 = vld [vmem:[#allocation8 + $0x688] sm:$0xff]  ;;  %v5164_v60 = vpack.c.bf16 %v1140_v21, %v1134_v45  ;;  %v1141_v52 = vld [vmem:[#allocation8 + $0x6b0] sm:$0xff] }
 0x233   : > { %v7105_v23 = vmax.f32 %v732_v7, 0.0  ;;  %5251 = vmatpush1.bf16.msra.mxu0 %v5250_v19  ;;  %1562 = vmatprep.mubr.f32.mxu1 %v9426_v53  ;;  %v1129_v19 = vld [vmem:[#allocation8 + $0x650] sm:$0xff]  ;;  %v1139_v7 = vld [vmem:[#allocation8 + $0x6a0] sm:$0xff]  ;;  %v1152_v16 = vld [vmem:[#allocation8 + $0x708] sm:$0xff] }
 0x234   : > { %5157 = vmatprep.subr.bf16.mxu1 %v5156_v0  ;;  %5253 = vmatprep.subr.bf16.mxu0 %v5252_v37  ;;  %v1142_v0 = vld [vmem:[#allocation8 + $0x6b8] sm:$0xff]  ;;  %v5258_v37 = vpack.c.bf16 %v1129_v19, %v1123_v43  ;;  %v5166_v29 = vpack.c.bf16 %v1139_v7, %v1133_v39  ;;  %v1145_v56 = vld [vmem:[#allocation8 + $0x6d0] sm:$0xff]  ;;  %v1151_v3 = vld [vmem:[#allocation8 + $0x700] sm:$0xff] }
 0x235   : > { %1401 = vmatprep.mubr.f32.mxu0 %v7105_v23  ;;  %1563 = vmatmul.mubr.f32.gmra.mrb[46].mxu1 %v7107_v59  ;;  %v5260_v24 = vpack.c.bf16 %v1142_v0, %v1136_v46  ;;  %v1164_v45 = vld [vmem:[#allocation8 + $0x768] sm:$0xff]  ;;  %v1147_v43 = vld [vmem:[#allocation8 + $0x6e0] sm:$0xff]  ;;  %v1153_v19 = vld [vmem:[#allocation8 + $0x710] sm:$0xff] }
 0x236   : > { %1402 = vmatmul.mubr.f32.gmra.mrb[62].mxu0 %v7109_v47  ;;  %5159 = vmatpush1.bf16.msra.mxu1 %v5158_v36  ;;  %v1148_v36 = vld [vmem:[#allocation8 + $0x6e8] sm:$0xff]  ;;  %v1166_v46 = vld [vmem:[#allocation8 + $0x778] sm:$0xff]  ;;  %v5266_v39 = vpack.c.bf16 %v1153_v19, %v1147_v43  ;;  %v1181_v43 = vld [vmem:[#allocation8 + $0x7f0] sm:$0xff] }
 0x237   : > { %1633 = vmatprep.mubr.f32.mxu1 %v6878_v12  ;;  %5255 = vmatpush1.bf16.msra.mxu0 %v5254_v40  ;;  %v1154_v40 = vld [vmem:[#allocation8 + $0x718] sm:$0xff]  ;;  %v1187_v19 = vld [vmem:[#allocation8 + $0x820] sm:$0xff] }
 0x238   : > { %1955 = vmatprep.mubr.f32.mxu0 %v6878_v12  ;;  %5161 = vmatprep.subr.bf16.mxu1 %v5160_v17  ;;  %v5168_v12 = vpack.c.bf16 %v1152_v16, %v1146_v5  ;;  %v5262_v17 = vpack.c.bf16 %v1141_v52, %v1135_v58  ;;  %v5264_v21 = vpack.c.bf16 %v1154_v40, %v1148_v36  ;;  %v1170_v7 = vld [vmem:[#allocation8 + $0x798] sm:$0xff]  ;;  %v1159_v16 = vld [vmem:[#allocation8 + $0x740] sm:$0xff]  ;;  %v1172_v58 = vld [vmem:[#allocation8 + $0x7a8] sm:$0xff] }
 0x239   : > { %5257 = vmatprep.subr.bf16.mxu0 %v5256_v18  ;;  %1634 = vmatmul.mubr.f32.vlgmr.msra.gmra.mrb[48].mxu1 %v6880_v20  ;;  %v1158_v18 = vld [vmem:[#allocation8 + $0x738] sm:$0xff]  ;;  %v1175_v36 = vld [vmem:[#allocation8 + $0x7c0] sm:$0xff] }
 0x23a   : > { %1639 = vmatprep.mubr.f32.mxu1 %v6891_v35  ;;  %5163 = vmatpush1.bf16.msra.mxu1 %v5162_v63  ;;  %v1160_v63 = vld [vmem:[#allocation8 + $0x748] sm:$0xff]  ;;  %v5172_v0 = vpack.c.bf16 %v1164_v45, %v1158_v18  ;;  %v1178_v52 = vld [vmem:[#allocation8 + $0x7d8] sm:$0xff]  ;;  %v1177_v18 = vld [vmem:[#allocation8 + $0x7d0] sm:$0xff] }
 0x23b   : > { %1956 = vmatmul.mubr.f32.vlgmr.msra.gmra.mrb[64].mxu0 %v6880_v20  ;;  %5165 = vmatprep.subr.bf16.mxu1 %v5164_v60  ;;  %v5170_v20 = vpack.c.bf16 %v1151_v3, %v1145_v56  ;;  %v1163_v60 = vld [vmem:[#allocation8 + $0x760] sm:$0xff]  ;;  %v5268_v5 = vpack.c.bf16 %v1166_v46, %v1160_v63  ;;  %v1188_v56 = vld [vmem:[#allocation8 + $0x828] sm:$0xff]  ;;  %v5272_v3 = vpack.c.bf16 %v1178_v52, %v1172_v58  ;;  %v1194_v63 = vld [vmem:[#allocation8 + $0x858] sm:$0xff] }
 0x23c   : > { %5259 = vmatpush1.bf16.msra.mxu0 %v5258_v37  ;;  %1961 = vmatprep.mubr.f32.mxu0 %v6891_v35  ;;  %v1157_v35 = vld [vmem:[#allocation8 + $0x730] sm:$0xff]  ;;  %v1176_v37 = vld [vmem:[#allocation8 + $0x7c8] sm:$0xff]  ;;  %v1195_v52 = vld [vmem:[#allocation8 + $0x860] sm:$0xff] }
 0x23d   : > { %1640 = vmatmul.mubr.f32.gmra.mrb[50].mxu1 %v6895_v42  ;;  %5261 = vmatprep.subr.bf16.mxu0 %v5260_v24  ;;  %v1165_v24 = vld [vmem:[#allocation8 + $0x770] sm:$0xff]  ;;  %v1184_v45 = vld [vmem:[#allocation8 + $0x808] sm:$0xff] }
 0x23e   : > { %1645 = vmatprep.mubr.f32.mxu1 %v6907_v4  ;;  %5167 = vmatpush1.bf16.msra.mxu1 %v5166_v29  ;;  %v1169_v29 = vld [vmem:[#allocation8 + $0x790] sm:$0xff]  ;;  %v5270_v40 = vpack.c.bf16 %v1165_v24, %v1159_v16  ;;  %v1200_v46 = vld [vmem:[#allocation8 + $0x888] sm:$0xff]  ;;  %v1206_v24 = vld [vmem:[#allocation8 + $0x8b8] sm:$0xff] }
 0x23f   : > { %1962 = vmatmul.mubr.f32.gmra.mrb[66].mxu0 %v6895_v42  ;;  %5169 = vmatprep.subr.bf16.mxu1 %v5168_v12  ;;  %v5174_v42 = vpack.c.bf16 %v1163_v60, %v1157_v35  ;;  %v1182_v12 = vld [vmem:[#allocation8 + $0x7f8] sm:$0xff]  ;;  %v1183_v35 = vld [vmem:[#allocation8 + $0x800] sm:$0xff]  ;;  %v1189_v60 = vld [vmem:[#allocation8 + $0x830] sm:$0xff] }
 0x240   : > { %1967 = vmatprep.mubr.f32.mxu0 %v6907_v4  ;;  %5263 = vmatpush1.bf16.msra.mxu0 %v5262_v17  ;;  %v5176_v4 = vpack.c.bf16 %v1176_v37, %v1170_v7  ;;  %v1171_v17 = vld [vmem:[#allocation8 + $0x7a0] sm:$0xff]  ;;  %v1202_v7 = vld [vmem:[#allocation8 + $0x898] sm:$0xff]  ;;  %v1193_v37 = vld [vmem:[#allocation8 + $0x850] sm:$0xff]  ;;  %v5278_v16 = vpack.c.bf16 %v1189_v60, %v1183_v35  ;;  %v6410_v60 = vmov 0  }
 0x241   : > { %1646 = vmatmul.mubr.f32.gmra.mrb[52].mxu1 %v6909_v8  ;;  %5265 = vmatprep.subr.bf16.mxu0 %v5264_v21  ;;  %v1190_v21 = vld [vmem:[#allocation8 + $0x838] sm:$0xff] }
 0x242   : > { %1651 = vmatprep.mubr.f32.mxu1 %v6923_v27  ;;  %5171 = vmatpush1.bf16.msra.mxu1 %v5170_v20  ;;  %v5274_v20 = vpack.c.bf16 %v1177_v18, %v1171_v17  ;;  %v1207_v17 = vld [vmem:[#allocation8 + $0x8c0] sm:$0xff]  ;;  %v1213_v18 = vld [vmem:[#allocation8 + $0x8f0] sm:$0xff] }
 0x243   : > { %1968 = vmatmul.mubr.f32.gmra.mrb[68].mxu0 %v6909_v8  ;;  %5173 = vmatprep.subr.bf16.mxu1 %v5172_v0  ;;  %v5178_v8 = vpack.c.bf16 %v1175_v36, %v1169_v29  ;;  %v5276_v0 = vpack.c.bf16 %v1190_v21, %v1184_v45  ;;  %v1208_v29 = vld [vmem:[#allocation8 + $0x8c8] sm:$0xff]  ;;  %v1214_v36 = vld [vmem:[#allocation8 + $0x8f8] sm:$0xff] }
 0x244   : > { %1973 = vmatprep.mubr.f32.mxu0 %v6923_v27  ;;  %5267 = vmatpush1.bf16.msra.mxu0 %v5266_v39  ;;  %v5180_v27 = vpack.c.bf16 %v1188_v56, %v1182_v12  ;;  %v1196_v39 = vld [vmem:[#allocation8 + $0x868] sm:$0xff]  ;;  %v1211_v12 = vld [vmem:[#allocation8 + $0x8e0] sm:$0xff]  ;;  %v9446_v35 = vld [vmem:[#allocation23_spill] sm:$0xff] }
 0x245   : > { %1652 = vmatmul.mubr.f32.gmra.mrb[54].mxu1 %v6927_v34  ;;  %5269 = vmatprep.subr.bf16.mxu0 %v5268_v5  ;;  %v1199_v5 = vld [vmem:[#allocation8 + $0x880] sm:$0xff]  ;;  %v5280_v58 = vpack.c.bf16 %v1202_v7, %v1196_v39  ;;  %v4060_v45 = vld [vmem:[#allocation13] sm:$0xff] }
 0x246   : > { %1657 = vmatprep.mubr.f32.mxu1 %v6941_v61  ;;  %5175 = vmatpush1.bf16.msra.mxu1 %v5174_v42  ;;  %v1212_v42 = vld [vmem:[#allocation8 + $0x8e8] sm:$0xff]  ;;  %v9447_v39 = vld [vmem:[#allocation24_spill] sm:$0xff] }
 0x247   : > { %1974 = vmatmul.mubr.f32.gmra.mrb[70].mxu0 %v6927_v34  ;;  %5177 = vmatprep.subr.bf16.mxu1 %v5176_v4  ;;  %v5182_v34 = vpack.c.bf16 %v1187_v19, %v1181_v43  ;;  %v1201_v4 = vld [vmem:[#allocation8 + $0x890] sm:$0xff] }
 0x248   : > { %1979 = vmatprep.mubr.f32.mxu0 %v6941_v61  ;;  %5271 = vmatpush1.bf16.msra.mxu0 %v5270_v40  ;;  %v5184_v61 = vpack.c.bf16 %v1200_v46, %v1194_v63  ;;  %v1205_v40 = vld [vmem:[#allocation8 + $0x8b0] sm:$0xff]  ;;  %v5282_v56 = vpack.c.bf16 %v1201_v4, %v1195_v52  ;;  %v9445_v63 = vld [vmem:[#allocation33_spill] sm:$0xff] }
 0x249   : > { %1658 = vmatmul.mubr.f32.gmra.mrb[56].mxu1 %v6943_v6  ;;  %5273 = vmatprep.subr.bf16.mxu0 %v5272_v3  ;;  %v5284_v3 = vpack.c.bf16 %v1214_v36, %v1208_v29  ;;  %v9442_v43 = vld [vmem:[#allocation30_spill] sm:$0xff]  ;;  %v9443_v19 = vld [vmem:[#allocation31_spill] sm:$0xff]  ;;  %v2213_v46 = vld [vmem:[#allocation11] sm:$0x3f] }
 0x24a   : > { %1663 = vmatprep.mubr.f32.mxu1 %v6959_v28  ;;  %5179 = vmatpush1.bf16.msra.mxu1 %v5178_v8  ;;  %v5190_v8 = vpack.c.bf16 %v1211_v12, %v1205_v40  ;;  %vm2214_vm0 = vcmp.gt.f32.partialorder %v2213_v46, 0.5 }
 0x24b   : > { %1980 = vmatmul.mubr.f32.gmra.mrb[72].mxu0 %v6943_v6  ;;  %5181 = vmatprep.subr.bf16.mxu1 %v5180_v27  ;;  %v5186_v6 = vpack.c.bf16 %v1199_v5, %v1193_v37  ;;  %v9441_v27 = vld [vmem:[#allocation29_spill] sm:$0xff] }
 0x24c   : > { %1985 = vmatprep.mubr.f32.mxu0 %v6959_v28  ;;  %5275 = vmatpush1.bf16.msra.mxu0 %v5274_v20  ;;  %v5188_v28 = vpack.c.bf16 %v1212_v42, %v1206_v24  ;;  %v9444_v20 = vld [vmem:[#allocation32_spill] sm:$0xff] }
 0x24d   : > { %1664 = vmatmul.mubr.f32.gmra.mrb[58].mxu1 %v6963_v38  ;;  %5277 = vmatprep.subr.bf16.mxu0 %v5276_v0  ;;  %v7275_v0 = vld [vmem:[#allocation10] sm:$0x3f] }
 0x24e   : > { %1669 = vmatprep.mubr.f32.mxu1 %v6977_v9  ;;  %5183 = vmatpush1.bf16.msra.mxu1 %v5182_v34  ;;  %v7281_v34 = vsel %vm2214_vm0, 1, %v6410_v60 }
 0x24f   : > { %1986 = vmatmul.mubr.f32.gmra.mrb[74].mxu0 %v6963_v38  ;;  %5185 = vmatprep.subr.bf16.mxu1 %v5184_v61  ;;  %v4061_v38 = vld [vmem:[#allocation13 + $0x8] sm:$0xff]  ;;  %v2319_v60 = vrot.slane %v7281_v34, %v9447_v39 }
 0x250   : > { %1991 = vmatprep.mubr.f32.mxu0 %v6977_v9  ;;  %5279 = vmatpush1.bf16.msra.mxu0 %v5278_v16  ;;  %v5286_v9 = vpack.c.bf16 %v1213_v18, %v1207_v17  ;;  %v7146_v21 = vpack.c.bf16 %v4061_v38, %v4060_v45 }
 0x251   : > { %1670 = vmatmul.mubr.f32.gmra.mrb[60].mxu1 %v6979_v14  ;;  %5281 = vmatprep.subr.bf16.mxu0 %v5280_v58  ;;  %vm7325_vm2 = vcmp.eq.s32.totalorder %v2319_v60, 1 }
 0x252   : > { %1675 = vmatprep.mubr.f32.mxu1 %v6995_v44  ;;  %5187 = vmatpush1.bf16.msra.mxu1 %v5186_v6  ;;  %9430 = vst [vmem:[#allocation34_spill] sm:$0xff] %v7146_v21 }
 0x253   : > { %1992 = vmatmul.mubr.f32.gmra.mrb[76].mxu0 %v6979_v14  ;;  %5189 = vmatprep.subr.bf16.mxu1 %v5188_v28  ;;  %v4062_v14 = vld [vmem:[#allocation13 + $0x10] sm:$0xff] }
 0x254   : > { %1997 = vmatprep.mubr.f32.mxu0 %v6995_v44  ;;  %5283 = vmatpush1.bf16.msra.mxu0 %v5282_v56  ;;  %v4063_v44 = vld [vmem:[#allocation13 + $0x18] sm:$0xff] }
 0x255   : > { %1676 = vmatmul.mubr.f32.gmra.mrb[62].mxu1 %v6999_v2  ;;  %5285 = vmatprep.subr.bf16.mxu0 %v5284_v3 }
 0x256   : > { %1681 = vmatprep.mubr.f32.mxu1 %v7009_v25  ;;  %5191 = vmatpush1.bf16.msra.mxu1 %v5190_v8 }
 0x257   : > { %1998 = vmatmul.mubr.f32.gmra.mrb[78].mxu0 %v6999_v2  ;;  %v7185_v2 = vpack.c.bf16 %v4063_v44, %v4062_v14 }
 0x258   : > { %2003 = vmatprep.mubr.f32.mxu0 %v7009_v25  ;;  %5287 = vmatpush1.bf16.msra.mxu0 %v5286_v9  ;;  %v4064_v25 = vld [vmem:[#allocation13 + $0x20] sm:$0xff] }
 0x259   : > { %1682 = vmatmul.mubr.f32.gmra.mrb[64].mxu1 %v7011_v32  ;;  %5321 = vmatprep.subr.bf16.mxu0 %v7146_v21  ;;  %9431 = vst [vmem:[#allocation35_spill] sm:$0xff] %v7185_v2 }
 0x25a   : > { %1687 = vmatprep.mubr.f32.mxu1 %v7023_v30 }
 0x25b   : > { %2004 = vmatmul.mubr.f32.gmra.mrb[80].mxu0 %v7011_v32  ;;  %v4065_v32 = vld [vmem:[#allocation13 + $0x28] sm:$0xff] }
 0x25c   : > { %2009 = vmatprep.mubr.f32.mxu0 %v7023_v30  ;;  %v7193_v30 = vpack.c.bf16 %v4065_v32, %v4064_v25 }
 0x25d   : > { %1688 = vmatmul.mubr.f32.gmra.mrb[66].mxu1 %v7027_v48 }
 0x25e   : > { %1693 = vmatprep.mubr.f32.mxu1 %v7037_v11  ;;  %9432 = vst [vmem:[#allocation36_spill] sm:$0xff] %v7193_v30 }
 0x25f   : > { %2010 = vmatmul.mubr.f32.gmra.mrb[82].mxu0 %v7027_v48  ;;  %v4066_v48 = vld [vmem:[#allocation13 + $0x30] sm:$0xff] }
 0x260   : > { %2015 = vmatprep.mubr.f32.mxu0 %v7037_v11  ;;  %v4067_v11 = vld [vmem:[#allocation13 + $0x38] sm:$0xff] }
 0x261   : > { %1694 = vmatmul.mubr.f32.gmra.mrb[68].mxu1 %v7039_v51 }
 0x262   : > { %1699 = vmatprep.mubr.f32.mxu1 %v7051_v55 }
 0x263   : > { %2016 = vmatmul.mubr.f32.gmra.mrb[84].mxu0 %v7039_v51  ;;  %v4068_v51 = vld [vmem:[#allocation13 + $0x40] sm:$0xff] }
 0x264   : > { %2021 = vmatprep.mubr.f32.mxu0 %v7051_v55  ;;  %v4069_v55 = vld [vmem:[#allocation13 + $0x48] sm:$0xff] }
 0x265   : > { %1700 = vmatmul.mubr.f32.gmra.mrb[70].mxu1 %v7055_v10 }
 0x266   : > { %1705 = vmatprep.mubr.f32.mxu1 %v7065_v33 }
 0x267   : > { %2022 = vmatmul.mubr.f32.gmra.mrb[86].mxu0 %v7055_v10  ;;  %v4070_v10 = vld [vmem:[#allocation13 + $0x50] sm:$0xff] }
 0x268   : > { %2027 = vmatprep.mubr.f32.mxu0 %v7065_v33  ;;  %v4071_v33 = vld [vmem:[#allocation13 + $0x58] sm:$0xff] }
 0x269   : > { %1706 = vmatmul.mubr.f32.gmra.mrb[72].mxu1 %v7067_v54 }
 0x26a   : > { %1711 = vmatprep.mubr.f32.mxu1 %v7079_v26 }
 0x26b   : > { %2028 = vmatmul.mubr.f32.gmra.mrb[88].mxu0 %v7067_v54  ;;  %v4072_v54 = vld [vmem:[#allocation13 + $0x60] sm:$0xff] }
 0x26c   : > { %2033 = vmatprep.mubr.f32.mxu0 %v7079_v26  ;;  %v4073_v26 = vld [vmem:[#allocation13 + $0x68] sm:$0xff] }
 0x26d   : > { %1712 = vmatmul.mubr.f32.gmra.mrb[74].mxu1 %v7083_v13 }
 0x26e   : > { %1717 = vmatprep.mubr.f32.mxu1 %v7093_v1 }
 0x26f   : > { %2034 = vmatmul.mubr.f32.gmra.mrb[90].mxu0 %v7083_v13  ;;  %v7225_v13 = vpack.c.bf16 %v4073_v26, %v4072_v54 }
 0x270   : > { %2039 = vmatprep.mubr.f32.mxu0 %v7093_v1  ;;  %v4074_v1 = vld [vmem:[#allocation13 + $0x70] sm:$0xff] }
 0x271   : > { %1718 = vmatmul.mubr.f32.gmra.mrb[76].mxu1 %v7095_v57 }
 0x272   : > { %1723 = vmatprep.mubr.f32.mxu1 %v7105_v23 }
 0x273   : > { %2040 = vmatmul.mubr.f32.gmra.mrb[92].mxu0 %v7095_v57  ;;  %v4075_v57 = vld [vmem:[#allocation13 + $0x78] sm:$0xff] }
 0x274   : > { %2045 = vmatprep.mubr.f32.mxu0 %v7105_v23  ;;  %v7233_v23 = vpack.c.bf16 %v4075_v57, %v4074_v1 }
 0x275   : > { %1724 = vmatmul.mubr.f32.gmra.mrb[78].mxu1 %v7109_v47 }
 0x276   : > { %1794 = vmatprep.mubr.f32.mxu1 %v9426_v53 }
 0x277   : > { %2046 = vmatmul.mubr.f32.gmra.mrb[94].mxu0 %v7109_v47  ;;  %v9440_v47 = vld [vmem:[#allocation28_spill] sm:$0xff] }
 0x278   : > { %2116 = vmatprep.mubr.f32.mxu0 %v9426_v53 }
 0x279   : > { %1795 = vmatmul.mubr.f32.vlgmr.msra.gmra.mrb[48].mxu1 %v6883_v22 }
 0x27a   : > { %1800 = vmatprep.mubr.f32.mxu1 %v9426_v53 }
 0x27b   : > { %2117 = vmatmul.mubr.f32.vlgmr.msra.gmra.mrb[64].mxu0 %v6883_v22  ;;  %v7201_v22 = vpack.c.bf16 %v4067_v11, %v4066_v48 }
 0x27c   : > { %2122 = vmatprep.mubr.f32.mxu0 %v9426_v53  ;;  %5323 = vmatpush3.bf16.msra.mxu0 %v7146_v21 }
 0x27d   : > { %1801 = vmatmul.mubr.f32.gmra.mrb[50].mxu1 %v6893_v41  ;;  %5325 = vmatprep.subr.bf16.mxu0 %v7185_v2  ;;  %9433 = vst [vmem:[#allocation37_spill] sm:$0xff] %v7201_v22 }
 0x27e   : > { %1806 = vmatprep.mubr.f32.mxu1 %v9426_v53 }
 0x27f   : > { %2123 = vmatmul.mubr.f32.gmra.mrb[66].mxu0 %v6893_v41  ;;  %v7209_v41 = vpack.c.bf16 %v4069_v55, %v4068_v51 }
 0x280   : > { %2128 = vmatprep.mubr.f32.mxu0 %v9426_v53  ;;  %5327 = vmatpush3.bf16.msra.mxu0 %v7185_v2 }
 0x281   : > { %1807 = vmatmul.mubr.f32.gmra.mrb[52].mxu1 %v6903_v62  ;;  %5329 = vmatprep.subr.bf16.mxu0 %v7193_v30  ;;  %9434 = vst [vmem:[#allocation38_spill] sm:$0xff] %v7209_v41 }
 0x282   : > { %1812 = vmatprep.mubr.f32.mxu1 %v9426_v53 }
 0x283   : > { %2129 = vmatmul.mubr.f32.gmra.mrb[68].mxu0 %v6903_v62  ;;  %v7217_v62 = vpack.c.bf16 %v4071_v33, %v4070_v10 }
 0x284   : > { %2134 = vmatprep.mubr.f32.mxu0 %v9426_v53  ;;  %5331 = vmatpush3.bf16.msra.mxu0 %v7193_v30 }
 0x285   : > { %1813 = vmatmul.mubr.f32.gmra.mrb[54].mxu1 %v6925_v31  ;;  %5333 = vmatprep.subr.bf16.mxu0 %v7201_v22  ;;  %9435 = vst [vmem:[#allocation39_spill] sm:$0xff] %v7217_v62 }
 0x286   : > { %1818 = vmatprep.mubr.f32.mxu1 %v9426_v53 }
 0x287   : > { %2135 = vmatmul.mubr.f32.gmra.mrb[70].mxu0 %v6925_v31  ;;  %v9436_v31 = vld [vmem:[#allocation26_spill] sm:$0xff] }
 0x288   : > { %2140 = vmatprep.mubr.f32.mxu0 %v9426_v53  ;;  %5335 = vmatpush3.bf16.msra.mxu0 %v7201_v22  ;;  %9437 = vst [vmem:[#allocation26_spill] sm:$0xff] %v7225_v13 }
 0x289   : > { %1819 = vmatmul.mubr.f32.gmra.mrb[56].mxu1 %v6937_v50  ;;  %5337 = vmatprep.subr.bf16.mxu0 %v7209_v41 }
 0x28a   : > { %1824 = vmatprep.mubr.f32.mxu1 %v9426_v53 }
 0x28b   : > { %2141 = vmatmul.mubr.f32.gmra.mrb[72].mxu0 %v6937_v50  ;;  %v9438_v50 = vld [vmem:[#allocation27_spill] sm:$0xff] }
 0x28c   : > { %2146 = vmatprep.mubr.f32.mxu0 %v9426_v53  ;;  %5339 = vmatpush3.bf16.msra.mxu0 %v7209_v41  ;;  %9439 = vst [vmem:[#allocation27_spill] sm:$0xff] %v7233_v23 }
 0x28d   : > { %1825 = vmatmul.mubr.f32.gmra.mrb[58].mxu1 %v9436_v31  ;;  %5341 = vmatprep.subr.bf16.mxu0 %v7217_v62 }
 0x28e   : > { %1830 = vmatprep.mubr.f32.mxu1 %v9426_v53 }
 0x28f   : > { %2147 = vmatmul.mubr.f32.gmra.mrb[74].mxu0 %v9436_v31 }
 0x290   : > { %2152 = vmatprep.mubr.f32.mxu0 %v9426_v53  ;;  %5343 = vmatpush3.bf16.msra.mxu0 %v7217_v62 }
 0x291   : > { %1831 = vmatmul.mubr.f32.gmra.mrb[60].mxu1 %v9438_v50  ;;  %5345 = vmatprep.subr.bf16.mxu0 %v7225_v13 }
 0x292   : > { %1836 = vmatprep.mubr.f32.mxu1 %v9426_v53 }
 0x293   : > { %2153 = vmatmul.mubr.f32.gmra.mrb[76].mxu0 %v9438_v50 }
 0x294   : > { %2158 = vmatprep.mubr.f32.mxu0 %v9426_v53  ;;  %5347 = vmatpush3.bf16.msra.mxu0 %v7225_v13 }
 0x295   : > { %1837 = vmatmul.mubr.f32.gmra.mrb[62].mxu1 %v9440_v47  ;;  %5349 = vmatprep.subr.bf16.mxu0 %v7233_v23 }
 0x296   : > { %1842 = vmatprep.mubr.f32.mxu1 %v9426_v53 }
 0x297   : > { %2159 = vmatmul.mubr.f32.gmra.mrb[78].mxu0 %v9440_v47 }
 0x298   : > { %2164 = vmatprep.mubr.f32.mxu0 %v9426_v53  ;;  %5351 = vmatpush3.bf16.msra.mxu0 %v7233_v23 }
 0x299   : > { %1843 = vmatmul.mubr.f32.gmra.mrb[64].mxu1 %v9441_v27 }
 0x29a   : > { %1848 = vmatprep.mubr.f32.mxu1 %v9426_v53 }
 0x29b   : > { %2165 = vmatmul.mubr.f32.gmra.mrb[80].mxu0 %v9441_v27 }
 0x29c   : > { %2170 = vmatprep.mubr.f32.mxu0 %v9426_v53 }
 0x29d   : > { %1849 = vmatmul.mubr.f32.gmra.mrb[66].mxu1 %v9442_v43 }
 0x29e   : > { %1854 = vmatprep.mubr.f32.mxu1 %v9426_v53 }
 0x29f   : > { %2171 = vmatmul.mubr.f32.gmra.mrb[82].mxu0 %v9442_v43 }
 0x2a0   : > { %2176 = vmatprep.mubr.f32.mxu0 %v9426_v53 }
 0x2a1   : > { %1855 = vmatmul.mubr.f32.gmra.mrb[68].mxu1 %v9443_v19 }
 0x2a2   : > { %1860 = vmatprep.mubr.f32.mxu1 %v9426_v53 }
 0x2a3   : > { %2177 = vmatmul.mubr.f32.gmra.mrb[84].mxu0 %v9443_v19 }
 0x2a4   : > { %2182 = vmatprep.mubr.f32.mxu0 %v9426_v53 }
 0x2a5   : > { %1861 = vmatmul.mubr.f32.gmra.mrb[70].mxu1 %v9444_v20 }
 0x2a6   : > { %1866 = vmatprep.mubr.f32.mxu1 %v9426_v53 }
 0x2a7   : > { %2183 = vmatmul.mubr.f32.gmra.mrb[86].mxu0 %v9444_v20 }
 0x2a8   : > { %2188 = vmatprep.mubr.f32.mxu0 %v9426_v53 }
 0x2a9   : > { %1867 = vmatmul.mubr.f32.gmra.mrb[72].mxu1 %v9445_v63 }
 0x2aa   : > { %1872 = vmatprep.mubr.f32.mxu1 %v9426_v53 }
 0x2ab   : > { %2189 = vmatmul.mubr.f32.gmra.mrb[88].mxu0 %v9445_v63 }
 0x2ac   : > { %2194 = vmatprep.mubr.f32.mxu0 %v9426_v53 }
 0x2ad   : > { %1873 = vmatmul.mubr.f32.gmra.mrb[74].mxu1 %v7081_v49 }
 0x2ae   : > { %1878 = vmatprep.mubr.f32.mxu1 %v9426_v53 }
 0x2af   : > { %2195 = vmatmul.mubr.f32.gmra.mrb[90].mxu0 %v7081_v49  ;;  %v7279_v49 = vrot.slane %v7275_v0, %v9446_v35 }
 0x2b0   : > { %2200 = vmatprep.mubr.f32.mxu0 %v9426_v53 }
 0x2b1   : > { %1879 = vmatmul.mubr.f32.gmra.mrb[76].mxu1 %v7089_v15 }
 0x2b2   : > { %1884 = vmatprep.mubr.f32.mxu1 %v9426_v53 }
 0x2b3   : > { %2201 = vmatmul.mubr.f32.gmra.mrb[92].mxu0 %v7089_v15  ;;  %v7285_v15 = vrot.slane %v7275_v0, %v9447_v39 }
 0x2b4   : > { %2206 = vmatprep.mubr.f32.mxu0 %v9426_v53 }
 0x2b5   : > { %1885 = vmatmul.mubr.f32.gmra.mrb[78].mxu1 %v7107_v59 }
 0x2b7   : > { %2207 = vmatmul.mubr.f32.gmra.mrb[94].mxu0 %v7107_v59  ;;  %v2315_v59 = vrot.slane %v7281_v34, %v9446_v35 }
 0x2b9   : > { %vm7293_vm1 = vcmp.eq.s32.totalorder %v2315_v59, 1 }
 0x2cc   : > { %v1474_v7 = vpop.f32.mrb[16].mxu1 }
 0x2cd   : > { %v1313_v61 = vpop.f32.mrb[32].mxu0  ;;  %v1476_v5 = vpop.f32.mrb[17].mxu1 }
 0x2ce   : > { %v1314_v37 = vadd.f32 %v1313_v61, %v7279_v49  ;;  %v1315_v16 = vpop.f32.mrb[33].mxu0 }
 0x2cf   : > { %v1316_v24 = vadd.f32 %v1315_v16, %v7285_v15 }
 0x2d0   : > { %v1475_v42 = vadd.f32 %v1474_v7, %v1314_v37  ;;  %v1480_v52 = vpop.f32.mrb[18].mxu1 }
 0x2d1   : > { %v7291_v58 = vadd.f32 %v1476_v5, %v1316_v24  ;;  %v1319_v4 = vpop.f32.mrb[34].mxu0  ;;  %v1482_v28 = vpop.f32.mrb[19].mxu1 }
 0x2d2   : > { %v2215_v29 = vmax.f32 %v1475_v42, 0.0  ;;  %v1320_v36 = vadd.f32 %v1319_v4, %v7279_v49  ;;  %v1321_v40 = vpop.f32.mrb[35].mxu0 }
 0x2d3   : > { %v1322_v12 = vadd.f32 %v1321_v40, %v7285_v15 }
 0x2d4   : > { %v1481_v56 = vadd.f32 %v1480_v52, %v1320_v36  ;;  %v2342_v3 = vsel %vm7293_vm1, %v2215_v29, %v1475_v42  ;;  %v1486_v18 = vpop.f32.mrb[20].mxu1 }
 0x2d5   : > { %v7301_v17 = vadd.f32 %v1482_v28, %v1322_v12  ;;  %v1325_v8 = vpop.f32.mrb[36].mxu0  ;;  %4912 = vmatprep.mubr.f32.mxu0 %v2342_v3  ;;  %v1488_v9 = vpop.f32.mrb[21].mxu1 }
 0x2d6   : > { %v2221_v45 = vmax.f32 %v1481_v56, 0.0  ;;  %v1326_v38 = vadd.f32 %v1325_v8, %v7279_v49  ;;  %v1327_v14 = vpop.f32.mrb[37].mxu0 }
 0x2d7   : > { %v1328_v44 = vadd.f32 %v1327_v14, %v7285_v15 }
 0x2d8   : > { %v1487_v25 = vadd.f32 %v1486_v18, %v1326_v38  ;;  %v2348_v32 = vsel %vm7293_vm1, %v2221_v45, %v1481_v56  ;;  %v1492_v11 = vpop.f32.mrb[22].mxu1 }
 0x2d9   : > { %v7307_v48 = vadd.f32 %v1488_v9, %v1328_v44  ;;  %v1331_v51 = vpop.f32.mrb[38].mxu0  ;;  %4913 = vmatmul.mubr.f32.vlgmr.msra.gmra.mrb[96].mxu0 %v2348_v32  ;;  %v1494_v33 = vpop.f32.mrb[23].mxu1 }
 0x2da   : > { %v2227_v55 = vmax.f32 %v1487_v25, 0.0  ;;  %v1332_v10 = vadd.f32 %v1331_v51, %v7279_v49  ;;  %v1333_v54 = vpop.f32.mrb[39].mxu0 }
 0x2db   : > { %v1334_v26 = vadd.f32 %v1333_v54, %v7285_v15 }
 0x2dc   : > { %v1493_v31 = vadd.f32 %v1492_v11, %v1332_v10  ;;  %v2354_v1 = vsel %vm7293_vm1, %v2227_v55, %v1487_v25  ;;  %v1498_v50 = vpop.f32.mrb[24].mxu1 }
 0x2dd   : > { %v7313_v57 = vadd.f32 %v1494_v33, %v1334_v26  ;;  %v1337_v47 = vpop.f32.mrb[40].mxu0  ;;  %4915 = vmatprep.mubr.f32.mxu0 %v2354_v1  ;;  %v1500_v19 = vpop.f32.mrb[25].mxu1 }
 0x2de   : > { %v2233_v27 = vmax.f32 %v1493_v31, 0.0  ;;  %v1338_v43 = vadd.f32 %v1337_v47, %v7279_v49  ;;  %v1339_v20 = vpop.f32.mrb[41].mxu0 }
 0x2df   : > { %v1340_v63 = vadd.f32 %v1339_v20, %v7285_v15 }
 0x2e0   : > { %v1499_v46 = vadd.f32 %v1498_v50, %v1338_v43  ;;  %v2360_v35 = vsel %vm7293_vm1, %v2233_v27, %v1493_v31  ;;  %v1504_v61 = vpop.f32.mrb[26].mxu1 }
 0x2e1   : > { %v1501_v7 = vadd.f32 %v1500_v19, %v1340_v63  ;;  %v1343_v59 = vpop.f32.mrb[42].mxu0  ;;  %4916 = vmatmul.mubr.f32.gmra.mrb[98].mxu0 %v2360_v35  ;;  %v1506_v16 = vpop.f32.mrb[27].mxu1 }
 0x2e2   : > { %v2239_v37 = vmax.f32 %v1499_v46, 0.0  ;;  %v1344_v5 = vadd.f32 %v1343_v59, %v7279_v49  ;;  %v1345_v24 = vpop.f32.mrb[43].mxu0 }
 0x2e3   : > { %v2240_v42 = vmax.f32 %v1501_v7, 0.0  ;;  %v1346_v52 = vadd.f32 %v1345_v24, %v7285_v15 }
 0x2e4   : > { %v1505_v4 = vadd.f32 %v1504_v61, %v1344_v5  ;;  %v2366_v29 = vsel %vm7293_vm1, %v2239_v37, %v1499_v46  ;;  %v1510_v28 = vpop.f32.mrb[28].mxu1 }
 0x2e5   : > { %v1507_v39 = vadd.f32 %v1506_v16, %v1346_v52  ;;  %v1349_v40 = vpop.f32.mrb[44].mxu0  ;;  %4918 = vmatprep.mubr.f32.mxu0 %v2366_v29  ;;  %v7331_v12 = vsel %vm7325_vm2, %v2240_v42, %v1501_v7  ;;  %v1512_v18 = vpop.f32.mrb[29].mxu1 }
 0x2e6   : > { %v2245_v56 = vmax.f32 %v1505_v4, 0.0  ;;  %v1350_v3 = vadd.f32 %v1349_v40, %v7279_v49  ;;  %v1351_v8 = vpop.f32.mrb[45].mxu0 }
 0x2e7   : > { %v2246_v45 = vmax.f32 %v1507_v39, 0.0  ;;  %v1352_v38 = vadd.f32 %v1351_v8, %v7285_v15 }
 0x2e8   : > { %v1511_v9 = vadd.f32 %v1510_v28, %v1350_v3  ;;  %v2372_v14 = vsel %vm7293_vm1, %v2245_v56, %v1505_v4  ;;  %v1516_v25 = vpop.f32.mrb[30].mxu1 }
 0x2e9   : > { %v1513_v44 = vadd.f32 %v1512_v18, %v1352_v38  ;;  %v1355_v32 = vpop.f32.mrb[46].mxu0  ;;  %4919 = vmatmul.mubr.f32.gmra.mrb[100].mxu0 %v2372_v14  ;;  %v7339_v11 = vsel %vm7325_vm2, %v2246_v45, %v1507_v39  ;;  %v1518_v10 = vpop.f32.mrb[31].mxu1 }
 0x2ea   : > { %v2251_v51 = vmax.f32 %v1511_v9, 0.0  ;;  %v1356_v55 = vadd.f32 %v1355_v32, %v7279_v49  ;;  %v1357_v33 = vpop.f32.mrb[47].mxu0 }
 0x2eb   : > { %v2252_v54 = vmax.f32 %v1513_v44, 0.0  ;;  %v1358_v26 = vadd.f32 %v1357_v33, %v7285_v15 }
 0x2ec   : > { %v1517_v31 = vadd.f32 %v1516_v25, %v1356_v55  ;;  %v2378_v1 = vsel %vm7293_vm1, %v2251_v51, %v1511_v9  ;;  %v1522_v47 = vpop.f32.mrb[32].mxu1 }
 0x2ed   : > { %v1519_v50 = vadd.f32 %v1518_v10, %v1358_v26  ;;  %v1361_v27 = vpop.f32.mrb[48].mxu0  ;;  %4921 = vmatprep.mubr.f32.mxu0 %v2378_v1  ;;  %v7347_v43 = vsel %vm7325_vm2, %v2252_v54, %v1513_v44  ;;  %v1524_v63 = vpop.f32.mrb[33].mxu1 }
 0x2ee   : > { %v2257_v19 = vmax.f32 %v1517_v31, 0.0  ;;  %v1362_v20 = vadd.f32 %v1361_v27, %v7279_v49  ;;  %v1363_v46 = vpop.f32.mrb[49].mxu0 }
 0x2ef   : > { %v2258_v35 = vmax.f32 %v1519_v50, 0.0  ;;  %v1364_v60 = vadd.f32 %v1363_v46, %v7285_v15 }
 0x2f0   : > { %v1523_v7 = vadd.f32 %v1522_v47, %v1362_v20  ;;  %v2384_v61 = vsel %vm7293_vm1, %v2257_v19, %v1517_v31  ;;  %v1528_v37 = vpop.f32.mrb[34].mxu1 }
 0x2f1   : > { %v1525_v59 = vadd.f32 %v1524_v63, %v1364_v60  ;;  %v1367_v5 = vpop.f32.mrb[50].mxu0  ;;  %4922 = vmatmul.mubr.f32.gmra.mrb[102].mxu0 %v2384_v61  ;;  %v7355_v16 = vsel %vm7325_vm2, %v2258_v35, %v1519_v50  ;;  %v1530_v52 = vpop.f32.mrb[35].mxu1 }
 0x2f2   : > { %v2263_v24 = vmax.f32 %v1523_v7, 0.0  ;;  %v1368_v42 = vadd.f32 %v1367_v5, %v7279_v49  ;;  %v1369_v4 = vpop.f32.mrb[51].mxu0 }
 0x2f3   : > { %v2264_v29 = vmax.f32 %v1525_v59, 0.0  ;;  %v1370_v39 = vadd.f32 %v1369_v4, %v7285_v15 }
 0x2f4   : > { %v1529_v28 = vadd.f32 %v1528_v37, %v1368_v42  ;;  %v7361_v40 = vsel %vm7293_vm1, %v2263_v24, %v1523_v7  ;;  %v1534_v3 = vpop.f32.mrb[36].mxu1 }
 0x2f5   : > { %9452 = vst [vmem:[#allocation28_spill] sm:$0xff] %v7361_v40  ;;  %v1531_v56 = vadd.f32 %v1530_v52, %v1370_v39  ;;  %v1373_v18 = vpop.f32.mrb[52].mxu0  ;;  %v7365_v8 = vsel %vm7325_vm2, %v2264_v29, %v1525_v59  ;;  %v1536_v9 = vpop.f32.mrb[37].mxu1 }
 0x2f6   : > { %v2269_v45 = vmax.f32 %v1529_v28, 0.0  ;;  %v1374_v38 = vadd.f32 %v1373_v18, %v7279_v49  ;;  %v1375_v14 = vpop.f32.mrb[53].mxu0 }
 0x2f7   : > { %v2270_v44 = vmax.f32 %v1531_v56, 0.0  ;;  %v1376_v25 = vadd.f32 %v1375_v14, %v7285_v15 }
 0x2f8   : > { %v1535_v32 = vadd.f32 %v1534_v3, %v1374_v38  ;;  %v7371_v51 = vsel %vm7293_vm1, %v2269_v45, %v1529_v28  ;;  %v1540_v10 = vpop.f32.mrb[38].mxu1 }
 0x2f9   : > { %9453 = vst [vmem:[#allocation29_spill] sm:$0xff] %v7371_v51  ;;  %v1537_v55 = vadd.f32 %v1536_v9, %v1376_v25  ;;  %v1379_v33 = vpop.f32.mrb[54].mxu0  ;;  %v7375_v54 = vsel %vm7325_vm2, %v2270_v44, %v1531_v56  ;;  %v1542_v1 = vpop.f32.mrb[39].mxu1 }
 0x2fa   : > { %v2275_v26 = vmax.f32 %v1535_v32, 0.0  ;;  %v1380_v31 = vadd.f32 %v1379_v33, %v7279_v49  ;;  %v1381_v50 = vpop.f32.mrb[55].mxu0 }
 0x2fb   : > { %v2276_v47 = vmax.f32 %v1537_v55, 0.0  ;;  %v1382_v27 = vadd.f32 %v1381_v50, %v7285_v15 }
 0x2fc   : > { %v1541_v19 = vadd.f32 %v1540_v10, %v1380_v31  ;;  %v7381_v20 = vsel %vm7293_vm1, %v2275_v26, %v1535_v32  ;;  %v1546_v46 = vpop.f32.mrb[40].mxu1 }
 0x2fd   : > { %9454 = vst [vmem:[#allocation30_spill] sm:$0xff] %v7381_v20  ;;  %v1543_v63 = vadd.f32 %v1542_v1, %v1382_v27  ;;  %v1385_v35 = vpop.f32.mrb[56].mxu0  ;;  %v7385_v60 = vsel %vm7325_vm2, %v2276_v47, %v1537_v55  ;;  %v1548_v59 = vpop.f32.mrb[41].mxu1 }
 0x2fe   : > { %v2281_v7 = vmax.f32 %v1541_v19, 0.0  ;;  %v1386_v61 = vadd.f32 %v1385_v35, %v7279_v49  ;;  %v1387_v37 = vpop.f32.mrb[57].mxu0 }
 0x2ff   : > { %v2282_v5 = vmax.f32 %v1543_v63, 0.0  ;;  %v1388_v24 = vadd.f32 %v1387_v37, %v7285_v15 }
 0x300   : > { %v1547_v42 = vadd.f32 %v1546_v46, %v1386_v61  ;;  %v7391_v52 = vsel %vm7293_vm1, %v2281_v7, %v1541_v19  ;;  %v1552_v29 = vpop.f32.mrb[42].mxu1 }
 0x301   : > { %9455 = vst [vmem:[#allocation31_spill] sm:$0xff] %v7391_v52  ;;  %v1549_v4 = vadd.f32 %v1548_v59, %v1388_v24  ;;  %v1391_v39 = vpop.f32.mrb[58].mxu0  ;;  %v7395_v28 = vsel %vm7325_vm2, %v2282_v5, %v1543_v63  ;;  %v1554_v18 = vpop.f32.mrb[43].mxu1 }
 0x302   : > { %v2287_v56 = vmax.f32 %v1547_v42, 0.0  ;;  %v1392_v3 = vadd.f32 %v1391_v39, %v7279_v49  ;;  %v1393_v45 = vpop.f32.mrb[59].mxu0 }
 0x303   : > { %v2288_v38 = vmax.f32 %v1549_v4, 0.0  ;;  %v1394_v9 = vadd.f32 %v1393_v45, %v7285_v15 }
 0x304   : > { %v1553_v14 = vadd.f32 %v1552_v29, %v1392_v3  ;;  %v7401_v44 = vsel %vm7293_vm1, %v2287_v56, %v1547_v42  ;;  %v1558_v32 = vpop.f32.mrb[44].mxu1 }
 0x305   : > { %9456 = vst [vmem:[#allocation32_spill] sm:$0xff] %v7401_v44  ;;  %v1555_v25 = vadd.f32 %v1554_v18, %v1394_v9  ;;  %v1397_v55 = vpop.f32.mrb[60].mxu0  ;;  %v7405_v10 = vsel %vm7325_vm2, %v2288_v38, %v1549_v4  ;;  %v1560_v31 = vpop.f32.mrb[45].mxu1  ;;  %v9461_v9 = vld [vmem:[#allocation25_spill] sm:$0xff] }
 0x306   : > { %v2293_v33 = vmax.f32 %v1553_v14, 0.0  ;;  %v1398_v26 = vadd.f32 %v1397_v55, %v7279_v49  ;;  %v1399_v1 = vpop.f32.mrb[61].mxu0 }
 0x307   : > { %v2294_v50 = vmax.f32 %v1555_v25, 0.0  ;;  %v1400_v47 = vadd.f32 %v1399_v1, %v7285_v15 }
 0x308   : > { %v1559_v27 = vadd.f32 %v1558_v32, %v1398_v26  ;;  %v7411_v19 = vsel %vm7293_vm1, %v2293_v33, %v1553_v14  ;;  %v1564_v46 = vpop.f32.mrb[46].mxu1  ;;  %v7438_v14 = vrot.slane %v7275_v0, %v9461_v9  ;;  %v9462_v32 = vlaneseq }
 0x309   : > { %9457 = vst [vmem:[#allocation33_spill] sm:$0xff] %v7411_v19  ;;  %v1561_v63 = vadd.f32 %v1560_v31, %v1400_v47  ;;  %v1403_v35 = vpop.f32.mrb[62].mxu0  ;;  %v7415_v7 = vsel %vm7325_vm2, %v2294_v50, %v1555_v25  ;;  %v1566_v37 = vpop.f32.mrb[47].mxu1  ;;  %v2323_v25 = vrot.slane %v7281_v34, %v9461_v9  ;;  %v2216_v31 = vmax.f32 %v7291_v58, 0.0 }
 0x30a   : > { %v2299_v61 = vmax.f32 %v1559_v27, 0.0  ;;  %v1404_v59 = vadd.f32 %v1403_v35, %v7279_v49  ;;  %v1405_v5 = vpop.f32.mrb[63].mxu0  ;;  %v2439_v55 = vand.u32 127, %v9462_v32 }
 0x30b   : > { %v2300_v24 = vmax.f32 %v1561_v63, 0.0  ;;  %v1406_v42 = vadd.f32 %v1405_v5, %v7285_v15  ;;  %v9460_v15 = vld [vmem:[#allocation22_spill] sm:$0xff]  ;;  %vm7453_vm3 = vcmp.eq.s32.totalorder %v2323_v25, 1 }
 0x30c   : > { %v1565_v4 = vadd.f32 %v1564_v46, %v1404_v59  ;;  %v7421_v29 = vsel %vm7293_vm1, %v2299_v61, %v1559_v27  ;;  %v1235_v38 = vsub.s32 4, %v9460_v15  ;;  %vm2441_vm4 = vcmp.lt.s32.totalorder %v2439_v55, 32 }
 0x30d   : > { %9458 = vst [vmem:[#allocation23_spill] sm:$0xff] %v7421_v29  ;;  %v1567_v39 = vadd.f32 %v1566_v37, %v1406_v42  ;;  %v7425_v56 = vsel %vm7325_vm2, %v2300_v24, %v1561_v63  ;;  %vm2445_vm5 = vcmp.ge.s32.totalorder %v2439_v55, 32  ;;  %vm2446_vm6 = vcmp.lt.s32.totalorder %v2439_v55, 64 }
 0x30e   : > { %v2305_v3 = vmax.f32 %v1565_v4, 0.0  ;;  %v7444_v33 = vrot.slane %v7275_v0, %v1235_v38  ;;  %v7447_v26 = vrot.slane %v7281_v34, %v1235_v38  ;;  %v2222_v61 = vmax.f32 %v7301_v17, 0.0  ;;  %vm7475_vm9 = vmand %vm2445_vm5, %vm2446_vm6 }
 0x30f   : > { %v2306_v18 = vmax.f32 %v1567_v39, 0.0  ;;  %v2343_v37 = vsel %vm7325_vm2, %v2216_v31, %v7291_v58  ;;  %vm2450_vm8 = vcmp.ge.s32.totalorder %v2439_v55, 64  ;;  %vm2455_vm10 = vcmp.ge.s32.totalorder %v2439_v55, 96 }
 0x310   : > { %v7429_v49 = vsel %vm7293_vm1, %v2305_v3, %v1565_v4  ;;  %vm2340_vm7 = vcmp.eq.s32.totalorder %v7447_v26, 1  ;;  %vm2451_vm11 = vcmp.lt.s32.totalorder %v2439_v55, 96  ;;  %v1231_v55 = vsub.s32 3, %v9460_v15 }
 0x311   : > { %9459 = vst [vmem:[#allocation24_spill] sm:$0xff] %v7429_v49  ;;  %v7433_v45 = vsel %vm7325_vm2, %v2306_v18, %v1567_v39  ;;  %v7471_v39 = vsel %vm2441_vm4, 1.0, %v9426_v53  ;;  %vm7509_vm12 = vmand %vm2450_vm8, %vm2451_vm11 }
 0x34c   : > { %v1796_v6 = vpop.f32.mrb[48].mxu1 }
 0x34d   : > { %v5432_v1 = vadd.f32 %v1796_v6, %v7438_v14  ;;  %v7451_v50 = vpop.f32.mrb[49].mxu1  ;;  %v2228_v6 = vmax.f32 %v7307_v48, 0.0 }
 0x34e   : > { %v2118_v27 = vpop.f32.mrb[64].mxu0 }
 0x34f   : > { %v2217_v63 = vmax.f32 %v5432_v1, 0.0  ;;  %v5464_v46 = vadd.f32 %v2118_v27, %v7444_v33  ;;  %v7458_v35 = vpop.f32.mrb[65].mxu0  ;;  %v2355_v19 = vsel %vm7325_vm2, %v2228_v6, %v7307_v48  ;;  %v7540_v48 = vrot.slane %v7281_v34, %v1231_v55 }
 0x350   : > { %v1802_v59 = vpop.f32.mrb[50].mxu1  ;;  %v1239_v6 = vsub.s32 5, %v9460_v15 }
 0x351   : > { %v2344_v5 = vsel %vm7453_vm3, %v2217_v63, %v5432_v1  ;;  %v2219_v24 = vmax.f32 %v5464_v46, 0.0  ;;  %v5434_v42 = vadd.f32 %v1802_v59, %v7438_v14  ;;  %v7468_v4 = vpop.f32.mrb[51].mxu1  ;;  %v2349_v1 = vsel %vm7325_vm2, %v2222_v61, %v7301_v17 }
 0x352   : > { %v7473_v3 = vmul.f32 %v2344_v5, %v2343_v37  ;;  %v2124_v18 = vpop.f32.mrb[66].mxu0  ;;  %v7504_v17 = vsel %vm2455_vm10, 1.0, %v9426_v53  ;;  %v7556_v15 = vrot.slane %v7281_v34, %v1239_v6  ;;  %vm2339_vm13 = vcmp.eq.s32.totalorder %v7540_v48, 1 }
 0x353   : > { %v2346_v58 = vsel %vm2340_vm7, %v2219_v24, %v5464_v46  ;;  %v2223_v9 = vmax.f32 %v5434_v42, 0.0  ;;  %v5466_v25 = vadd.f32 %v2124_v18, %v7444_v33  ;;  %v7482_v32 = vpop.f32.mrb[67].mxu0  ;;  %v7553_v18 = vrot.slane %v7275_v0, %v1231_v55 }
 0x354   : > { %v7485_v31 = vmul.f32 %v2346_v58, %v2343_v37  ;;  %v1808_v27 = vpop.f32.mrb[52].mxu1  ;;  %v2476_v24 = vmul.f32 %v7471_v39, %v7473_v3  ;;  %v7500_v37 = vsel %vm7475_vm9, 1.0, %v9426_v53  ;;  %v7570_v34 = vrot.slane %v7275_v0, %v1239_v6 }
 0x355   : > { %v2350_v63 = vsel %vm7453_vm3, %v2223_v9, %v5434_v42  ;;  %v2225_v59 = vmax.f32 %v5466_v25, 0.0  ;;  %v5436_v46 = vadd.f32 %v1808_v27, %v7438_v14  ;;  %v7493_v5 = vpop.f32.mrb[53].mxu1  ;;  %v2540_v52 = vmul.f32 %v7500_v37, %v7473_v3 }
 0x356   : > { %v7506_v61 = vmul.f32 %v2350_v63, %v2349_v1  ;;  %v2130_v42 = vpop.f32.mrb[68].mxu0  ;;  %2492 = vadd.xlane.f32.xlu0 %v2476_v24  ;;  %v2748_v49 = vmul.f32 %v7471_v39, %v7485_v31  ;;  %v2234_v63 = vmax.f32 %v7313_v57, 0.0  ;;  %vm2341_vm14 = vcmp.eq.s32.totalorder %v7556_v15, 1 }
 0x357   : > { %v2352_v58 = vsel %vm2340_vm7, %v2225_v59, %v5466_v25  ;;  %v2229_v9 = vmax.f32 %v5436_v46, 0.0  ;;  %v5468_v38 = vadd.f32 %v2130_v42, %v7444_v33  ;;  %v7516_v27 = vpop.f32.mrb[69].mxu0 }
 0x358   : > { %v7522_v29 = vmul.f32 %v2352_v58, %v2349_v1  ;;  %v1814_v25 = vpop.f32.mrb[54].mxu1  ;;  %2764 = vadd.xlane.f32.xlu1 %v2748_v49  ;;  %v7537_v1 = vsel %vm7509_vm12, 1.0, %v9426_v53  ;;  %v2812_v53 = vmul.f32 %v7500_v37, %v7485_v31 }
 0x359   : > { %v2356_v59 = vsel %vm7453_vm3, %v2229_v9, %v5436_v46  ;;  %v2231_v42 = vmax.f32 %v5468_v38, 0.0  ;;  %v5438_v24 = vadd.f32 %v1814_v25, %v7438_v14  ;;  %v7530_v44 = vpop.f32.mrb[55].mxu1  ;;  %v2604_v55 = vmul.f32 %v7537_v1, %v7473_v3 }
 0x35a   : > { %v7543_v46 = vmul.f32 %v2356_v59, %v2355_v19  ;;  %v2136_v49 = vpop.f32.mrb[70].mxu0  ;;  %2556 = vadd.xlane.f32.xlu0 %v2540_v52 }
 0x35b   : > { %v2358_v58 = vsel %vm2340_vm7, %v2231_v42, %v5468_v38  ;;  %v2235_v9 = vmax.f32 %v5438_v24, 0.0  ;;  %v5470_v25 = vadd.f32 %v2136_v49, %v7444_v33  ;;  %v7548_v20 = vpop.f32.mrb[71].mxu0  ;;  %v2361_v38 = vsel %vm7325_vm2, %v2234_v63, %v7313_v57 }
 0x35c   : > { %v7558_v59 = vmul.f32 %v2358_v58, %v2355_v19  ;;  %v1820_v42 = vpop.f32.mrb[56].mxu1  ;;  %2828 = vadd.xlane.f32.xlu1 %v2812_v53  ;;  %v2876_v53 = vmul.f32 %v7537_v1, %v7485_v31 }
 0x35d   : > { %v2362_v49 = vsel %vm7453_vm3, %v2235_v9, %v5438_v24  ;;  %v2237_v52 = vmax.f32 %v5470_v25, 0.0  ;;  %v5440_v51 = vadd.f32 %v1820_v42, %v7438_v14  ;;  %v1822_v40 = vpop.f32.mrb[57].mxu1 }
 0x35e   : > { %v7572_v19 = vmul.f32 %v2362_v49, %v2361_v38  ;;  %v5441_v57 = vadd.f32 %v1822_v40, %v7553_v18  ;;  %v2142_v36 = vpop.f32.mrb[72].mxu0  ;;  %2620 = vadd.xlane.f32.xlu0 %v2604_v55  ;;  %v2668_v55 = vmul.f32 %v7504_v17, %v7473_v3  ;;  %v2940_v3 = vmul.f32 %v7504_v17, %v7485_v31 }
 0x35f   : > { %v2364_v63 = vsel %vm2340_vm7, %v2237_v52, %v5470_v25  ;;  %v2241_v24 = vmax.f32 %v5440_v51, 0.0  ;;  %v5472_v58 = vadd.f32 %v2142_v36, %v7444_v33  ;;  %v2144_v9 = vpop.f32.mrb[73].mxu0 }
 0x360   : > { %v7581_v0 = vmul.f32 %v2364_v63, %v2361_v38  ;;  %v2242_v6 = vmax.f32 %v5441_v57, 0.0  ;;  %v5473_v42 = vadd.f32 %v2144_v9, %v7570_v34  ;;  %v1826_v40 = vpop.f32.mrb[58].mxu1  ;;  %2892 = vadd.xlane.f32.xlu1 %v2876_v53 }
 0x361   : > { %v2368_v49 = vsel %vm7453_vm3, %v2241_v24, %v5440_v51  ;;  %v2243_v25 = vmax.f32 %v5472_v58, 0.0  ;;  %v5442_v52 = vadd.f32 %v1826_v40, %v7438_v14  ;;  %v1828_v36 = vpop.f32.mrb[59].mxu1 }
 0x362   : > { %v7590_v23 = vmul.f32 %v2368_v49, %v7331_v12  ;;  %v7594_v38 = vsel %vm2339_vm13, %v2242_v6, %v5441_v57  ;;  %v2244_v63 = vmax.f32 %v5473_v42, 0.0  ;;  %v5443_v9 = vadd.f32 %v1828_v36, %v7553_v18  ;;  %v2148_v13 = vpop.f32.mrb[74].mxu0  ;;  %2684 = vadd.xlane.f32.xlu0 %v2668_v55 }
 0x363   : > { %9469 = vst [vmem:[#allocation22_spill] sm:$0xff] %v7594_v38  ;;  %v2370_v51 = vsel %vm2340_vm7, %v2243_v25, %v5472_v58  ;;  %v2247_v24 = vmax.f32 %v5442_v52, 0.0  ;;  %v5474_v53 = vadd.f32 %v2148_v13, %v7444_v33  ;;  %v2150_v40 = vpop.f32.mrb[75].mxu0  ;;  %v2879_v47 = vmul.f32 %v7537_v1, %v7581_v0 }
 0x364   : > { %v7603_v49 = vmul.f32 %v2370_v51, %v7331_v12  ;;  %v7607_v57 = vsel %vm2341_vm14, %v2244_v63, %v5473_v42  ;;  %v2248_v6 = vmax.f32 %v5443_v9, 0.0  ;;  %v5475_v36 = vadd.f32 %v2150_v40, %v7570_v34  ;;  %v1832_v38 = vpop.f32.mrb[60].mxu1  ;;  %2956 = vadd.xlane.f32.xlu1 %v2940_v3 }
 0x365   : > { %9470 = vst [vmem:[#allocation25_spill] sm:$0xff] %v7607_v57  ;;  %v2374_v58 = vsel %vm7453_vm3, %v2247_v24, %v5442_v52  ;;  %v2249_v13 = vmax.f32 %v5474_v53, 0.0  ;;  %v5444_v25 = vadd.f32 %v1832_v38, %v7438_v14  ;;  %v1834_v55 = vpop.f32.mrb[61].mxu1  ;;  %v2477_v12 = vmul.f32 %v7471_v39, %v7506_v61 }
 0x366   : > { %v7616_v31 = vmul.f32 %v2374_v58, %v7339_v11  ;;  %v7620_v42 = vsel %vm2339_vm13, %v2248_v6, %v5443_v9  ;;  %v2250_v63 = vmax.f32 %v5475_v36, 0.0  ;;  %v5445_v51 = vadd.f32 %v1834_v55, %v7553_v18  ;;  %v2154_v40 = vpop.f32.mrb[76].mxu0 }
 0x367   : > { %9471 = vst [vmem:[#allocation40_spill] sm:$0xff] %v7620_v42  ;;  %v2376_v52 = vsel %vm2340_vm7, %v2249_v13, %v5474_v53  ;;  %v2253_v24 = vmax.f32 %v5444_v25, 0.0  ;;  %v5476_v38 = vadd.f32 %v2154_v40, %v7444_v33  ;;  %v2156_v3 = vpop.f32.mrb[77].mxu0  ;;  %2494 = vadd.xlane.f32.xlu0 %v2477_v12  ;;  %v2541_v58 = vmul.f32 %v7500_v37, %v7506_v61 }
 0x368   : > { %v7629_v57 = vmul.f32 %v2376_v52, %v7339_v11  ;;  %v7633_v9 = vsel %vm2341_vm14, %v2250_v63, %v5475_v36  ;;  %v2254_v6 = vmax.f32 %v5445_v51, 0.0  ;;  %v5477_v55 = vadd.f32 %v2156_v3, %v7570_v34  ;;  %v1838_v42 = vpop.f32.mrb[62].mxu1 }
 0x369   : > { %9472 = vst [vmem:[#allocation41_spill] sm:$0xff] %v7633_v9  ;;  %v2380_v53 = vsel %vm7453_vm3, %v2253_v24, %v5444_v25  ;;  %v2255_v13 = vmax.f32 %v5476_v38, 0.0  ;;  %2558 = vadd.xlane.f32.xlu1 %v2541_v58  ;;  %v5446_v12 = vadd.f32 %v1838_v42, %v7438_v14  ;;  %v1840_v40 = vpop.f32.mrb[63].mxu1  ;;  %v2605_v11 = vmul.f32 %v7537_v1, %v7506_v61 }
 0x36a   : > { %v7642_v52 = vmul.f32 %v2380_v53, %v7347_v43  ;;  %v7646_v36 = vsel %vm2339_vm13, %v2254_v6, %v5445_v51  ;;  %v2256_v63 = vmax.f32 %v5477_v55, 0.0  ;;  %v5447_v3 = vadd.f32 %v1840_v40, %v7553_v18  ;;  %v2160_v9 = vpop.f32.mrb[78].mxu0 }
 0x36b   : > { %9473 = vst [vmem:[#allocation42_spill] sm:$0xff] %v7646_v36  ;;  %v2382_v25 = vsel %vm2340_vm7, %v2255_v13, %v5476_v38  ;;  %v2259_v24 = vmax.f32 %v5446_v12, 0.0  ;;  %v5478_v42 = vadd.f32 %v2160_v9, %v7444_v33  ;;  %v2162_v58 = vpop.f32.mrb[79].mxu0  ;;  %2622 = vadd.xlane.f32.xlu0 %v2605_v11  ;;  %v2813_v53 = vmul.f32 %v7500_v37, %v7522_v29 }
 0x36c   : > { %v7655_v62 = vmul.f32 %v2382_v25, %v7347_v43  ;;  %v7659_v51 = vsel %vm2341_vm14, %v2256_v63, %v5477_v55  ;;  %v2260_v6 = vmax.f32 %v5447_v3, 0.0  ;;  %v5479_v40 = vadd.f32 %v2162_v58, %v7570_v34  ;;  %v1844_v36 = vpop.f32.mrb[64].mxu1 }
 0x36d   : > { %9474 = vst [vmem:[#allocation43_spill] sm:$0xff] %v7659_v51  ;;  %v2386_v38 = vsel %vm7453_vm3, %v2259_v24, %v5446_v12  ;;  %v2261_v9 = vmax.f32 %v5478_v42, 0.0  ;;  %2830 = vadd.xlane.f32.xlu1 %v2813_v53  ;;  %v5448_v13 = vadd.f32 %v1844_v36, %v7438_v14  ;;  %v1846_v11 = vpop.f32.mrb[65].mxu1  ;;  %v2669_v43 = vmul.f32 %v7504_v17, %v7506_v61 }
 0x36e   : > { %v7668_v25 = vmul.f32 %v2386_v38, %v7355_v16  ;;  %v7672_v55 = vsel %vm2339_vm13, %v2260_v6, %v5447_v3  ;;  %v2262_v63 = vmax.f32 %v5479_v40, 0.0  ;;  %v5449_v58 = vadd.f32 %v1846_v11, %v7553_v18  ;;  %v2166_v51 = vpop.f32.mrb[80].mxu0 }
 0x36f   : > { %9475 = vst [vmem:[#allocation44_spill] sm:$0xff] %v7672_v55  ;;  %v2388_v12 = vsel %vm2340_vm7, %v2261_v9, %v5478_v42  ;;  %v2265_v24 = vmax.f32 %v5448_v13, 0.0  ;;  %v5480_v36 = vadd.f32 %v2166_v51, %v7444_v33  ;;  %v2168_v53 = vpop.f32.mrb[81].mxu0  ;;  %2686 = vadd.xlane.f32.xlu0 %v2669_v43  ;;  %v2877_v61 = vmul.f32 %v7537_v1, %v7522_v29 }
 0x370   : > { %v7681_v38 = vmul.f32 %v2388_v12, %v7355_v16  ;;  %v7685_v3 = vsel %vm2341_vm14, %v2262_v63, %v5479_v40  ;;  %v2266_v6 = vmax.f32 %v5449_v58, 0.0  ;;  %v5481_v11 = vadd.f32 %v2168_v53, %v7570_v34  ;;  %v1850_v55 = vpop.f32.mrb[66].mxu1 }
 0x371   : > { %9476 = vst [vmem:[#allocation45_spill] sm:$0xff] %v7685_v3  ;;  %v2392_v42 = vsel %vm7453_vm3, %v2265_v24, %v5448_v13  ;;  %v2267_v51 = vmax.f32 %v5480_v36, 0.0  ;;  %2894 = vadd.xlane.f32.xlu1 %v2877_v61  ;;  %v5450_v9 = vadd.f32 %v1850_v55, %v7438_v14  ;;  %v1852_v43 = vpop.f32.mrb[67].mxu1  ;;  %v2749_v16 = vmul.f32 %v7471_v39, %v7522_v29 }
 0x372   : > { %v7694_v12 = vmul.f32 %v2392_v42, %v7365_v8  ;;  %v7698_v40 = vsel %vm2339_vm13, %v2266_v6, %v5449_v58  ;;  %v2268_v63 = vmax.f32 %v5481_v11, 0.0  ;;  %v5451_v53 = vadd.f32 %v1852_v43, %v7553_v18  ;;  %v2172_v3 = vpop.f32.mrb[82].mxu0 }
 0x373   : > { %9477 = vst [vmem:[#allocation46_spill] sm:$0xff] %v7698_v40  ;;  %v2394_v13 = vsel %vm2340_vm7, %v2267_v51, %v5480_v36  ;;  %v2271_v24 = vmax.f32 %v5450_v9, 0.0  ;;  %v5482_v55 = vadd.f32 %v2172_v3, %v7444_v33  ;;  %v2174_v61 = vpop.f32.mrb[83].mxu0  ;;  %2766 = vadd.xlane.f32.xlu0 %v2749_v16  ;;  %v2941_v42 = vmul.f32 %v7504_v17, %v7522_v29 }
 0x374   : > { %v7707_v41 = vmul.f32 %v2394_v13, %v7365_v8  ;;  %v7711_v58 = vsel %vm2341_vm14, %v2268_v63, %v5481_v11  ;;  %v2272_v6 = vmax.f32 %v5451_v53, 0.0  ;;  %v5483_v43 = vadd.f32 %v2174_v61, %v7570_v34  ;;  %v1856_v40 = vpop.f32.mrb[68].mxu1 }
 0x375   : > { %9478 = vst [vmem:[#allocation47_spill] sm:$0xff] %v7711_v58  ;;  %v2398_v36 = vsel %vm7453_vm3, %v2271_v24, %v5450_v9  ;;  %v2273_v3 = vmax.f32 %v5482_v55, 0.0  ;;  %2958 = vadd.xlane.f32.xlu1 %v2941_v42  ;;  %v5452_v51 = vadd.f32 %v1856_v40, %v7438_v14  ;;  %v1858_v16 = vpop.f32.mrb[69].mxu1  ;;  %v2478_v8 = vmul.f32 %v7471_v39, %v7543_v46 }
 0x376   : > { %v7720_v29 = vmul.f32 %v2398_v36, %v7375_v54  ;;  %v7724_v11 = vsel %vm2339_vm13, %v2272_v6, %v5451_v53  ;;  %v2274_v63 = vmax.f32 %v5483_v43, 0.0  ;;  %v5453_v13 = vadd.f32 %v1858_v16, %v7553_v18  ;;  %v2178_v61 = vpop.f32.mrb[84].mxu0 }
 0x377   : > { %9479 = vst [vmem:[#allocation48_spill] sm:$0xff] %v7724_v11  ;;  %v2400_v9 = vsel %vm2340_vm7, %v2273_v3, %v5482_v55  ;;  %v2277_v24 = vmax.f32 %v5452_v51, 0.0  ;;  %v5484_v40 = vadd.f32 %v2178_v61, %v7444_v33  ;;  %v2180_v42 = vpop.f32.mrb[85].mxu0  ;;  %2496 = vadd.xlane.f32.xlu0 %v2478_v8  ;;  %v2542_v36 = vmul.f32 %v7500_v37, %v7543_v46 }
 0x378   : > { %v7733_v58 = vmul.f32 %v2400_v9, %v7375_v54  ;;  %v7737_v53 = vsel %vm2341_vm14, %v2274_v63, %v5483_v43  ;;  %v2278_v6 = vmax.f32 %v5453_v13, 0.0  ;;  %v5485_v16 = vadd.f32 %v2180_v42, %v7570_v34  ;;  %v1862_v11 = vpop.f32.mrb[70].mxu1 }
 0x379   : > { %9480 = vst [vmem:[#allocation49_spill] sm:$0xff] %v7737_v53  ;;  %v2404_v55 = vsel %vm7453_vm3, %v2277_v24, %v5452_v51  ;;  %v2279_v3 = vmax.f32 %v5484_v40, 0.0  ;;  %2560 = vadd.xlane.f32.xlu1 %v2542_v36  ;;  %v5454_v8 = vadd.f32 %v1862_v11, %v7438_v14  ;;  %v1864_v61 = vpop.f32.mrb[71].mxu1  ;;  %v2606_v54 = vmul.f32 %v7537_v1, %v7543_v46 }
 0x37a   : > { %v7746_v9 = vmul.f32 %v2404_v55, %v7385_v60  ;;  %v7750_v43 = vsel %vm2339_vm13, %v2278_v6, %v5453_v13  ;;  %v2280_v63 = vmax.f32 %v5485_v16, 0.0  ;;  %v5455_v42 = vadd.f32 %v1864_v61, %v7553_v18  ;;  %v2184_v53 = vpop.f32.mrb[86].mxu0 }
 0x37b   : > { %9481 = vst [vmem:[#allocation50_spill] sm:$0xff] %v7750_v43  ;;  %v2406_v51 = vsel %vm2340_vm7, %v2279_v3, %v5484_v40  ;;  %v2283_v24 = vmax.f32 %v5454_v8, 0.0  ;;  %v5486_v11 = vadd.f32 %v2184_v53, %v7444_v33  ;;  %v2186_v36 = vpop.f32.mrb[87].mxu0  ;;  %2624 = vadd.xlane.f32.xlu0 %v2606_v54  ;;  %v2750_v55 = vmul.f32 %v7471_v39, %v7558_v59 }
 0x37c   : > { %v7759_v22 = vmul.f32 %v2406_v51, %v7385_v60  ;;  %v7763_v13 = vsel %vm2341_vm14, %v2280_v63, %v5485_v16  ;;  %v2284_v6 = vmax.f32 %v5455_v42, 0.0  ;;  %v5487_v61 = vadd.f32 %v2186_v36, %v7570_v34  ;;  %v1868_v43 = vpop.f32.mrb[72].mxu1 }
 0x37d   : > { %9482 = vst [vmem:[#allocation51_spill] sm:$0xff] %v7763_v13  ;;  %v2410_v40 = vsel %vm7453_vm3, %v2283_v24, %v5454_v8  ;;  %v2285_v53 = vmax.f32 %v5486_v11, 0.0  ;;  %2768 = vadd.xlane.f32.xlu1 %v2750_v55  ;;  %v5456_v3 = vadd.f32 %v1868_v43, %v7438_v14  ;;  %v1870_v54 = vpop.f32.mrb[73].mxu1  ;;  %v2670_v60 = vmul.f32 %v7504_v17, %v7543_v46 }
 0x37e   : > { %v7772_v51 = vmul.f32 %v2410_v40, %v7395_v28  ;;  %v7776_v16 = vsel %vm2339_vm13, %v2284_v6, %v5455_v42  ;;  %v2286_v63 = vmax.f32 %v5487_v61, 0.0  ;;  %v5457_v36 = vadd.f32 %v1870_v54, %v7553_v18  ;;  %v2190_v13 = vpop.f32.mrb[88].mxu0 }
 0x37f   : > { %9483 = vst [vmem:[#allocation52_spill] sm:$0xff] %v7776_v16  ;;  %v2412_v8 = vsel %vm2340_vm7, %v2285_v53, %v5486_v11  ;;  %v2289_v24 = vmax.f32 %v5456_v3, 0.0  ;;  %v5488_v43 = vadd.f32 %v2190_v13, %v7444_v33  ;;  %v2192_v55 = vpop.f32.mrb[89].mxu0  ;;  %2688 = vadd.xlane.f32.xlu0 %v2670_v60  ;;  %v2878_v46 = vmul.f32 %v7537_v1, %v7558_v59 }
 0x380   : > { %v7785_v40 = vmul.f32 %v2412_v8, %v7395_v28  ;;  %v7789_v42 = vsel %vm2341_vm14, %v2286_v63, %v5487_v61  ;;  %v2290_v6 = vmax.f32 %v5457_v36, 0.0  ;;  %v5489_v54 = vadd.f32 %v2192_v55, %v7570_v34  ;;  %v1874_v16 = vpop.f32.mrb[74].mxu1 }
 0x381   : > { %9484 = vst [vmem:[#allocation53_spill] sm:$0xff] %v7789_v42  ;;  %v2416_v11 = vsel %vm7453_vm3, %v2289_v24, %v5456_v3  ;;  %v2291_v13 = vmax.f32 %v5488_v43, 0.0  ;;  %2896 = vadd.xlane.f32.xlu1 %v2878_v46  ;;  %v5458_v53 = vadd.f32 %v1874_v16, %v7438_v14  ;;  %v1876_v60 = vpop.f32.mrb[75].mxu1  ;;  %v2814_v28 = vmul.f32 %v7500_v37, %v7558_v59 }
 0x382   : > { %v7798_v8 = vmul.f32 %v2416_v11, %v7405_v10  ;;  %v7802_v61 = vsel %vm2339_vm13, %v2290_v6, %v5457_v36  ;;  %v2292_v63 = vmax.f32 %v5489_v54, 0.0  ;;  %v5459_v55 = vadd.f32 %v1876_v60, %v7553_v18  ;;  %v2196_v42 = vpop.f32.mrb[90].mxu0 }
 0x383   : > { %9485 = vst [vmem:[#allocation54_spill] sm:$0xff] %v7802_v61  ;;  %v2418_v3 = vsel %vm2340_vm7, %v2291_v13, %v5488_v43  ;;  %v2295_v24 = vmax.f32 %v5458_v53, 0.0  ;;  %v5490_v16 = vadd.f32 %v2196_v42, %v7444_v33  ;;  %v2198_v46 = vpop.f32.mrb[91].mxu0  ;;  %2832 = vadd.xlane.f32.xlu0 %v2814_v28  ;;  %v2942_v11 = vmul.f32 %v7504_v17, %v7558_v59 }
 0x384   : > { %v7811_v30 = vmul.f32 %v2418_v3, %v7405_v10  ;;  %v7815_v36 = vsel %vm2341_vm14, %v2292_v63, %v5489_v54  ;;  %v2296_v6 = vmax.f32 %v5459_v55, 0.0  ;;  %v5491_v60 = vadd.f32 %v2198_v46, %v7570_v34  ;;  %v1880_v61 = vpop.f32.mrb[76].mxu1 }
 0x385   : > { %9486 = vst [vmem:[#allocation55_spill] sm:$0xff] %v7815_v36  ;;  %v2422_v43 = vsel %vm7453_vm3, %v2295_v24, %v5458_v53  ;;  %v2297_v42 = vmax.f32 %v5490_v16, 0.0  ;;  %2960 = vadd.xlane.f32.xlu1 %v2942_v11  ;;  %v5460_v13 = vadd.f32 %v1880_v61, %v7438_v14  ;;  %v1882_v28 = vpop.f32.mrb[77].mxu1  ;;  %v2479_v10 = vmul.f32 %v7471_v39, %v7572_v19 }
 0x386   : > { %v7824_v59 = vmul.f32 %v2422_v43, %v7415_v7  ;;  %v7828_v54 = vsel %vm2339_vm13, %v2296_v6, %v5459_v55  ;;  %v2298_v63 = vmax.f32 %v5491_v60, 0.0  ;;  %v5461_v3 = vadd.f32 %v1882_v28, %v7553_v18  ;;  %v2202_v46 = vpop.f32.mrb[92].mxu0 }
 0x387   : > { %9487 = vst [vmem:[#allocation56_spill] sm:$0xff] %v7828_v54  ;;  %v2424_v53 = vsel %vm2340_vm7, %v2297_v42, %v5490_v16  ;;  %v2301_v24 = vmax.f32 %v5460_v13, 0.0  ;;  %v5492_v61 = vadd.f32 %v2202_v46, %v7444_v33  ;;  %v2204_v11 = vpop.f32.mrb[93].mxu0  ;;  %2498 = vadd.xlane.f32.xlu0 %v2479_v10  ;;  %v2543_v43 = vmul.f32 %v7500_v37, %v7572_v19 }
 0x388   : > { %v7837_v36 = vmul.f32 %v2424_v53, %v7415_v7  ;;  %v7841_v55 = vsel %vm2341_vm14, %v2298_v63, %v5491_v60  ;;  %v2302_v6 = vmax.f32 %v5461_v3, 0.0  ;;  %v5493_v28 = vadd.f32 %v2204_v11, %v7570_v34  ;;  %v1886_v54 = vpop.f32.mrb[78].mxu1 }
 0x389   : > { %9488 = vst [vmem:[#allocation57_spill] sm:$0xff] %v7841_v55  ;;  %v2428_v16 = vsel %vm7453_vm3, %v2301_v24, %v5460_v13  ;;  %v2303_v42 = vmax.f32 %v5492_v61, 0.0  ;;  %2562 = vadd.xlane.f32.xlu1 %v2543_v43  ;;  %v5462_v10 = vadd.f32 %v1886_v54, %v7438_v14  ;;  %v1888_v46 = vpop.f32.mrb[79].mxu1  ;;  %v2607_v7 = vmul.f32 %v7537_v1, %v7572_v19 }
 0x38a   : > { %v7850_v53 = vmul.f32 %v2428_v16, %v7425_v56  ;;  %v7854_v60 = vsel %vm2339_vm13, %v2302_v6, %v5461_v3  ;;  %v2304_v63 = vmax.f32 %v5493_v28, 0.0  ;;  %v5463_v11 = vadd.f32 %v1888_v46, %v7553_v18  ;;  %v2208_v55 = vpop.f32.mrb[94].mxu0 }
 0x38b   : > { %9489 = vst [vmem:[#allocation58_spill] sm:$0xff] %v7854_v60  ;;  %v2430_v13 = vsel %vm2340_vm7, %v2303_v42, %v5492_v61  ;;  %v2307_v24 = vmax.f32 %v5462_v10, 0.0  ;;  %v5494_v14 = vadd.f32 %v2208_v55, %v7444_v33  ;;  %v2210_v54 = vpop.f32.mrb[95].mxu0  ;;  %2626 = vadd.xlane.f32.xlu0 %v2607_v7  ;;  %v2751_v43 = vmul.f32 %v7471_v39, %v7581_v0 }
 0x38c   : > { %v7863_v16 = vmul.f32 %v2430_v13, %v7425_v56  ;;  %v7867_v3 = vsel %vm2341_vm14, %v2304_v63, %v5493_v28  ;;  %v2308_v6 = vmax.f32 %v5463_v11, 0.0  ;;  %v5495_v46 = vadd.f32 %v2210_v54, %v7570_v34 }
 0x38d   : > { %9490 = vst [vmem:[#allocation59_spill] sm:$0xff] %v7867_v3  ;;  %v2434_v61 = vsel %vm7453_vm3, %v2307_v24, %v5462_v10  ;;  %v2309_v42 = vmax.f32 %v5494_v14, 0.0  ;;  %2770 = vadd.xlane.f32.xlu1 %v2751_v43  ;;  %v2671_v33 = vmul.f32 %v7504_v17, %v7572_v19  ;;  %v2815_v63 = vmul.f32 %v7500_v37, %v7581_v0 }
 0x38e   : > { %v7875_v55 = vmul.f32 %v2434_v61, %v7433_v45  ;;  %v7879_v56 = vsel %vm2339_vm13, %v2308_v6, %v5463_v11  ;;  %v2310_v28 = vmax.f32 %v5495_v46, 0.0  ;;  %v2943_v26 = vmul.f32 %v7504_v17, %v7581_v0 }
 0x38f   : > { %9491 = vst [vmem:[#allocation60_spill] sm:$0xff] %v7879_v56  ;;  %v2436_v7 = vsel %vm2340_vm7, %v2309_v42, %v5494_v14  ;;  %2690 = vadd.xlane.f32.xlu0 %v2671_v33  ;;  %v2480_v11 = vmul.f32 %v7471_v39, %v7590_v23  ;;  %v2608_v13 = vmul.f32 %v7537_v1, %v7590_v23 }
 0x390   : > { %v7886_v10 = vmul.f32 %v2436_v7, %v7433_v45  ;;  %v7890_v19 = vsel %vm2341_vm14, %v2310_v28, %v5495_v46  ;;  %v2544_v45 = vmul.f32 %v7500_v37, %v7590_v23  ;;  %v2752_v24 = vmul.f32 %v7471_v39, %v7603_v49  ;;  %v4077_v28 = vld [vmem:[#allocation14 + $0x8] sm:$0xff] }
 0x391   : > { %9492 = vst [vmem:[#allocation61_spill] sm:$0xff] %v7890_v19  ;;  %2898 = vadd.xlane.f32.xlu1 %v2879_v47  ;;  %v2672_v0 = vmul.f32 %v7504_v17, %v7590_v23  ;;  %v2880_v14 = vmul.f32 %v7537_v1, %v7603_v49  ;;  %v2816_v54 = vmul.f32 %v7500_v37, %v7603_v49 }
 0x392   : > { %v2944_v43 = vmul.f32 %v7504_v17, %v7603_v49  ;;  %v2481_v6 = vmul.f32 %v7471_v39, %v7616_v31  ;;  %v2545_v23 = vmul.f32 %v7500_v37, %v7616_v31  ;;  %v2609_v46 = vmul.f32 %v7537_v1, %v7616_v31  ;;  %v4076_v49 = vld [vmem:[#allocation14] sm:$0xff] }
 0x393   : > { %2834 = vadd.xlane.f32.xlu0 %v2815_v63  ;;  %v2753_v61 = vmul.f32 %v7471_v39, %v7629_v57  ;;  %v2673_v7 = vmul.f32 %v7504_v17, %v7616_v31  ;;  %v5288_v47 = vpack.c.bf16 %v4077_v28, %v4076_v49  ;;  %v2881_v63 = vmul.f32 %v7537_v1, %v7629_v57  ;;  %v4078_v31 = vld [vmem:[#allocation14 + $0x10] sm:$0xff] }
 0x394   : > { %v4082_v28 = vld [vmem:[#allocation14 + $0x30] sm:$0xff]  ;;  %v2486_v15 = vmul.f32 %v7471_v39, %v7746_v9  ;;  %v8179_v56 = vmul.f32 %v7537_v1, %v7837_v36  ;;  %v8194_v60 = vmul.f32 %v7471_v39, %v7850_v53 }
 0x395   : > { %2962 = vadd.xlane.f32.xlu1 %v2943_v26  ;;  %5289 = vmatprep.subr.bf16.mxu1 %v5288_v47  ;;  %v2817_v26 = vmul.f32 %v7500_v37, %v7629_v57 }
 0x396   : > { %5291 = vmatpush3.bf16.msra.mxu1 %v5288_v47  ;;  %v4084_v47 = vld [vmem:[#allocation14 + $0x40] sm:$0xff] }
 0x397   : > { %2500 = vadd.xlane.f32.xlu0 %v2480_v11  ;;  %v2945_v11 = vmul.f32 %v7504_v17, %v7629_v57  ;;  %v2610_v57 = vmul.f32 %v7537_v1, %v7642_v52 }
 0x399   : > { %2564 = vadd.xlane.f32.xlu1 %v2544_v45 }
 0x39b   : > { %2628 = vadd.xlane.f32.xlu0 %v2608_v13 }
 0x39d   : > { %2772 = vadd.xlane.f32.xlu1 %v2752_v24  ;;  %v4079_v24 = vld [vmem:[#allocation14 + $0x18] sm:$0xff] }
 0x39f   : > { %2692 = vadd.xlane.f32.xlu0 %v2672_v0  ;;  %v4080_v0 = vld [vmem:[#allocation14 + $0x20] sm:$0xff] }
 0x3a1   : > { %2900 = vadd.xlane.f32.xlu1 %v2880_v14  ;;  %v2482_v14 = vmul.f32 %v7471_v39, %v7642_v52 }
 0x3a3   : > { %2836 = vadd.xlane.f32.xlu0 %v2816_v54  ;;  %v5292_v54 = vpack.c.bf16 %v4079_v24, %v4078_v31  ;;  %v2882_v24 = vmul.f32 %v7537_v1, %v7655_v62 }
 0x3a5   : > { %2964 = vadd.xlane.f32.xlu1 %v2944_v43  ;;  %v4081_v43 = vld [vmem:[#allocation14 + $0x28] sm:$0xff]  ;;  %5293 = vmatprep.subr.bf16.mxu1 %v5292_v54 }
 0x3a6   : > { %5295 = vmatpush3.bf16.msra.mxu1 %v5292_v54 }
 0x3a7   : > { %2502 = vadd.xlane.f32.xlu0 %v2481_v6  ;;  %v5296_v6 = vpack.c.bf16 %v4081_v43, %v4080_v0  ;;  %v2818_v0 = vmul.f32 %v7500_v37, %v7655_v62  ;;  %v2483_v43 = vmul.f32 %v7471_v39, %v7668_v25 }
 0x3a9   : > { %2566 = vadd.xlane.f32.xlu1 %v2545_v23  ;;  %v2546_v23 = vmul.f32 %v7500_v37, %v7642_v52  ;;  %5297 = vmatprep.subr.bf16.mxu1 %v5296_v6 }
 0x3aa   : > { %5299 = vmatpush3.bf16.msra.mxu1 %v5296_v6  ;;  %v4086_v6 = vld [vmem:[#allocation14 + $0x50] sm:$0xff] }
 0x3ab   : > { %2630 = vadd.xlane.f32.xlu0 %v2609_v46  ;;  %v2754_v46 = vmul.f32 %v7471_v39, %v7655_v62 }
 0x3ac   : > { %v7920_v42 = vpop.f32.mrb[96].mxu0 }
 0x3ad   : > { %9493 = vst [vmem:[#allocation62_spill] sm:$0xff] %v7920_v42  ;;  %v7922_v33 = vpop.f32.mrb[97].mxu0  ;;  %2774 = vadd.xlane.f32.xlu1 %v2753_v61 }
 0x3ae   : > { %9494 = vst [vmem:[#allocation63_spill] sm:$0xff] %v7922_v33 }
 0x3af   : > { %2694 = vadd.xlane.f32.xlu0 %v2673_v7  ;;  %v4083_v7 = vld [vmem:[#allocation14 + $0x38] sm:$0xff] }
 0x3b1   : > { %2902 = vadd.xlane.f32.xlu1 %v2881_v63  ;;  %v2674_v63 = vmul.f32 %v7504_v17, %v7642_v52 }
 0x3b3   : > { %2838 = vadd.xlane.f32.xlu0 %v2817_v26  ;;  %v5300_v26 = vpack.c.bf16 %v4083_v7, %v4082_v28  ;;  %v4089_v28 = vld [vmem:[#allocation14 + $0x68] sm:$0xff]  ;;  %v2547_v7 = vmul.f32 %v7500_v37, %v7668_v25 }
 0x3b4   : > { %v7932_v45 = vpop.f32.mrb[98].mxu0 }
 0x3b5   : > { %9495 = vst [vmem:[#allocation64_spill] sm:$0xff] %v7932_v45  ;;  %v7934_v13 = vpop.f32.mrb[99].mxu0  ;;  %2966 = vadd.xlane.f32.xlu1 %v2945_v11  ;;  %v4085_v11 = vld [vmem:[#allocation14 + $0x48] sm:$0xff]  ;;  %5301 = vmatprep.subr.bf16.mxu1 %v5300_v26 }
 0x3b6   : > { %9496 = vst [vmem:[#allocation65_spill] sm:$0xff] %v7934_v13  ;;  %v5304_v31 = vpack.c.bf16 %v4085_v11, %v4084_v47  ;;  %5303 = vmatpush3.bf16.msra.mxu1 %v5300_v26  ;;  %v2675_v26 = vmul.f32 %v7504_v17, %v7668_v25  ;;  %v4090_v11 = vld [vmem:[#allocation14 + $0x70] sm:$0xff]  ;;  %v8159_v13 = vmul.f32 %v7500_v37, %v7824_v59 }
 0x3b7   : > { %2504 = vadd.xlane.f32.xlu0 %v2482_v14  ;;  %v2946_v14 = vmul.f32 %v7504_v17, %v7655_v62  ;;  %v2611_v62 = vmul.f32 %v7537_v1, %v7668_v25  ;;  %v2947_v25 = vmul.f32 %v7504_v17, %v7681_v38 }
 0x3b8   : > { %5305 = vmatprep.subr.bf16.mxu1 %v5304_v31 }
 0x3b9   : > { %2568 = vadd.xlane.f32.xlu1 %v2546_v23  ;;  %v4087_v23 = vld [vmem:[#allocation14 + $0x58] sm:$0xff] }
 0x3ba   : > { %5307 = vmatpush3.bf16.msra.mxu1 %v5304_v31  ;;  %v4091_v31 = vld [vmem:[#allocation14 + $0x78] sm:$0xff] }
 0x3bb   : > { %2632 = vadd.xlane.f32.xlu0 %v2610_v57  ;;  %v4088_v57 = vld [vmem:[#allocation14 + $0x60] sm:$0xff] }
 0x3bc   : > { %v7944_v61 = vpop.f32.mrb[100].mxu0  ;;  %v5312_v47 = vpack.c.bf16 %v4089_v28, %v4088_v57  ;;  %v2756_v57 = vmul.f32 %v7471_v39, %v7707_v41  ;;  %v5433_v28 = vadd.f32 %v7451_v50, %v7553_v18  ;;  %v5437_v50 = vadd.f32 %v7493_v5, %v7553_v18 }
 0x3bd   : > { %9497 = vst [vmem:[#allocation66_spill] sm:$0xff] %v7944_v61  ;;  %v7946_v49 = vpop.f32.mrb[101].mxu0  ;;  %2776 = vadd.xlane.f32.xlu1 %v2754_v46  ;;  %v5308_v46 = vpack.c.bf16 %v4087_v23, %v4086_v6  ;;  %v2548_v6 = vmul.f32 %v7500_v37, %v7694_v12  ;;  %v2612_v23 = vmul.f32 %v7537_v1, %v7694_v12 }
 0x3be   : > { %9498 = vst [vmem:[#allocation67_spill] sm:$0xff] %v7946_v49  ;;  %v8155_v61 = vmul.f32 %v7471_v39, %v7824_v59 }
 0x3bf   : > { %2696 = vadd.xlane.f32.xlu0 %v2674_v63  ;;  %5309 = vmatprep.subr.bf16.mxu1 %v5308_v46  ;;  %v2755_v63 = vmul.f32 %v7471_v39, %v7681_v38 }
 0x3c0   : > { %5311 = vmatpush3.bf16.msra.mxu1 %v5308_v46  ;;  %v2884_v46 = vmul.f32 %v7537_v1, %v7707_v41 }
 0x3c1   : > { %2904 = vadd.xlane.f32.xlu1 %v2882_v24  ;;  %5313 = vmatprep.subr.bf16.mxu1 %v5312_v47  ;;  %v5316_v24 = vpack.c.bf16 %v4091_v31, %v4090_v11  ;;  %v2218_v31 = vmax.f32 %v5433_v28, 0.0 }
 0x3c3   : > { %2840 = vadd.xlane.f32.xlu0 %v2818_v0  ;;  %v2883_v0 = vmul.f32 %v7537_v1, %v7681_v38 }
 0x3c4   : > { %v7956_v54 = vpop.f32.mrb[102].mxu0  ;;  %5315 = vmatpush3.bf16.msra.mxu1 %v5312_v47  ;;  %v5465_v47 = vadd.f32 %v7458_v35, %v7570_v34 }
 0x3c5   : > { %9499 = vst [vmem:[#allocation68_spill] sm:$0xff] %v7956_v54  ;;  %v7958_v52 = vpop.f32.mrb[103].mxu0  ;;  %2968 = vadd.xlane.f32.xlu1 %v2946_v14  ;;  %5317 = vmatprep.subr.bf16.mxu1 %v5316_v24  ;;  %v2819_v14 = vmul.f32 %v7500_v37, %v7681_v38  ;;  %v2676_v38 = vmul.f32 %v7504_v17, %v7694_v12 }
 0x3c6   : > { %9500 = vst [vmem:[#allocation69_spill] sm:$0xff] %v7958_v52 }
 0x3c7   : > { %2506 = vadd.xlane.f32.xlu0 %v2483_v43  ;;  %v2484_v43 = vmul.f32 %v7471_v39, %v7694_v12  ;;  %v2948_v12 = vmul.f32 %v7504_v17, %v7707_v41 }
 0x3c8   : > { %5319 = vmatpush3.bf16.msra.mxu1 %v5316_v24  ;;  %v2220_v24 = vmax.f32 %v5465_v47, 0.0 }
 0x3c9   : > { %2570 = vadd.xlane.f32.xlu1 %v2547_v7  ;;  %5352 = vmatprep.subr.bf16.mxu1 %v7146_v21  ;;  %v2820_v7 = vmul.f32 %v7500_v37, %v7707_v41  ;;  %v5439_v41 = vadd.f32 %v7530_v44, %v7553_v18 }
 0x3cb   : > { %2634 = vadd.xlane.f32.xlu0 %v2611_v62  ;;  %v5435_v62 = vadd.f32 %v7468_v4, %v7553_v18  ;;  %v2485_v4 = vmul.f32 %v7471_v39, %v7720_v29  ;;  %v8021_v18 = vsel %vm2341_vm14, %v2220_v24, %v5465_v47 }
 0x3cd   : > { %2778 = vadd.xlane.f32.xlu1 %v2755_v63  ;;  %v5467_v63 = vadd.f32 %v7482_v32, %v7570_v34  ;;  %v5471_v32 = vadd.f32 %v7548_v20, %v7570_v34  ;;  %v2613_v20 = vmul.f32 %v7537_v1, %v7720_v29 }
 0x3cf   : > { %2698 = vadd.xlane.f32.xlu0 %v2675_v26  ;;  %v5469_v26 = vadd.f32 %v7516_v27, %v7570_v34  ;;  %v2549_v27 = vmul.f32 %v7500_v37, %v7720_v29 }
 0x3d1   : > { %2906 = vadd.xlane.f32.xlu1 %v2883_v0  ;;  %v2224_v0 = vmax.f32 %v5435_v62, 0.0 }
 0x3d3   : > { %2842 = vadd.xlane.f32.xlu0 %v2819_v14  ;;  %v8025_v34 = vsel %vm2339_vm13, %v2224_v0, %v5435_v62 }
 0x3d5   : > { %2970 = vadd.xlane.f32.xlu1 %v2947_v25  ;;  %v2226_v25 = vmax.f32 %v5467_v63, 0.0 }
 0x3d7   : > { %2508 = vadd.xlane.f32.xlu0 %v2484_v43  ;;  %v2230_v43 = vmax.f32 %v5437_v50, 0.0 }
 0x3d9   : > { %2572 = vadd.xlane.f32.xlu1 %v2548_v6  ;;  %v2232_v6 = vmax.f32 %v5469_v26, 0.0  ;;  %v8035_v47 = vsel %vm2339_vm13, %v2230_v43, %v5437_v50 }
 0x3da   : > { %9501 = vst [vmem:[#allocation70_spill] sm:$0xff] %v8035_v47 }
 0x3db   : > { %2636 = vadd.xlane.f32.xlu0 %v2612_v23  ;;  %v8039_v62 = vsel %vm2341_vm14, %v2232_v6, %v5469_v26  ;;  %v2885_v26 = vmul.f32 %v7537_v1, %v7733_v58 }
 0x3dc   : > { %9502 = vst [vmem:[#allocation71_spill] sm:$0xff] %v8039_v62 }
 0x3dd   : > { %2780 = vadd.xlane.f32.xlu1 %v2756_v57  ;;  %v8015_v57 = vsel %vm2339_vm13, %v2218_v31, %v5433_v28 }
 0x3df   : > { %2700 = vadd.xlane.f32.xlu0 %v2676_v38 }
 0x3e1   : > { %2908 = vadd.xlane.f32.xlu1 %v2884_v46  ;;  %v2236_v46 = vmax.f32 %v5439_v41, 0.0 }
 0x3e3   : > { %2844 = vadd.xlane.f32.xlu0 %v2820_v7  ;;  %v2493_v11 = vpop.xlane.xlu0 %2492  ;;  %v2238_v7 = vmax.f32 %v5471_v32, 0.0 }
 0x3e4   : > { %v2524_v35 = vmul.f32 0.17677669, %v2493_v11 }
 0x3e5   : > { %2972 = vadd.xlane.f32.xlu1 %v2948_v12  ;;  %v2765_v14 = vpop.xlane.xlu1 %2764  ;;  %v8049_v50 = vsel %vm2341_vm14, %v2238_v7, %v5471_v32  ;;  %v2550_v32 = vmul.f32 %v7500_v37, %v7746_v9 }
 0x3e6   : > { %v2796_v5 = vmul.f32 0.17677669, %v2765_v14  ;;  %v8031_v14 = vsel %vm2341_vm14, %v2226_v25, %v5467_v63  ;;  %v8045_v63 = vsel %vm2339_vm13, %v2236_v46, %v5439_v41  ;;  %9504 = vst [vmem:[#allocation73_spill] sm:$0xff] %v8049_v50  ;;  %v2949_v41 = vmul.f32 %v7504_v17, %v7733_v58 }
 0x3e7   : > { %2510 = vadd.xlane.f32.xlu0 %v2485_v4  ;;  %v2557_v23 = vpop.xlane.xlu0 %2556  ;;  %v2757_v4 = vmul.f32 %v7471_v39, %v7733_v58  ;;  %9503 = vst [vmem:[#allocation72_spill] sm:$0xff] %v8045_v63  ;;  %v8198_v50 = vmul.f32 %v7500_v37, %v7850_v53 }
 0x3e8   : > { %v3004_v38 = vmax.f32 %v2524_v35, %v2796_v5  ;;  %v2588_v44 = vmul.f32 0.17677669, %v2557_v23 }
 0x3e9   : > { %2574 = vadd.xlane.f32.xlu1 %v2549_v27  ;;  %v2829_v12 = vpop.xlane.xlu1 %2828  ;;  %9505 = vst [vmem:[#allocation74_spill] sm:$0xff] %v8198_v50 }
 0x3ea   : > { %v3020_v11 = vsub.f32 %v2524_v35, %v3004_v38  ;;  %v3068_v28 = vsub.f32 %v2796_v5, %v3004_v38  ;;  %v2860_v31 = vmul.f32 0.17677669, %v2829_v12  ;;  %v2677_v35 = vmul.f32 %v7504_v17, %v7720_v29 }
 0x3eb   : > { %2638 = vadd.xlane.f32.xlu0 %v2613_v20  ;;  %v2621_v24 = vpop.xlane.xlu0 %2620  ;;  %v2821_v29 = vmul.f32 %v7500_v37, %v7733_v58  ;;  %v8067_v58 = vmul.f32 %v7504_v17, %v7746_v9 }
 0x3ec   : > { %v3036_v0 = vmul.f32 1.442695, %v3020_v11  ;;  %v3084_v5 = vmul.f32 1.442695, %v3068_v28  ;;  %v3196_v27 = vmax.f32 %v2588_v44, %v2860_v31  ;;  %v2652_v23 = vmul.f32 0.17677669, %v2621_v24 }
 0x3ed   : > { %2782 = vadd.xlane.f32.xlu1 %v2757_v4  ;;  %v2893_v25 = vpop.xlane.xlu1 %2892  ;;  %v2614_v11 = vmul.f32 %v7537_v1, %v7746_v9  ;;  %v2758_v28 = vmul.f32 %v7471_v39, %v7759_v22  ;;  %v8081_v9 = vmul.f32 %v7504_v17, %v7759_v22 }
 0x3ee   : > { %5704 = vpow2.f32 %v3036_v0  ;;  %v3212_v43 = vsub.f32 %v2588_v44, %v3196_v27  ;;  %v3260_v6 = vsub.f32 %v2860_v31, %v3196_v27  ;;  %v2924_v38 = vmul.f32 0.17677669, %v2893_v25 }
 0x3ef   : > { %2702 = vadd.xlane.f32.xlu0 %v2677_v35  ;;  %5706 = vpow2.f32 %v3084_v5  ;;  %v2685_v48 = vpop.xlane.xlu0 %2684  ;;  %v8071_v31 = vmul.f32 %v7537_v1, %v7759_v22  ;;  %v8077_v5 = vmul.f32 %v7500_v37, %v7759_v22  ;;  %v8085_v27 = vmul.f32 %v7471_v39, %v7772_v51 }
 0x3f0   : > { %v3228_v20 = vmul.f32 1.442695, %v3212_v43  ;;  %v3276_v46 = vmul.f32 1.442695, %v3260_v6  ;;  %v3388_v7 = vmax.f32 %v2652_v23, %v2924_v38  ;;  %v2716_v12 = vmul.f32 0.17677669, %v2685_v48 }
 0x3f1   : > { %2910 = vadd.xlane.f32.xlu1 %v2885_v26  ;;  %v2957_v44 = vpop.xlane.xlu1 %2956  ;;  %v8093_v6 = vmul.f32 %v7537_v1, %v7772_v51  ;;  %v8097_v22 = vmul.f32 %v7471_v39, %v7785_v40  ;;  %v8105_v48 = vmul.f32 %v7537_v1, %v7785_v40 }
 0x3f2   : > { %5708 = vpow2.f32 %v3228_v20  ;;  %v3404_v4 = vsub.f32 %v2652_v23, %v3388_v7  ;;  %v3452_v24 = vsub.f32 %v2924_v38, %v3388_v7  ;;  %v2988_v35 = vmul.f32 0.17677669, %v2957_v44 }
 0x3f3   : > { %2846 = vadd.xlane.f32.xlu0 %v2821_v29  ;;  %5710 = vpow2.f32 %v3276_v46  ;;  %v8089_v29 = vmul.f32 %v7500_v37, %v7772_v51  ;;  %v8101_v38 = vmul.f32 %v7504_v17, %v7772_v51  ;;  %v8109_v46 = vmul.f32 %v7500_v37, %v7785_v40 }
 0x3f4   : > { %v8073_v0 = vpop.xlane.xlu0 %2494  ;;  %v3420_v25 = vmul.f32 1.442695, %v3404_v4  ;;  %v3468_v23 = vmul.f32 1.442695, %v3452_v24  ;;  %v3580_v26 = vmax.f32 %v2716_v12, %v2988_v35  ;;  %v8113_v44 = vmul.f32 %v7504_v17, %v7785_v40 }
 0x3f5   : > { %2974 = vadd.xlane.f32.xlu1 %v2949_v41  ;;  %v8117_v51 = vmul.f32 %v7471_v39, %v7798_v8  ;;  %v8121_v4 = vmul.f32 %v7500_v37, %v7798_v8  ;;  %v8131_v40 = vmul.f32 %v7471_v39, %v7811_v30  ;;  %v2525_v62 = vmul.f32 0.17677669, %v8073_v0 }
 0x3f6   : > { %v2559_v43 = vpop.xlane.xlu1 %2558  ;;  %5712 = vpow2.f32 %v3420_v25  ;;  %v3596_v41 = vsub.f32 %v2716_v12, %v3580_v26  ;;  %v3644_v20 = vsub.f32 %v2988_v35, %v3580_v26  ;;  %v8127_v35 = vmul.f32 %v7537_v1, %v7798_v8 }
 0x3f7   : > { %2512 = vadd.xlane.f32.xlu0 %v2486_v15  ;;  %5714 = vpow2.f32 %v3468_v23  ;;  %v8137_v26 = vmul.f32 %v7504_v17, %v7798_v8  ;;  %v2589_v54 = vmul.f32 0.17677669, %v2559_v43 }
 0x3f8   : > { %v2623_v7 = vpop.xlane.xlu0 %2622  ;;  %v8123_v12 = vpop.eup %5704  ;;  %v3612_v15 = vmul.f32 1.442695, %v3596_v41  ;;  %v3660_v24 = vmul.f32 1.442695, %v3644_v20  ;;  %v8141_v41 = vmul.f32 %v7537_v1, %v7811_v30  ;;  %v8149_v20 = vmul.f32 %v7504_v17, %v7811_v30 }
 0x3f9   : > { %2576 = vadd.xlane.f32.xlu1 %v2550_v32  ;;  %v8133_v25 = vpop.eup %5706  ;;  %v8145_v32 = vmul.f32 %v7500_v37, %v7811_v30  ;;  %v8163_v30 = vmul.f32 %v7537_v1, %v7824_v59 }
 0x3fa   : > { %v2831_v23 = vpop.xlane.xlu1 %2830  ;;  %v3116_v52 = vadd.f32 %v8133_v25, %v8123_v12  ;;  %5716 = vpow2.f32 %v3612_v15  ;;  %v8173_v15 = vmul.f32 %v7504_v17, %v7824_v59 }
 0x3fb   : > { %v2861_v49 = vmul.f32 0.17677669, %v2831_v23  ;;  %2640 = vadd.xlane.f32.xlu0 %v2614_v11  ;;  %5718 = vpow2.f32 %v3660_v24  ;;  %v8169_v11 = vmul.f32 %v7471_v39, %v7837_v36  ;;  %v2653_v23 = vmul.f32 0.17677669, %v2623_v7 }
 0x3fc   : > { %v2687_v8 = vpop.xlane.xlu0 %2686  ;;  %v8165_v45 = vpop.eup %5708  ;;  %5720 = vrcp.f32 %v3116_v52  ;;  %v8183_v52 = vmul.f32 %v7500_v37, %v7837_v36 }
 0x3fd   : > { %v3197_v43 = vmax.f32 %v2589_v54, %v2861_v49  ;;  %2784 = vadd.xlane.f32.xlu1 %v2758_v28  ;;  %v8175_v24 = vpop.eup %5710  ;;  %v8187_v28 = vmul.f32 %v7504_v17, %v7837_v36  ;;  %v8202_v36 = vmul.f32 %v7537_v1, %v7850_v53  ;;  %v2717_v0 = vmul.f32 0.17677669, %v2687_v8 }
 0x3fe   : > { %v2895_v19 = vpop.xlane.xlu1 %2894  ;;  %v3308_v59 = vadd.f32 %v8175_v24, %v8165_v45 }
 0x3ff   : > { %v3213_v33 = vsub.f32 %v2589_v54, %v3197_v43  ;;  %v3261_v3 = vsub.f32 %v2861_v49, %v3197_v43  ;;  %v2925_v42 = vmul.f32 0.17677669, %v2895_v19  ;;  %2704 = vadd.xlane.f32.xlu0 %v8067_v58  ;;  %9506 = vst [vmem:[#allocation75_spill] sm:$0xff] %v8202_v36  ;;  %v8206_v54 = vmul.f32 %v7471_v39, %v7863_v16 }
 0x400   : > { %v2767_v7 = vpop.xlane.xlu0 %2766  ;;  %v8208_v19 = vpop.eup %5712  ;;  %5722 = vrcp.f32 %v3308_v59  ;;  %v8216_v36 = vmul.f32 %v7504_v17, %v7850_v53 }
 0x401   : > { %9507 = vst [vmem:[#allocation76_spill] sm:$0xff] %v8206_v54  ;;  %v3230_v49 = vmul.f32 1.442695, %v3213_v33  ;;  %v3278_v58 = vmul.f32 1.442695, %v3261_v3  ;;  %v3389_v43 = vmax.f32 %v2653_v23, %v2925_v42  ;;  %2912 = vadd.xlane.f32.xlu1 %v8071_v31  ;;  %v8211_v63 = vpop.eup %5714  ;;  %v8220_v54 = vmul.f32 %v7537_v1, %v7863_v16 }
 0x402   : > { %v2797_v47 = vmul.f32 0.17677669, %v2767_v7  ;;  %v2959_v50 = vpop.xlane.xlu1 %2958  ;;  %9508 = vst [vmem:[#allocation77_spill] sm:$0xff] %v8216_v36  ;;  %v3500_v3 = vadd.f32 %v8211_v63, %v8208_v19 }
 0x403   : > { %9509 = vst [vmem:[#allocation78_spill] sm:$0xff] %v8220_v54  ;;  %5724 = vpow2.f32 %v3230_v49  ;;  %v3405_v33 = vsub.f32 %v2653_v23, %v3389_v43  ;;  %v3453_v31 = vsub.f32 %v2925_v42, %v3389_v43  ;;  %2848 = vadd.xlane.f32.xlu0 %v8077_v5  ;;  %v2989_v7 = vmul.f32 0.17677669, %v2959_v50 }
 0x404   : > { %5726 = vpow2.f32 %v3278_v58  ;;  %v3005_v59 = vmax.f32 %v2525_v62, %v2797_v47  ;;  %v2497_v2 = vpop.xlane.xlu0 %2496  ;;  %v8225_v21 = vpop.eup %5716  ;;  %v8230_v54 = vmul.f32 %v7500_v37, %v7863_v16  ;;  %v8236_v50 = vmul.f32 %v7504_v17, %v7863_v16 }
 0x405   : > { %5728 = vrcp.f32 %v3500_v3  ;;  %v3422_v53 = vmul.f32 1.442695, %v3405_v33  ;;  %v3470_v36 = vmul.f32 1.442695, %v3453_v31  ;;  %2976 = vadd.xlane.f32.xlu1 %v8081_v9  ;;  %v8232_v23 = vpop.eup %5718  ;;  %v3581_v49 = vmax.f32 %v2717_v0, %v2989_v7 }
 0x406   : > { %v3021_v42 = vsub.f32 %v2525_v62, %v3005_v59  ;;  %v3069_v5 = vsub.f32 %v2797_v47, %v3005_v59  ;;  %v2561_v8 = vpop.xlane.xlu1 %2560  ;;  %v5721_v58 = vpop.eup %5720  ;;  %v3692_v43 = vadd.f32 %v8232_v23, %v8225_v21  ;;  %v8243_v9 = vmul.f32 %v7471_v39, %v7875_v55 }
 0x407   : > { %5730 = vpow2.f32 %v3422_v53  ;;  %2514 = vadd.xlane.f32.xlu0 %v8085_v27  ;;  %v8247_v47 = vmul.f32 %v7500_v37, %v7875_v55  ;;  %v8251_v33 = vmul.f32 %v7537_v1, %v7875_v55  ;;  %v3597_v31 = vsub.f32 %v2717_v0, %v3581_v49 }
 0x408   : > { %9510 = vst [vmem:[#allocation79_spill] sm:$0xff] %v8243_v9  ;;  %5732 = vpow2.f32 %v3470_v36  ;;  %v3038_v62 = vmul.f32 1.442695, %v3021_v42  ;;  %v3086_v3 = vmul.f32 1.442695, %v3069_v5  ;;  %v2625_v16 = vpop.xlane.xlu0 %2624  ;;  %v3645_v59 = vsub.f32 %v2989_v7, %v3581_v49 }
 0x409   : > { %9511 = vst [vmem:[#allocation80_spill] sm:$0xff] %v8247_v47  ;;  %9512 = vst [vmem:[#allocation81_spill] sm:$0xff] %v8251_v33  ;;  %5734 = vrcp.f32 %v3692_v43  ;;  %2578 = vadd.xlane.f32.xlu1 %v8089_v29  ;;  %v8256_v27 = vmul.f32 %v7471_v39, %v7886_v10  ;;  %v3180_v53 = vmul.f32 %v5721_v58, %v8133_v25  ;;  %v2526_v36 = vmul.f32 0.17677669, %v2497_v2 }
 0x40a   : > { %5736 = vpow2.f32 %v3038_v62  ;;  %v2769_v42 = vpop.xlane.xlu1 %2768  ;;  %v8261_v5 = vmul.f32 %v7500_v37, %v7886_v10  ;;  %v5723_v47 = vpop.eup %5722  ;;  %v3614_v43 = vmul.f32 1.442695, %v3597_v31  ;;  %v3662_v0 = vmul.f32 1.442695, %v3645_v59 }
 0x40b   : > { %9513 = vst [vmem:[#allocation82_spill] sm:$0xff] %v8256_v27  ;;  %5738 = vpow2.f32 %v3086_v3  ;;  %v2798_v7 = vmul.f32 0.17677669, %v2769_v42  ;;  %2642 = vadd.xlane.f32.xlu0 %v8093_v6  ;;  %v3164_v49 = vmul.f32 %v5721_v58, %v8123_v12  ;;  %v3356_v27 = vmul.f32 %v5723_v47, %v8165_v45 }
 0x40c   : > { %9514 = vst [vmem:[#allocation83_spill] sm:$0xff] %v8261_v5  ;;  %v2689_v29 = vpop.xlane.xlu0 %2688  ;;  %v8268_v2 = vmul.f32 %v7537_v1, %v7886_v10  ;;  %v8272_v25 = vmul.f32 %v7504_v17, %v7875_v55  ;;  %5740 = vpow2.f32 %v3614_v43  ;;  %v8276_v3 = vmul.f32 0.17677669, %v2561_v8 }
 0x40d   : > { %v8274_v62 = vpop.eup %5724  ;;  %v2654_v31 = vmul.f32 0.17677669, %v2625_v16  ;;  %v3006_v6 = vmax.f32 %v2526_v36, %v2798_v7  ;;  %2786 = vadd.xlane.f32.xlu1 %v8097_v22  ;;  %v3372_v45 = vmul.f32 %v5723_v47, %v8175_v24  ;;  %5742 = vpow2.f32 %v3662_v0 }
 0x40e   : > { %9515 = vst [vmem:[#allocation84_spill] sm:$0xff] %v8268_v2  ;;  %9516 = vst [vmem:[#allocation85_spill] sm:$0xff] %v8272_v25  ;;  %v8279_v12 = vpop.eup %5726  ;;  %v2897_v58 = vpop.xlane.xlu1 %2896  ;;  %v3788_v59 = vmul.f32 %v7500_v37, %v3356_v27  ;;  %v3916_v55 = vmul.f32 %v7471_v39, %v3180_v53  ;;  %v2718_v22 = vmul.f32 0.17677669, %v2689_v29  ;;  %v3772_v47 = vmul.f32 %v7471_v39, %v3164_v49 }
 0x40f   : > { %v5729_v42 = vpop.eup %5728  ;;  %v3309_v43 = vadd.f32 %v8279_v12, %v8274_v62  ;;  %v3022_v8 = vsub.f32 %v2526_v36, %v3006_v6  ;;  %v3070_v25 = vsub.f32 %v2798_v7, %v3006_v6  ;;  %v2926_v16 = vmul.f32 0.17677669, %v2897_v58  ;;  %2706 = vadd.xlane.f32.xlu0 %v8101_v38 }
 0x410   : > { %v2833_v2 = vpop.xlane.xlu0 %2832  ;;  %v3548_v5 = vmul.f32 %v5729_v42, %v8208_v19  ;;  %v3564_v24 = vmul.f32 %v5729_v42, %v8211_v63  ;;  %v3804_v29 = vadd.f32 %v3788_v59, %v3772_v47  ;;  %v3932_v19 = vmul.f32 %v7500_v37, %v3372_v45 }
 0x411   : > { %v8290_v27 = vpop.eup %5730  ;;  %5744 = vrcp.f32 %v3309_v43  ;;  %v3040_v53 = vmul.f32 1.442695, %v3022_v8  ;;  %v3088_v0 = vmul.f32 1.442695, %v3070_v25  ;;  %v3390_v33 = vmax.f32 %v2654_v31, %v2926_v16  ;;  %2914 = vadd.xlane.f32.xlu1 %v8105_v48 }
 0x412   : > { %v8293_v36 = vpop.eup %5732  ;;  %v2862_v7 = vmul.f32 0.17677669, %v2833_v2  ;;  %v2961_v38 = vpop.xlane.xlu1 %2960  ;;  %v3820_v6 = vmul.f32 %v7537_v1, %v3548_v5  ;;  %v3964_v5 = vmul.f32 %v7537_v1, %v3564_v24 }
 0x413   : > { %v5735_v63 = vpop.eup %5734  ;;  %v3501_v49 = vadd.f32 %v8293_v36, %v8290_v27  ;;  %5746 = vpow2.f32 %v3040_v53  ;;  %v3406_v58 = vsub.f32 %v2654_v31, %v3390_v33  ;;  %v3454_v42 = vsub.f32 %v2926_v16, %v3390_v33  ;;  %2850 = vadd.xlane.f32.xlu0 %v8109_v46 }
 0x414   : > { %v8300_v25 = vpop.eup %5736  ;;  %5748 = vpow2.f32 %v3088_v0  ;;  %v3198_v48 = vmax.f32 %v8276_v3, %v2862_v7  ;;  %v2990_v2 = vmul.f32 0.17677669, %v2961_v38  ;;  %v2499_v59 = vpop.xlane.xlu0 %2498  ;;  %v3740_v33 = vmul.f32 %v5735_v63, %v8225_v21 }
 0x415   : > { %v8304_v43 = vpop.eup %5738  ;;  %5750 = vrcp.f32 %v3501_v49  ;;  %v3424_v45 = vmul.f32 1.442695, %v3406_v58  ;;  %v3472_v8 = vmul.f32 1.442695, %v3454_v42  ;;  %2978 = vadd.xlane.f32.xlu1 %v8113_v44  ;;  %v2527_v24 = vmul.f32 0.17677669, %v2499_v59 }
 0x416   : > { %v3117_v46 = vadd.f32 %v8304_v43, %v8300_v25  ;;  %v3214_v31 = vsub.f32 %v8276_v3, %v3198_v48  ;;  %v3262_v16 = vsub.f32 %v2862_v7, %v3198_v48  ;;  %v3582_v47 = vmax.f32 %v2718_v22, %v2990_v2  ;;  %v2563_v53 = vpop.xlane.xlu1 %2562  ;;  %v8311_v0 = vpop.eup %5740 }
 0x417   : > { %5752 = vpow2.f32 %v3424_v45  ;;  %2516 = vadd.xlane.f32.xlu0 %v8117_v51  ;;  %v3756_v38 = vmul.f32 %v5735_v63, %v8232_v23  ;;  %v3948_v49 = vadd.f32 %v3932_v19, %v3916_v55  ;;  %v8315_v44 = vpop.eup %5742  ;;  %v3836_v48 = vadd.f32 %v3820_v6, %v3804_v29 }
 0x418   : > { %5754 = vrcp.f32 %v3117_v46  ;;  %v3232_v21 = vmul.f32 1.442695, %v3214_v31  ;;  %v3280_v58 = vmul.f32 1.442695, %v3262_v16  ;;  %v3598_v42 = vsub.f32 %v2718_v22, %v3582_v47  ;;  %v2627_v9 = vpop.xlane.xlu0 %2626 }
 0x419   : > { %v3693_v3 = vadd.f32 %v8315_v44, %v8311_v0  ;;  %5756 = vpow2.f32 %v3472_v8  ;;  %v3646_v7 = vsub.f32 %v2990_v2, %v3582_v47  ;;  %2580 = vadd.xlane.f32.xlu1 %v8121_v4  ;;  %v3852_v23 = vmul.f32 %v7504_v17, %v3740_v33 }
 0x41a   : > { %5758 = vpow2.f32 %v3232_v21  ;;  %v3616_v51 = vmul.f32 1.442695, %v3598_v42  ;;  %v2771_v59 = vpop.xlane.xlu1 %2770  ;;  %v3980_v55 = vadd.f32 %v3964_v5, %v3948_v49  ;;  %v3996_v22 = vmul.f32 %v7504_v17, %v3756_v38 }
 0x41b   : > { %v5745_v19 = vpop.eup %5744  ;;  %5760 = vrcp.f32 %v3693_v3  ;;  %v3664_v63 = vmul.f32 1.442695, %v3646_v7  ;;  %v2799_v45 = vmul.f32 0.17677669, %v2771_v59  ;;  %2644 = vadd.xlane.f32.xlu0 %v8127_v35  ;;  %v3868_v2 = vadd.f32 %v3852_v23, %v3836_v48 }
 0x41c   : > { %v3357_v8 = vmul.f32 %v5745_v19, %v8274_v62  ;;  %5762 = vpow2.f32 %v3280_v58  ;;  %v2691_v4 = vpop.xlane.xlu0 %2690  ;;  %v8326_v29 = vmul.f32 %v7504_v17, %v7886_v10  ;;  %v8330_v5 = vmul.f32 0.17677669, %v2563_v53 }
 0x41d   : > { %v8328_v6 = vpop.eup %5746  ;;  %5764 = vpow2.f32 %v3616_v51  ;;  %v3007_v33 = vmax.f32 %v2527_v24, %v2799_v45  ;;  %2788 = vadd.xlane.f32.xlu1 %v8131_v40  ;;  %v4012_v35 = vadd.f32 %v3996_v22, %v3980_v55  ;;  %v3373_v62 = vmul.f32 %v5745_v19, %v8279_v12 }
 0x41e   : > { %v8333_v46 = vpop.eup %5748  ;;  %5766 = vpow2.f32 %v3664_v63  ;;  %v2655_v31 = vmul.f32 0.17677669, %v2627_v9  ;;  %v3884_v16 = vmul.f32 %v3868_v2, %v8015_v57  ;;  %v2899_v47 = vpop.xlane.xlu1 %2898  ;;  %v8342_v40 = vmul.f32 %v7500_v37, %v3357_v8 }
 0x41f   : > { %v5751_v10 = vpop.eup %5750  ;;  %v3118_v38 = vadd.f32 %v8333_v46, %v8328_v6  ;;  %v3023_v49 = vsub.f32 %v2527_v24, %v3007_v33  ;;  %v3071_v53 = vsub.f32 %v2799_v45, %v3007_v33  ;;  %v4028_v21 = vmul.f32 %v4012_v35, %v8021_v18  ;;  %2708 = vadd.xlane.f32.xlu0 %v8137_v26 }
 0x420   : > { %v3549_v12 = vmul.f32 %v5751_v10, %v8290_v27  ;;  %v2719_v58 = vmul.f32 0.17677669, %v2691_v4  ;;  %v2927_v9 = vmul.f32 0.17677669, %v2899_v47  ;;  %v2835_v42 = vpop.xlane.xlu0 %2834  ;;  %v3933_v18 = vmul.f32 %v7500_v37, %v3373_v62 }
 0x421   : > { %v8345_v57 = vpop.eup %5752  ;;  %5768 = vrcp.f32 %v3118_v38  ;;  %v3042_v3 = vmul.f32 1.442695, %v3023_v49  ;;  %v3090_v7 = vmul.f32 1.442695, %v3071_v53  ;;  %v4044_v48 = vadd.f32 %v4028_v21, %v3884_v16  ;;  %2916 = vadd.xlane.f32.xlu1 %v8141_v41 }
 0x422   : > { %v5755_v24 = vpop.eup %5754  ;;  %v3565_v26 = vmul.f32 %v5751_v10, %v8293_v36  ;;  %v3391_v51 = vmax.f32 %v2655_v31, %v2927_v9  ;;  %v2863_v59 = vmul.f32 0.17677669, %v2835_v42  ;;  %v2963_v23 = vpop.xlane.xlu1 %2962  ;;  %v3821_v4 = vmul.f32 %v7537_v1, %v3549_v12 }
 0x423   : > { %v8350_v27 = vpop.eup %5756  ;;  %v3165_v55 = vmul.f32 %v5755_v24, %v8300_v25  ;;  %v3181_v19 = vmul.f32 %v5755_v24, %v8304_v43  ;;  %5770 = vpow2.f32 %v3042_v3  ;;  %4856 = vmatprep.mubr.f32.mxu1 %v4044_v48  ;;  %v2991_v63 = vmul.f32 0.17677669, %v2963_v23  ;;  %2852 = vadd.xlane.f32.xlu0 %v8145_v32 }
 0x424   : > { %v8355_v41 = vpop.eup %5758  ;;  %v3502_v45 = vadd.f32 %v8350_v27, %v8345_v57  ;;  %5772 = vpow2.f32 %v3090_v7  ;;  %v3407_v36 = vsub.f32 %v2655_v31, %v3391_v51  ;;  %v3455_v22 = vsub.f32 %v2927_v9, %v3391_v51  ;;  %v2501_v8 = vpop.xlane.xlu0 %2500 }
 0x425   : > { %v5761_v2 = vpop.eup %5760  ;;  %v3917_v25 = vmul.f32 %v7471_v39, %v3181_v19  ;;  %v3199_v43 = vmax.f32 %v8330_v5, %v2863_v59  ;;  %v3583_v33 = vmax.f32 %v2719_v58, %v2991_v63  ;;  %2980 = vadd.xlane.f32.xlu1 %v8149_v20  ;;  %v3965_v35 = vmul.f32 %v7537_v1, %v3565_v26 }
 0x426   : > { %v8363_v32 = vpop.eup %5762  ;;  %v3773_v62 = vmul.f32 %v7471_v39, %v3165_v55  ;;  %v3757_v31 = vmul.f32 %v5761_v2, %v8315_v44  ;;  %v3426_v16 = vmul.f32 1.442695, %v3407_v36  ;;  %v2565_v47 = vpop.xlane.xlu1 %2564  ;;  %5774 = vrcp.f32 %v3502_v45 }
 0x427   : > { %v8368_v10 = vpop.eup %5764  ;;  %v3310_v38 = vadd.f32 %v8363_v32, %v8355_v41  ;;  %v3474_v49 = vmul.f32 1.442695, %v3455_v22  ;;  %v3215_v53 = vsub.f32 %v8330_v5, %v3199_v43  ;;  %2518 = vadd.xlane.f32.xlu0 %v8155_v61  ;;  %v3949_v21 = vadd.f32 %v3933_v18, %v3917_v25 }
 0x428   : > { %v8374_v20 = vpop.eup %5766  ;;  %5776 = vpow2.f32 %v3426_v16  ;;  %v3263_v12 = vsub.f32 %v2863_v59, %v3199_v43  ;;  %v3599_v9 = vsub.f32 %v2719_v58, %v3583_v33  ;;  %v2629_v44 = vpop.xlane.xlu0 %2628  ;;  %v3647_v7 = vsub.f32 %v2991_v63, %v3583_v33 }
 0x429   : > { %5778 = vrcp.f32 %v3310_v38  ;;  %v3694_v42 = vadd.f32 %v8374_v20, %v8368_v10  ;;  %v3234_v3 = vmul.f32 1.442695, %v3215_v53  ;;  %2582 = vadd.xlane.f32.xlu1 %v8159_v13  ;;  %v3741_v48 = vmul.f32 %v5761_v2, %v8311_v0 }
 0x42a   : > { %5780 = vpow2.f32 %v3474_v49  ;;  %v3282_v5 = vmul.f32 1.442695, %v3263_v12  ;;  %v3618_v61 = vmul.f32 1.442695, %v3599_v9  ;;  %v2773_v24 = vpop.xlane.xlu1 %2772  ;;  %v3997_v18 = vmul.f32 %v7504_v17, %v3757_v31 }
 0x42b   : > { %v5769_v26 = vpop.eup %5768  ;;  %5782 = vrcp.f32 %v3694_v42  ;;  %v3666_v58 = vmul.f32 1.442695, %v3647_v7  ;;  %v2528_v51 = vmul.f32 0.17677669, %v2501_v8  ;;  %2646 = vadd.xlane.f32.xlu0 %v8163_v30  ;;  %v8382_v59 = vmul.f32 0.17677669, %v2565_v47 }
 0x42c   : > { %5784 = vpow2.f32 %v3234_v3  ;;  %v2800_v23 = vmul.f32 0.17677669, %v2773_v24  ;;  %v2693_v55 = vpop.xlane.xlu0 %2692  ;;  %v3805_v13 = vadd.f32 %v8342_v40, %v3773_v62  ;;  %v8388_v19 = vmul.f32 %v5769_v26, %v8333_v46 }
 0x42d   : > { %v8385_v0 = vpop.eup %5770  ;;  %5786 = vpow2.f32 %v3282_v5  ;;  %v2656_v63 = vmul.f32 0.17677669, %v2629_v44  ;;  %2790 = vadd.xlane.f32.xlu1 %v8169_v11  ;;  %v3981_v45 = vadd.f32 %v3965_v35, %v3949_v21  ;;  %v3853_v2 = vmul.f32 %v7504_v17, %v3741_v48 }
 0x42e   : > { %v8391_v36 = vpop.eup %5772  ;;  %5788 = vpow2.f32 %v3618_v61  ;;  %v3008_v30 = vmax.f32 %v2528_v51, %v2800_v23  ;;  %v2901_v22 = vpop.xlane.xlu1 %2900  ;;  %v3837_v8 = vadd.f32 %v3821_v4, %v3805_v13  ;;  %v3166_v62 = vmul.f32 %v5769_v26, %v8328_v6 }
 0x42f   : > { %v3119_v40 = vadd.f32 %v8391_v36, %v8385_v0  ;;  %5790 = vpow2.f32 %v3666_v58  ;;  %v2928_v25 = vmul.f32 0.17677669, %v2901_v22  ;;  %2710 = vadd.xlane.f32.xlu0 %v8173_v15  ;;  %v4013_v46 = vadd.f32 %v3997_v18, %v3981_v45 }
 0x430   : > { %v3024_v43 = vsub.f32 %v2528_v51, %v3008_v30  ;;  %v3072_v33 = vsub.f32 %v2800_v23, %v3008_v30  ;;  %v3869_v11 = vadd.f32 %v3853_v2, %v3837_v8  ;;  %v2837_v35 = vpop.xlane.xlu0 %2836  ;;  %v5775_v31 = vpop.eup %5774  ;;  %v2720_v16 = vmul.f32 0.17677669, %v2693_v55  ;;  %v9518_v2 = vld [vmem:[#allocation35_spill] sm:$0xff] }
 0x431   : > { %v3392_v47 = vmax.f32 %v2656_v63, %v2928_v25  ;;  %v4029_v4 = vmul.f32 %v4013_v46, %v8031_v14  ;;  %2918 = vadd.xlane.f32.xlu1 %v8179_v56  ;;  %v2864_v38 = vmul.f32 0.17677669, %v2837_v35  ;;  %5792 = vrcp.f32 %v3119_v40  ;;  %v9519_v46 = vld [vmem:[#allocation74_spill] sm:$0xff] }
 0x432   : > { %v8400_v49 = vpop.eup %5776  ;;  %v3044_v53 = vmul.f32 1.442695, %v3024_v43  ;;  %v3092_v15 = vmul.f32 1.442695, %v3072_v33  ;;  %v3885_v21 = vmul.f32 %v3869_v11, %v8025_v34  ;;  %v2965_v12 = vpop.xlane.xlu1 %2964  ;;  %v3550_v48 = vmul.f32 %v5775_v31, %v8345_v57 }
 0x433   : > { %v5779_v9 = vpop.eup %5778  ;;  %v3408_v44 = vsub.f32 %v2656_v63, %v3392_v47  ;;  %v3456_v42 = vsub.f32 %v2928_v25, %v3392_v47  ;;  %v3200_v6 = vmax.f32 %v8382_v59, %v2864_v38  ;;  %v2992_v3 = vmul.f32 0.17677669, %v2965_v12  ;;  %2854 = vadd.xlane.f32.xlu0 %v8183_v52  ;;  %v9521_v12 = vld [vmem:[#allocation36_spill] sm:$0xff] }
 0x434   : > { %v8405_v14 = vpop.eup %5780  ;;  %5794 = vpow2.f32 %v3044_v53  ;;  %v4045_v56 = vadd.f32 %v4029_v4, %v3885_v21  ;;  %v2503_v7 = vpop.xlane.xlu0 %2502  ;;  %v3774_v5 = vmul.f32 %v7471_v39, %v3166_v62  ;;  %v3358_v57 = vmul.f32 %v5779_v9, %v8355_v41  ;;  %v9520_v4 = vld [vmem:[#allocation75_spill] sm:$0xff] }
 0x435   : > { %v5783_v61 = vpop.eup %5782  ;;  %v3503_v34 = vadd.f32 %v8405_v14, %v8400_v49  ;;  %5796 = vpow2.f32 %v3092_v15  ;;  %v3428_v24 = vmul.f32 1.442695, %v3408_v44  ;;  %v3476_v26 = vmul.f32 1.442695, %v3456_v42  ;;  %2982 = vadd.xlane.f32.xlu1 %v8187_v28  ;;  %v9517_v28 = vld [vmem:[#allocation34_spill] sm:$0xff] }
 0x436   : > { %v8412_v18 = vpop.eup %5784  ;;  %4857 = vmatmul.mubr.f32.vlgmr.msra.gmra.mrb[80].mxu1 %v4045_v56  ;;  %v3216_v52 = vsub.f32 %v8382_v59, %v3200_v6  ;;  %v3264_v58 = vsub.f32 %v2864_v38, %v3200_v6  ;;  %v3584_v51 = vmax.f32 %v2720_v16, %v2992_v3  ;;  %v2567_v23 = vpop.xlane.xlu1 %2566  ;;  %v3374_v13 = vmul.f32 %v5779_v9, %v8363_v32 }
 0x437   : > { %v8416_v55 = vpop.eup %5786  ;;  %5798 = vrcp.f32 %v3503_v34  ;;  %v2529_v63 = vmul.f32 0.17677669, %v2503_v7  ;;  %v8419_v45 = vmul.f32 0.17677669, %v2567_v23  ;;  %2520 = vadd.xlane.f32.xlu0 %v8194_v60  ;;  %5360 = vmatpush3.bf16.msra.mxu1 %v9517_v28  ;;  %v3742_v8 = vmul.f32 %v5783_v61, %v8368_v10 }
 0x438   : > { %v8423_v30 = vpop.eup %5788  ;;  %v3311_v59 = vadd.f32 %v8416_v55, %v8412_v18  ;;  %5800 = vpow2.f32 %v3428_v24  ;;  %v3236_v22 = vmul.f32 1.442695, %v3216_v52  ;;  %v2631_v41 = vpop.xlane.xlu0 %2630  ;;  %5353 = vmatprep.subr.bf16.mxu1 %v9518_v2  ;;  %v3284_v40 = vmul.f32 1.442695, %v3264_v58 }
 0x439   : > { %v8429_v32 = vpop.eup %5790  ;;  %5802 = vpow2.f32 %v3476_v26  ;;  %v3600_v25 = vsub.f32 %v2720_v16, %v3584_v51  ;;  %v3648_v60 = vsub.f32 %v2992_v3, %v3584_v51  ;;  %2584 = vadd.xlane.f32.xlu1 %v9519_v46  ;;  %v3566_v11 = vmul.f32 %v5775_v31, %v8350_v27  ;;  %v9522_v31 = vld [vmem:[#allocation76_spill] sm:$0xff]  ;;  %v9523_v26 = vld [vmem:[#allocation77_spill] sm:$0xff] }
 0x43a   : > { %5804 = vrcp.f32 %v3311_v59  ;;  %v3695_v43 = vadd.f32 %v8429_v32, %v8423_v30  ;;  %v2775_v33 = vpop.xlane.xlu1 %2774  ;;  %v3790_v35 = vmul.f32 %v7500_v37, %v3358_v57  ;;  %v2657_v38 = vmul.f32 0.17677669, %v2631_v41  ;;  %v9524_v51 = vld [vmem:[#allocation37_spill] sm:$0xff]  ;;  %v9525_v59 = vld [vmem:[#allocation78_spill] sm:$0xff] }
 0x43b   : > { %5806 = vpow2.f32 %v3236_v22  ;;  %v3620_v10 = vmul.f32 1.442695, %v3600_v25  ;;  %v3668_v62 = vmul.f32 1.442695, %v3648_v60  ;;  %v2801_v47 = vmul.f32 0.17677669, %v2775_v33  ;;  %2648 = vadd.xlane.f32.xlu0 %v9520_v4  ;;  %5361 = vmatpush3.bf16.msra.mxu1 %v9518_v2  ;;  %v8438_v16 = vpop.eup %5792 }
 0x43c   : > { %5808 = vrcp.f32 %v3695_v43  ;;  %v2695_v53 = vpop.xlane.xlu0 %2694  ;;  %v3806_v15 = vadd.f32 %v3790_v35, %v3774_v5  ;;  %v3822_v21 = vmul.f32 %v7537_v1, %v3550_v48  ;;  %5354 = vmatprep.subr.bf16.mxu1 %v9521_v12  ;;  %v3758_v9 = vmul.f32 %v5783_v61, %v8374_v20  ;;  %v9527_v4 = vld [vmem:[#allocation38_spill] sm:$0xff] }
 0x43d   : > { %5810 = vpow2.f32 %v3284_v40  ;;  %v3009_v27 = vmax.f32 %v2529_v63, %v2801_v47  ;;  %2792 = vadd.xlane.f32.xlu1 %v9522_v31  ;;  %v3854_v44 = vmul.f32 %v7504_v17, %v3742_v8  ;;  %v3918_v56 = vmul.f32 %v7471_v39, %v8388_v19  ;;  %v9528_v31 = vld [vmem:[#allocation71_spill] sm:$0xff] }
 0x43e   : > { %v8445_v42 = vpop.eup %5794  ;;  %5812 = vpow2.f32 %v3620_v10  ;;  %v2903_v6 = vpop.xlane.xlu1 %2902  ;;  %v3838_v3 = vadd.f32 %v3822_v21, %v3806_v15  ;;  %v3934_v7 = vmul.f32 %v7500_v37, %v3374_v13  ;;  %v3966_v58 = vmul.f32 %v7537_v1, %v3566_v11  ;;  %v9526_v11 = vld [vmem:[#allocation70_spill] sm:$0xff] }
 0x43f   : > { %v8450_v48 = vpop.eup %5796  ;;  %5814 = vpow2.f32 %v3668_v62  ;;  %v3025_v5 = vsub.f32 %v2529_v63, %v3009_v27  ;;  %v3073_v34 = vsub.f32 %v2801_v47, %v3009_v27  ;;  %v2929_v24 = vmul.f32 0.17677669, %v2903_v6  ;;  %2712 = vadd.xlane.f32.xlu0 %v9523_v26  ;;  %5362 = vmatpush3.bf16.msra.mxu1 %v9521_v12 }
 0x440   : > { %v3120_v20 = vadd.f32 %v8450_v48, %v8445_v42  ;;  %v3870_v61 = vadd.f32 %v3854_v44, %v3838_v3  ;;  %v3950_v52 = vadd.f32 %v3934_v7, %v3918_v56  ;;  %v2839_v19 = vpop.xlane.xlu0 %2838  ;;  %5355 = vmatprep.subr.bf16.mxu1 %v9524_v51  ;;  %v2721_v63 = vmul.f32 0.17677669, %v2695_v53 }
 0x441   : > { %v8458_v23 = vpop.eup %5798  ;;  %v3046_v57 = vmul.f32 1.442695, %v3025_v5  ;;  %v3094_v13 = vmul.f32 1.442695, %v3073_v34  ;;  %v3393_v28 = vmax.f32 %v2657_v38, %v2929_v24  ;;  %2920 = vadd.xlane.f32.xlu1 %v9525_v59  ;;  %v3998_v8 = vmul.f32 %v7504_v17, %v3758_v9 }
 0x442   : > { %v8461_v22 = vpop.eup %5800  ;;  %5816 = vrcp.f32 %v3120_v20  ;;  %v3982_v41 = vadd.f32 %v3966_v58, %v3950_v52  ;;  %v2865_v2 = vmul.f32 0.17677669, %v2839_v19  ;;  %v2967_v40 = vpop.xlane.xlu1 %2966  ;;  %v3886_v35 = vmul.f32 %v3870_v61, %v9526_v11  ;;  %v9530_v61 = vld [vmem:[#allocation39_spill] sm:$0xff] }
 0x443   : > { %v8464_v25 = vpop.eup %5802  ;;  %5818 = vpow2.f32 %v3046_v57  ;;  %v3409_v60 = vsub.f32 %v2657_v38, %v3393_v28  ;;  %v3457_v46 = vsub.f32 %v2929_v24, %v3393_v28  ;;  %v2993_v43 = vmul.f32 0.17677669, %v2967_v40  ;;  %2856 = vadd.xlane.f32.xlu0 %v8230_v54  ;;  %5363 = vmatpush3.bf16.msra.mxu1 %v9524_v51  ;;  %v9531_v51 = vld [vmem:[#allocation80_spill] sm:$0xff] }
 0x444   : > { %v5805_v33 = vpop.eup %5804  ;;  %5820 = vpow2.f32 %v3094_v13  ;;  %v4014_v10 = vadd.f32 %v3998_v8, %v3982_v41  ;;  %v3201_v62 = vmax.f32 %v8419_v45, %v2865_v2  ;;  %v2505_v47 = vpop.xlane.xlu0 %2504  ;;  %5356 = vmatprep.subr.bf16.mxu1 %v9527_v4  ;;  %v3504_v38 = vadd.f32 %v8464_v25, %v8461_v22  ;;  %v9532_v8 = vld [vmem:[#allocation81_spill] sm:$0xff] }
 0x445   : > { %v8471_v53 = vpop.eup %5806  ;;  %v3430_v15 = vmul.f32 1.442695, %v3409_v60  ;;  %v3478_v21 = vmul.f32 1.442695, %v3457_v46  ;;  %v3585_v54 = vmax.f32 %v2721_v63, %v2993_v43  ;;  %2984 = vadd.xlane.f32.xlu1 %v8236_v50  ;;  %v8478_v27 = vmul.f32 %v8438_v16, %v8391_v36  ;;  %v9529_v50 = vld [vmem:[#allocation79_spill] sm:$0xff] }
 0x446   : > { %v5809_v12 = vpop.eup %5808  ;;  %v4030_v9 = vmul.f32 %v4014_v10, %v9528_v31  ;;  %v3217_v44 = vsub.f32 %v8419_v45, %v3201_v62  ;;  %v3265_v6 = vsub.f32 %v2865_v2, %v3201_v62  ;;  %v2569_v3 = vpop.xlane.xlu1 %2568  ;;  %v8485_v7 = vmul.f32 %v5805_v33, %v8416_v55  ;;  %v9536_v31 = vld [vmem:[#allocation27_spill] sm:$0xff] }
 0x447   : > { %v8482_v56 = vpop.eup %5810  ;;  %5822 = vpow2.f32 %v3430_v15  ;;  %v3601_v5 = vsub.f32 %v2721_v63, %v3585_v54  ;;  %v3649_v34 = vsub.f32 %v2993_v43, %v3585_v54  ;;  %2522 = vadd.xlane.f32.xlu0 %v9529_v50  ;;  %5364 = vmatpush3.bf16.msra.mxu1 %v9527_v4  ;;  %v2530_v19 = vmul.f32 0.17677669, %v2505_v47  ;;  %v9535_v15 = vld [vmem:[#allocation83_spill] sm:$0xff] }
 0x448   : > { %v8489_v36 = vpop.eup %5812  ;;  %v3312_v24 = vadd.f32 %v8482_v56, %v8471_v53  ;;  %5824 = vpow2.f32 %v3478_v21  ;;  %v4046_v45 = vadd.f32 %v4030_v9, %v3886_v35  ;;  %v3238_v26 = vmul.f32 1.442695, %v3217_v44  ;;  %v2633_v20 = vpop.xlane.xlu0 %2632  ;;  %5357 = vmatprep.subr.bf16.mxu1 %v9530_v61 }
 0x449   : > { %v8494_v55 = vpop.eup %5814  ;;  %5826 = vrcp.f32 %v3504_v38  ;;  %v3286_v52 = vmul.f32 1.442695, %v3265_v6  ;;  %v3622_v58 = vmul.f32 1.442695, %v3601_v5  ;;  %2586 = vadd.xlane.f32.xlu1 %v9531_v51  ;;  %v3670_v13 = vmul.f32 1.442695, %v3649_v34 }
 0x44a   : > { %5828 = vrcp.f32 %v3312_v24  ;;  %v3696_v57 = vadd.f32 %v8494_v55, %v8489_v36  ;;  %4859 = vmatprep.mubr.f32.mxu1 %v4046_v45  ;;  %v2777_v63 = vpop.xlane.xlu1 %2776  ;;  %v3167_v28 = vmul.f32 %v8438_v16, %v8385_v0  ;;  %v8501_v59 = vmul.f32 0.17677669, %v2569_v3  ;;  %v9533_v16 = vld [vmem:[#allocation26_spill] sm:$0xff]  ;;  %v9537_v5 = vld [vmem:[#allocation84_spill] sm:$0xff] }
 0x44b   : > { %5830 = vpow2.f32 %v3238_v26  ;;  %v2802_v41 = vmul.f32 0.17677669, %v2777_v63  ;;  %2650 = vadd.xlane.f32.xlu0 %v9532_v8  ;;  %v3359_v2 = vmul.f32 %v5805_v33, %v8412_v18  ;;  %5365 = vmatpush3.bf16.msra.mxu1 %v9530_v61  ;;  %v2658_v60 = vmul.f32 0.17677669, %v2633_v20  ;;  %v9534_v18 = vld [vmem:[#allocation82_spill] sm:$0xff] }
 0x44c   : > { %v8506_v40 = vpop.eup %5816  ;;  %5832 = vrcp.f32 %v3696_v57  ;;  %v2697_v46 = vpop.xlane.xlu0 %2696  ;;  %v3551_v43 = vmul.f32 %v8458_v23, %v8400_v49  ;;  %v3567_v0 = vmul.f32 %v8458_v23, %v8405_v14  ;;  %5358 = vmatprep.subr.bf16.mxu1 %v9533_v16  ;;  %v3743_v33 = vmul.f32 %v5809_v12, %v8423_v30 }
 0x44d   : > { %v8513_v11 = vpop.eup %5818  ;;  %5834 = vpow2.f32 %v3286_v52  ;;  %v3010_v35 = vmax.f32 %v2530_v19, %v2802_v41  ;;  %2794 = vadd.xlane.f32.xlu1 %v9534_v18  ;;  %v3759_v10 = vmul.f32 %v5809_v12, %v8429_v32  ;;  %v8522_v49 = vmul.f32 %v8506_v40, %v8450_v48 }
 0x44e   : > { %v8518_v62 = vpop.eup %5820  ;;  %5836 = vpow2.f32 %v3622_v58  ;;  %v2905_v14 = vpop.xlane.xlu1 %2904  ;;  %v3775_v23 = vmul.f32 %v7471_v39, %v3167_v28  ;;  %v3791_v47 = vmul.f32 %v7500_v37, %v3359_v2  ;;  %v3823_v48 = vmul.f32 %v7537_v1, %v3551_v43 }
 0x44f   : > { %v3121_v4 = vadd.f32 %v8518_v62, %v8513_v11  ;;  %5838 = vpow2.f32 %v3670_v13  ;;  %v3026_v38 = vsub.f32 %v2530_v19, %v3010_v35  ;;  %v3074_v30 = vsub.f32 %v2802_v41, %v3010_v35  ;;  %2858 = vadd.xlane.f32.xlu0 %v9535_v15  ;;  %5366 = vmatpush3.bf16.msra.mxu1 %v9533_v16 }
 0x450   : > { %v2930_v32 = vmul.f32 0.17677669, %v2905_v14  ;;  %v3807_v21 = vadd.f32 %v3791_v47, %v3775_v23  ;;  %v3919_v54 = vmul.f32 %v7471_v39, %v8478_v27  ;;  %v2841_v12 = vpop.xlane.xlu0 %2840  ;;  %5359 = vmatprep.subr.bf16.mxu1 %v9536_v31  ;;  %v3935_v3 = vmul.f32 %v7500_v37, %v8485_v7  ;;  %v9538_v7 = vld [vmem:[#allocation85_spill] sm:$0xff]  ;;  %v9539_v14 = vld [vmem:[#allocation72_spill] sm:$0xff] }
 0x451   : > { %v8534_v9 = vpop.eup %5822  ;;  %5840 = vrcp.f32 %v3121_v4  ;;  %v3048_v44 = vmul.f32 1.442695, %v3026_v38  ;;  %v3096_v6 = vmul.f32 1.442695, %v3074_v30  ;;  %2922 = vadd.xlane.f32.xlu1 %v9537_v5  ;;  %v3855_v45 = vmul.f32 %v7504_v17, %v3743_v33 }
 0x452   : > { %v8539_v34 = vpop.eup %5824  ;;  %v3394_v50 = vmax.f32 %v2658_v60, %v2930_v32  ;;  %v3839_v24 = vadd.f32 %v3823_v48, %v3807_v21  ;;  %v3967_v27 = vmul.f32 %v7537_v1, %v3567_v0  ;;  %v2969_v26 = vpop.xlane.xlu1 %2968  ;;  %v3951_v52 = vadd.f32 %v3935_v3, %v3919_v54  ;;  %v9540_v21 = vld [vmem:[#allocation73_spill] sm:$0xff] }
 0x453   : > { %v8543_v20 = vpop.eup %5826  ;;  %v3505_v61 = vadd.f32 %v8539_v34, %v8534_v9  ;;  %5842 = vpow2.f32 %v3048_v44  ;;  %v2866_v58 = vmul.f32 0.17677669, %v2841_v12  ;;  %2714 = vadd.xlane.f32.xlu0 %v9538_v7  ;;  %5367 = vmatpush3.bf16.msra.mxu1 %v9536_v31  ;;  %v2722_v41 = vmul.f32 0.17677669, %v2697_v46 }
 0x454   : > { %v5829_v19 = vpop.eup %5828  ;;  %5844 = vpow2.f32 %v3096_v6  ;;  %v3410_v51 = vsub.f32 %v2658_v60, %v3394_v50  ;;  %v3458_v57 = vsub.f32 %v2930_v32, %v3394_v50  ;;  %v3871_v13 = vadd.f32 %v3855_v45, %v3839_v24  ;;  %v2507_v63 = vpop.xlane.xlu0 %2506 }
 0x455   : > { %v8549_v28 = vpop.eup %5830  ;;  %v3983_v8 = vadd.f32 %v3967_v27, %v3951_v52  ;;  %v3999_v2 = vmul.f32 %v7504_v17, %v3759_v10  ;;  %v3202_v43 = vmax.f32 %v8501_v59, %v2866_v58  ;;  %2986 = vadd.xlane.f32.xlu1 %v8326_v29  ;;  %5846 = vrcp.f32 %v3505_v61 }
 0x456   : > { %v8554_v0 = vpop.eup %5832  ;;  %v3432_v16 = vmul.f32 1.442695, %v3410_v51  ;;  %v3480_v35 = vmul.f32 1.442695, %v3458_v57  ;;  %v2994_v18 = vmul.f32 0.17677669, %v2969_v26  ;;  %v2571_v60 = vpop.xlane.xlu1 %2570  ;;  %v3887_v23 = vmul.f32 %v3871_v13, %v9539_v14 }
 0x457   : > { %v8556_v33 = vpop.eup %5834  ;;  %v4015_v47 = vadd.f32 %v3999_v2, %v3983_v8  ;;  %v3218_v46 = vsub.f32 %v8501_v59, %v3202_v43  ;;  %v3266_v4 = vsub.f32 %v2866_v58, %v3202_v43  ;;  %v3376_v38 = vmul.f32 %v5829_v19, %v8482_v56 }
 0x458   : > { %v8560_v10 = vpop.eup %5836  ;;  %v3313_v29 = vadd.f32 %v8556_v33, %v8549_v28  ;;  %5848 = vpow2.f32 %v3432_v16  ;;  %v3586_v30 = vmax.f32 %v2722_v41, %v2994_v18  ;;  %v2635_v15 = vpop.xlane.xlu0 %2634  ;;  %v2531_v5 = vmul.f32 0.17677669, %v2507_v63 }
 0x459   : > { %v8565_v32 = vpop.eup %5838  ;;  %5850 = vpow2.f32 %v3480_v35  ;;  %v4031_v48 = vmul.f32 %v4015_v47, %v9540_v21  ;;  %v3240_v54 = vmul.f32 1.442695, %v3218_v46  ;;  %v3288_v12 = vmul.f32 1.442695, %v3266_v4 }
 0x45a   : > { %5852 = vrcp.f32 %v3313_v29  ;;  %v3697_v59 = vadd.f32 %v8565_v32, %v8560_v10  ;;  %v3602_v31 = vsub.f32 %v2722_v41, %v3586_v30  ;;  %v3650_v44 = vsub.f32 %v2994_v18, %v3586_v30  ;;  %v2779_v56 = vpop.xlane.xlu1 %2778 }
 0x45b   : > { %v8570_v6 = vpop.eup %5840  ;;  %v4047_v3 = vadd.f32 %v4031_v48, %v3887_v23  ;;  %5854 = vpow2.f32 %v3240_v54  ;;  %v2803_v50 = vmul.f32 0.17677669, %v2779_v56  ;;  %v8572_v27 = vmul.f32 0.17677669, %v2571_v60 }
 0x45c   : > { %5856 = vrcp.f32 %v3697_v59  ;;  %v3624_v24 = vmul.f32 1.442695, %v3602_v31  ;;  %v3672_v45 = vmul.f32 1.442695, %v3650_v44  ;;  %v2699_v26 = vpop.xlane.xlu0 %2698  ;;  %v2659_v52 = vmul.f32 0.17677669, %v2635_v15 }
 0x45d   : > { %v8574_v61 = vpop.eup %5842  ;;  %4860 = vmatmul.mubr.f32.gmra.mrb[82].mxu1 %v4047_v3  ;;  %5858 = vpow2.f32 %v3288_v12  ;;  %v3011_v58 = vmax.f32 %v2531_v5, %v2803_v50  ;;  %v3168_v7 = vmul.f32 %v8506_v40, %v8445_v42  ;;  %v8582_v57 = vmul.f32 %v8570_v6, %v8518_v62 }
 0x45e   : > { %v8578_v51 = vpop.eup %5844  ;;  %5860 = vpow2.f32 %v3624_v24  ;;  %v2907_v13 = vpop.xlane.xlu1 %2906  ;;  %v3360_v63 = vmul.f32 %v5829_v19, %v8471_v53  ;;  %v3552_v41 = vmul.f32 %v8543_v20, %v8461_v22  ;;  %v8591_v40 = vmul.f32 0.17677669, %v2699_v26 }
 0x45f   : > { %v3122_v8 = vadd.f32 %v8578_v51, %v8574_v61  ;;  %5862 = vpow2.f32 %v3672_v45  ;;  %v3027_v2 = vsub.f32 %v2531_v5, %v3011_v58  ;;  %v3075_v43 = vsub.f32 %v2803_v50, %v3011_v58  ;;  %v8589_v42 = vpop.eup %5846 }
 0x460   : > { %v2931_v16 = vmul.f32 0.17677669, %v2907_v13  ;;  %v3568_v62 = vmul.f32 %v8543_v20, %v8464_v25  ;;  %v3744_v53 = vmul.f32 %v8554_v0, %v8489_v36  ;;  %v2843_v19 = vpop.xlane.xlu0 %2842  ;;  %v3776_v18 = vmul.f32 %v7471_v39, %v3168_v7 }
 0x461   : > { %v3050_v35 = vmul.f32 1.442695, %v3027_v2  ;;  %v3098_v22 = vmul.f32 1.442695, %v3075_v43  ;;  %v3792_v60 = vmul.f32 %v7500_v37, %v3360_v63  ;;  %5864 = vrcp.f32 %v3122_v8  ;;  %v9541_v8 = vld [vmem:[#allocation22_spill] sm:$0xff] }
 0x462   : > { %v8599_v14 = vpop.eup %5848  ;;  %v3395_v23 = vmax.f32 %v2659_v52, %v2931_v16  ;;  %v3760_v47 = vmul.f32 %v8554_v0, %v8494_v55  ;;  %v3824_v46 = vmul.f32 %v7537_v1, %v3552_v41  ;;  %v2971_v25 = vpop.xlane.xlu1 %2970  ;;  %v3920_v4 = vmul.f32 %v7471_v39, %v8522_v49 }
 0x463   : > { %v8604_v20 = vpop.eup %5850  ;;  %5866 = vpow2.f32 %v3050_v35  ;;  %v3808_v36 = vadd.f32 %v3792_v60, %v3776_v18  ;;  %v3936_v29 = vmul.f32 %v7500_v37, %v3376_v38  ;;  %v3856_v12 = vmul.f32 %v7504_v17, %v3744_v53 }
 0x464   : > { %v5853_v30 = vpop.eup %5852  ;;  %v3506_v15 = vadd.f32 %v8604_v20, %v8599_v14  ;;  %5868 = vpow2.f32 %v3098_v22  ;;  %v3411_v21 = vsub.f32 %v2659_v52, %v3395_v23  ;;  %v3459_v48 = vsub.f32 %v2931_v16, %v3395_v23  ;;  %v2509_v55 = vpop.xlane.xlu0 %2508  ;;  %v9542_v22 = vld [vmem:[#allocation25_spill] sm:$0xff] }
 0x465   : > { %v8611_v0 = vpop.eup %5854  ;;  %v3840_v54 = vadd.f32 %v3824_v46, %v3808_v36  ;;  %v3952_v59 = vadd.f32 %v3936_v29, %v3920_v4  ;;  %v3968_v31 = vmul.f32 %v7537_v1, %v3568_v62  ;;  %v4000_v56 = vmul.f32 %v7504_v17, %v3760_v47 }
 0x466   : > { %v8615_v44 = vpop.eup %5856  ;;  %v3434_v49 = vmul.f32 1.442695, %v3411_v21  ;;  %v3482_v38 = vmul.f32 1.442695, %v3459_v48  ;;  %v2867_v3 = vmul.f32 0.17677669, %v2843_v19  ;;  %v2573_v5 = vpop.xlane.xlu1 %2572  ;;  %5870 = vrcp.f32 %v3506_v15 }
 0x467   : > { %v8618_v50 = vpop.eup %5858  ;;  %v3872_v24 = vadd.f32 %v3856_v12, %v3840_v54  ;;  %v3984_v45 = vadd.f32 %v3968_v31, %v3952_v59  ;;  %v2995_v26 = vmul.f32 0.17677669, %v2971_v25  ;;  %v8623_v58 = vmul.f32 %v5853_v30, %v8556_v33 }
 0x468   : > { %v8620_v52 = vpop.eup %5860  ;;  %v3314_v7 = vadd.f32 %v8618_v50, %v8611_v0  ;;  %5872 = vpow2.f32 %v3434_v49  ;;  %v3203_v13 = vmax.f32 %v8572_v27, %v2867_v3  ;;  %v2637_v63 = vpop.xlane.xlu0 %2636  ;;  %v2532_v19 = vmul.f32 0.17677669, %v2509_v55 }
 0x469   : > { %v8628_v41 = vpop.eup %5862  ;;  %5874 = vpow2.f32 %v3482_v38  ;;  %v3888_v2 = vmul.f32 %v3872_v24, %v9541_v8  ;;  %v4016_v43 = vadd.f32 %v4000_v56, %v3984_v45  ;;  %v3587_v16 = vmax.f32 %v8591_v40, %v2995_v26 }
 0x46a   : > { %v3698_v62 = vadd.f32 %v8628_v41, %v8620_v52  ;;  %v3219_v33 = vsub.f32 %v8572_v27, %v3203_v13  ;;  %v3267_v53 = vsub.f32 %v2867_v3, %v3203_v13  ;;  %v2781_v35 = vpop.xlane.xlu1 %2780  ;;  %v8637_v47 = vmul.f32 0.17677669, %v2573_v5 }
 0x46b   : > { %v4032_v18 = vmul.f32 %v4016_v43, %v9542_v22  ;;  %v3603_v60 = vsub.f32 %v8591_v40, %v3587_v16  ;;  %v3651_v23 = vsub.f32 %v2995_v26, %v3587_v16  ;;  %v8639_v46 = vpop.eup %5864  ;;  %5876 = vrcp.f32 %v3314_v7 }
 0x46c   : > { %v3242_v25 = vmul.f32 1.442695, %v3219_v33  ;;  %v3290_v36 = vmul.f32 1.442695, %v3267_v53  ;;  %v2660_v4 = vmul.f32 0.17677669, %v2637_v63  ;;  %v2701_v29 = vpop.xlane.xlu0 %2700  ;;  %5878 = vrcp.f32 %v3698_v62 }
 0x46d   : > { %v8641_v15 = vpop.eup %5866  ;;  %v4048_v27 = vadd.f32 %v4032_v18, %v3888_v2  ;;  %v3626_v21 = vmul.f32 1.442695, %v3603_v60  ;;  %v2804_v48 = vmul.f32 0.17677669, %v2781_v35  ;;  %v3674_v40 = vmul.f32 1.442695, %v3651_v23 }
 0x46e   : > { %v8643_v55 = vpop.eup %5868  ;;  %5880 = vpow2.f32 %v3242_v25  ;;  %v2909_v54 = vpop.xlane.xlu1 %2908  ;;  %v3169_v12 = vmul.f32 %v8570_v6, %v8513_v11  ;;  %v3361_v59 = vmul.f32 %v5853_v30, %v8549_v28  ;;  %v8652_v56 = vmul.f32 %v8639_v46, %v8578_v51 }
 0x46f   : > { %v3123_v31 = vadd.f32 %v8643_v55, %v8641_v15  ;;  %4862 = vmatprep.mubr.f32.mxu1 %v4048_v27  ;;  %5882 = vpow2.f32 %v3290_v36  ;;  %v3012_v49 = vmax.f32 %v2532_v19, %v2804_v48  ;;  %v2932_v38 = vmul.f32 0.17677669, %v2909_v54 }
 0x470   : > { %5884 = vpow2.f32 %v3626_v21  ;;  %v3553_v3 = vmul.f32 %v8589_v42, %v8534_v9  ;;  %v3745_v11 = vmul.f32 %v8615_v44, %v8560_v10  ;;  %v2845_v6 = vpop.xlane.xlu0 %2844  ;;  %v8658_v28 = vpop.eup %5870  ;;  %v3569_v51 = vmul.f32 %v8589_v42, %v8539_v34 }
 0x471   : > { %5886 = vrcp.f32 %v3123_v31  ;;  %v3028_v30 = vsub.f32 %v2532_v19, %v3012_v49  ;;  %v3076_v5 = vsub.f32 %v2804_v48, %v3012_v49  ;;  %v3396_v24 = vmax.f32 %v2660_v4, %v2932_v38 }
 0x472   : > { %v8660_v45 = vpop.eup %5872  ;;  %5888 = vpow2.f32 %v3674_v40  ;;  %v3777_v26 = vmul.f32 %v7471_v39, %v3169_v12  ;;  %v3793_v9 = vmul.f32 %v7500_v37, %v3361_v59  ;;  %v2973_v7 = vpop.xlane.xlu1 %2972  ;;  %v3761_v16 = vmul.f32 %v8615_v44, %v8565_v32 }
 0x473   : > { %v8666_v13 = vpop.eup %5874  ;;  %v3052_v10 = vmul.f32 1.442695, %v3028_v30  ;;  %v3100_v63 = vmul.f32 1.442695, %v3076_v5  ;;  %v3412_v8 = vsub.f32 %v2660_v4, %v3396_v24  ;;  %v3460_v2 = vsub.f32 %v2932_v38, %v3396_v24 }
 0x474   : > { %v3507_v43 = vadd.f32 %v8666_v13, %v8660_v45  ;;  %v3809_v62 = vadd.f32 %v3793_v9, %v3777_v26  ;;  %v3825_v34 = vmul.f32 %v7537_v1, %v3553_v3  ;;  %v2511_v42 = vpop.xlane.xlu0 %2510  ;;  %v3857_v19 = vmul.f32 %v7504_v17, %v3745_v11 }
 0x475   : > { %5890 = vpow2.f32 %v3052_v10  ;;  %v3436_v33 = vmul.f32 1.442695, %v3412_v8  ;;  %v3484_v53 = vmul.f32 1.442695, %v3460_v2  ;;  %v8674_v35 = vpop.eup %5876  ;;  %v3921_v18 = vmul.f32 %v7471_v39, %v8582_v57 }
 0x476   : > { %5892 = vrcp.f32 %v3507_v43  ;;  %v3841_v22 = vadd.f32 %v3825_v34, %v3809_v62  ;;  %v3937_v60 = vmul.f32 %v7500_v37, %v8623_v58  ;;  %v2575_v32 = vpop.xlane.xlu1 %2574  ;;  %v8680_v44 = vpop.eup %5878  ;;  %v2724_v23 = vmul.f32 0.17677669, %v2701_v29 }
 0x477   : > { %5894 = vpow2.f32 %v3100_v63  ;;  %v3969_v25 = vmul.f32 %v7537_v1, %v3569_v51  ;;  %v2868_v36 = vmul.f32 0.17677669, %v2845_v6  ;;  %v2996_v48 = vmul.f32 0.17677669, %v2973_v7  ;;  %v9543_v51 = vld [vmem:[#allocation40_spill] sm:$0xff] }
 0x478   : > { %v8683_v4 = vpop.eup %5880  ;;  %5896 = vpow2.f32 %v3436_v33  ;;  %v3873_v27 = vadd.f32 %v3857_v19, %v3841_v22  ;;  %v3953_v21 = vadd.f32 %v3937_v60, %v3921_v18  ;;  %v2639_v40 = vpop.xlane.xlu0 %2638  ;;  %v8689_v57 = vmul.f32 %v8674_v35, %v8618_v50 }
 0x479   : > { %v8685_v54 = vpop.eup %5882  ;;  %5898 = vpow2.f32 %v3484_v53  ;;  %v4001_v58 = vmul.f32 %v7504_v17, %v3761_v16  ;;  %v3204_v29 = vmax.f32 %v8637_v47, %v2868_v36  ;;  %v3588_v49 = vmax.f32 %v2724_v23, %v2996_v48  ;;  %v9544_v16 = vld [vmem:[#allocation41_spill] sm:$0xff] }
 0x47a   : > { %v8693_v12 = vpop.eup %5884  ;;  %v3315_v59 = vadd.f32 %v8685_v54, %v8683_v4  ;;  %v3985_v31 = vadd.f32 %v3969_v25, %v3953_v21  ;;  %v2533_v38 = vmul.f32 0.17677669, %v2511_v42  ;;  %v2783_v3 = vpop.xlane.xlu1 %2782  ;;  %v8700_v30 = vmul.f32 0.17677669, %v2575_v32 }
 0x47b   : > { %v8697_v11 = vpop.eup %5886  ;;  %v3220_v6 = vsub.f32 %v8637_v47, %v3204_v29  ;;  %v3268_v50 = vsub.f32 %v2868_v36, %v3204_v29  ;;  %v2805_v5 = vmul.f32 0.17677669, %v2783_v3  ;;  %v3889_v26 = vmul.f32 %v3873_v27, %v9543_v51 }
 0x47c   : > { %v8702_v24 = vpop.eup %5888  ;;  %5900 = vrcp.f32 %v3315_v59  ;;  %v4017_v9 = vadd.f32 %v4001_v58, %v3985_v31  ;;  %v3604_v7 = vsub.f32 %v2724_v23, %v3588_v49  ;;  %v2703_v10 = vpop.xlane.xlu0 %2702  ;;  %v3652_v43 = vsub.f32 %v2996_v48, %v3588_v49 }
 0x47d   : > { %v3699_v63 = vadd.f32 %v8702_v24, %v8693_v12  ;;  %v3244_v8 = vmul.f32 1.442695, %v3220_v6  ;;  %v3292_v2 = vmul.f32 1.442695, %v3268_v50  ;;  %v2661_v34 = vmul.f32 0.17677669, %v2639_v40 }
 0x47e   : > { %v4033_v47 = vmul.f32 %v4017_v9, %v9544_v16  ;;  %v3628_v62 = vmul.f32 1.442695, %v3604_v7  ;;  %v3013_v42 = vmax.f32 %v2533_v38, %v2805_v5  ;;  %v2911_v33 = vpop.xlane.xlu1 %2910  ;;  %v8712_v19 = vmul.f32 %v8697_v11, %v8643_v55 }
 0x47f   : > { %v8708_v53 = vpop.eup %5890  ;;  %5902 = vrcp.f32 %v3699_v63  ;;  %v3676_v22 = vmul.f32 1.442695, %v3652_v43  ;;  %v2933_v18 = vmul.f32 0.17677669, %v2911_v33  ;;  %v3170_v48 = vmul.f32 %v8639_v46, %v8574_v61 }
 0x480   : > { %v8714_v60 = vpop.eup %5892  ;;  %v4049_v32 = vadd.f32 %v4033_v47, %v3889_v26  ;;  %5904 = vpow2.f32 %v3244_v8  ;;  %v3029_v23 = vsub.f32 %v2533_v38, %v3013_v42  ;;  %v3077_v25 = vsub.f32 %v2805_v5, %v3013_v42  ;;  %v2847_v36 = vpop.xlane.xlu0 %2846 }
 0x481   : > { %v8716_v27 = vpop.eup %5894  ;;  %5906 = vpow2.f32 %v3292_v2  ;;  %v3397_v21 = vmax.f32 %v2661_v34, %v2933_v18  ;;  %v3362_v55 = vmul.f32 %v8674_v35, %v8611_v0  ;;  %v3554_v59 = vmul.f32 %v8658_v28, %v8599_v14 }
 0x482   : > { %v8722_v40 = vpop.eup %5896  ;;  %v3124_v58 = vadd.f32 %v8716_v27, %v8708_v53  ;;  %4863 = vmatmul.mubr.f32.gmra.mrb[84].mxu1 %v4049_v32  ;;  %5908 = vpow2.f32 %v3628_v62  ;;  %v3054_v29 = vmul.f32 1.442695, %v3029_v23  ;;  %v2975_v31 = vpop.xlane.xlu1 %2974  ;;  %v3102_v38 = vmul.f32 1.442695, %v3077_v25 }
 0x483   : > { %v8728_v49 = vpop.eup %5898  ;;  %5910 = vpow2.f32 %v3676_v22  ;;  %v3413_v61 = vsub.f32 %v2661_v34, %v3397_v21  ;;  %v3461_v46 = vsub.f32 %v2933_v18, %v3397_v21  ;;  %v3570_v35 = vmul.f32 %v8658_v28, %v8604_v20 }
 0x484   : > { %5912 = vrcp.f32 %v3124_v58  ;;  %v3508_v0 = vadd.f32 %v8728_v49, %v8722_v40  ;;  %v3746_v3 = vmul.f32 %v8680_v44, %v8620_v52  ;;  %v2513_v6 = vpop.xlane.xlu0 %2512  ;;  %v2725_v14 = vmul.f32 0.17677669, %v2703_v10 }
 0x485   : > { %5914 = vpow2.f32 %v3054_v29  ;;  %v3438_v50 = vmul.f32 1.442695, %v3413_v61  ;;  %v3486_v5 = vmul.f32 1.442695, %v3461_v46  ;;  %v3762_v26 = vmul.f32 %v8680_v44, %v8628_v41 }
 0x486   : > { %v5901_v51 = vpop.eup %5900  ;;  %5916 = vrcp.f32 %v3508_v0  ;;  %v3778_v9 = vmul.f32 %v7471_v39, %v3170_v48  ;;  %v3794_v7 = vmul.f32 %v7500_v37, %v3362_v55  ;;  %v2577_v63 = vpop.xlane.xlu1 %2576  ;;  %v3826_v20 = vmul.f32 %v7537_v1, %v3554_v59 }
 0x487   : > { %5918 = vpow2.f32 %v3102_v38  ;;  %v3922_v52 = vmul.f32 %v7471_v39, %v8652_v56  ;;  %v3938_v28 = vmul.f32 %v7500_v37, %v8689_v57  ;;  %v3858_v8 = vmul.f32 %v7504_v17, %v3746_v3 }
 0x488   : > { %5920 = vpow2.f32 %v3438_v50  ;;  %v3810_v10 = vadd.f32 %v3794_v7, %v3778_v9  ;;  %v3970_v41 = vmul.f32 %v7537_v1, %v3570_v35  ;;  %v2641_v44 = vpop.xlane.xlu0 %2640  ;;  %v2869_v16 = vmul.f32 0.17677669, %v2847_v36  ;;  %v9545_v35 = vld [vmem:[#allocation42_spill] sm:$0xff] }
 0x489   : > { %v8747_v2 = vpop.eup %5902  ;;  %5922 = vpow2.f32 %v3486_v5  ;;  %v3954_v43 = vadd.f32 %v3938_v28, %v3922_v52  ;;  %v2997_v47 = vmul.f32 0.17677669, %v2975_v31  ;;  %v8752_v56 = vmul.f32 %v5901_v51, %v8685_v54 }
 0x48a   : > { %v8749_v62 = vpop.eup %5904  ;;  %v3842_v34 = vadd.f32 %v3826_v20, %v3810_v10  ;;  %v4002_v57 = vmul.f32 %v7504_v17, %v3762_v26  ;;  %v2534_v42 = vmul.f32 0.17677669, %v2513_v6  ;;  %v2785_v33 = vpop.xlane.xlu1 %2784  ;;  %v3205_v32 = vmax.f32 %v8700_v30, %v2869_v16  ;;  %v9546_v26 = vld [vmem:[#allocation43_spill] sm:$0xff] }
 0x48b   : > { %v8755_v22 = vpop.eup %5906  ;;  %v3986_v18 = vadd.f32 %v3970_v41, %v3954_v43  ;;  %v3589_v23 = vmax.f32 %v2725_v14, %v2997_v47  ;;  %v8758_v25 = vmul.f32 0.17677669, %v2577_v63  ;;  %v2662_v48 = vmul.f32 0.17677669, %v2641_v44 }
 0x48c   : > { %v8760_v36 = vpop.eup %5908  ;;  %v3316_v21 = vadd.f32 %v8755_v22, %v8749_v62  ;;  %v3874_v54 = vadd.f32 %v3858_v8, %v3842_v34  ;;  %v2806_v55 = vmul.f32 0.17677669, %v2785_v33  ;;  %v2705_v58 = vpop.xlane.xlu0 %2704  ;;  %v3221_v31 = vsub.f32 %v8700_v30, %v3205_v32 }
 0x48d   : > { %v8764_v29 = vpop.eup %5910  ;;  %v4018_v59 = vadd.f32 %v4002_v57, %v3986_v18  ;;  %v3269_v38 = vsub.f32 %v2869_v16, %v3205_v32  ;;  %v3605_v61 = vsub.f32 %v2725_v14, %v3589_v23  ;;  %v3653_v6 = vsub.f32 %v2997_v47, %v3589_v23 }
 0x48e   : > { %v8767_v46 = vpop.eup %5912  ;;  %5924 = vrcp.f32 %v3316_v21  ;;  %v3700_v0 = vadd.f32 %v8764_v29, %v8760_v36  ;;  %v3890_v3 = vmul.f32 %v3874_v54, %v9545_v35  ;;  %v2913_v50 = vpop.xlane.xlu1 %2912  ;;  %v3246_v7 = vmul.f32 1.442695, %v3221_v31 }
 0x48f   : > { %v8772_v5 = vpop.eup %5914  ;;  %v4034_v9 = vmul.f32 %v4018_v59, %v9546_v26  ;;  %v3294_v63 = vmul.f32 1.442695, %v3269_v38  ;;  %v3171_v30 = vmul.f32 %v8697_v11, %v8641_v15  ;;  %v3630_v20 = vmul.f32 1.442695, %v3605_v61 }
 0x490   : > { %v8777_v14 = vpop.eup %5916  ;;  %5926 = vrcp.f32 %v3700_v0  ;;  %v3014_v52 = vmax.f32 %v2534_v42, %v2806_v55  ;;  %v3363_v28 = vmul.f32 %v5901_v51, %v8683_v4  ;;  %v2849_v10 = vpop.xlane.xlu0 %2848  ;;  %v3678_v44 = vmul.f32 1.442695, %v3653_v6 }
 0x491   : > { %v8780_v8 = vpop.eup %5918  ;;  %v4050_v41 = vadd.f32 %v4034_v9, %v3890_v3  ;;  %5928 = vpow2.f32 %v3246_v7  ;;  %v2934_v43 = vmul.f32 0.17677669, %v2913_v50  ;;  %v8790_v4 = vmul.f32 %v8767_v46, %v8716_v27 }
 0x492   : > { %v8782_v16 = vpop.eup %5920  ;;  %v3125_v47 = vadd.f32 %v8780_v8, %v8772_v5  ;;  %5930 = vpow2.f32 %v3294_v63  ;;  %v3030_v15 = vsub.f32 %v2534_v42, %v3014_v52  ;;  %v3078_v11 = vsub.f32 %v2806_v55, %v3014_v52  ;;  %v2977_v34 = vpop.xlane.xlu1 %2976 }
 0x493   : > { %v8786_v57 = vpop.eup %5922  ;;  %4865 = vmatprep.mubr.f32.mxu1 %v4050_v41  ;;  %5932 = vpow2.f32 %v3630_v20  ;;  %v3398_v51 = vmax.f32 %v2662_v48, %v2934_v43  ;;  %v3555_v33 = vmul.f32 %v8714_v60, %v8660_v45  ;;  %v3747_v27 = vmul.f32 %v8747_v2, %v8693_v12 }
 0x494   : > { %5934 = vrcp.f32 %v3125_v47  ;;  %v3509_v18 = vadd.f32 %v8786_v57, %v8782_v16  ;;  %v3056_v32 = vmul.f32 1.442695, %v3030_v15  ;;  %v3104_v42 = vmul.f32 1.442695, %v3078_v11  ;;  %v2515_v23 = vpop.xlane.xlu0 %2514 }
 0x495   : > { %5936 = vpow2.f32 %v3678_v44  ;;  %v3414_v21 = vsub.f32 %v2662_v48, %v3398_v51  ;;  %v3462_v54 = vsub.f32 %v2934_v43, %v3398_v51  ;;  %v3571_v55 = vmul.f32 %v8714_v60, %v8666_v13 }
 0x496   : > { %5938 = vrcp.f32 %v3509_v18  ;;  %v3779_v59 = vmul.f32 %v7471_v39, %v3171_v30  ;;  %v3795_v45 = vmul.f32 %v7500_v37, %v3363_v28  ;;  %v2579_v31 = vpop.xlane.xlu1 %2578  ;;  %v3763_v0 = vmul.f32 %v8747_v2, %v8702_v24 }
 0x497   : > { %5940 = vpow2.f32 %v3056_v32  ;;  %v3440_v38 = vmul.f32 1.442695, %v3414_v21  ;;  %v3488_v61 = vmul.f32 1.442695, %v3462_v54  ;;  %v2726_v35 = vmul.f32 0.17677669, %v2705_v58 }
 0x498   : > { %v8804_v48 = vpop.eup %5924  ;;  %5942 = vpow2.f32 %v3104_v42  ;;  %v3811_v12 = vadd.f32 %v3795_v45, %v3779_v59  ;;  %v3827_v3 = vmul.f32 %v7537_v1, %v3555_v33  ;;  %v2643_v6 = vpop.xlane.xlu0 %2642  ;;  %v3859_v13 = vmul.f32 %v7504_v17, %v3747_v27  ;;  %v9547_v21 = vld [vmem:[#allocation44_spill] sm:$0xff] }
 0x499   : > { %5944 = vpow2.f32 %v3440_v38  ;;  %v3923_v60 = vmul.f32 %v7471_v39, %v8712_v19  ;;  %v3939_v50 = vmul.f32 %v7500_v37, %v8752_v56  ;;  %v8816_v24 = vmul.f32 %v8804_v48, %v8755_v22 }
 0x49a   : > { %v8812_v26 = vpop.eup %5926  ;;  %5946 = vpow2.f32 %v3488_v61  ;;  %v3843_v2 = vadd.f32 %v3827_v3, %v3811_v12  ;;  %v2870_v58 = vmul.f32 0.17677669, %v2849_v10  ;;  %v2787_v9 = vpop.xlane.xlu1 %2786  ;;  %v3971_v30 = vmul.f32 %v7537_v1, %v3571_v55  ;;  %v9548_v12 = vld [vmem:[#allocation45_spill] sm:$0xff] }
 0x49b   : > { %v8818_v7 = vpop.eup %5928  ;;  %v3955_v63 = vadd.f32 %v3939_v50, %v3923_v60  ;;  %v4003_v19 = vmul.f32 %v7504_v17, %v3763_v0  ;;  %v2998_v20 = vmul.f32 0.17677669, %v2977_v34  ;;  %v2535_v41 = vmul.f32 0.17677669, %v2515_v23 }
 0x49c   : > { %v8822_v52 = vpop.eup %5930  ;;  %v3875_v56 = vadd.f32 %v3859_v13, %v3843_v2  ;;  %v3206_v28 = vmax.f32 %v8758_v25, %v2870_v58  ;;  %v2807_v22 = vmul.f32 0.17677669, %v2787_v9  ;;  %v2707_v44 = vpop.xlane.xlu0 %2706  ;;  %v8829_v11 = vmul.f32 0.17677669, %v2579_v31 }
 0x49d   : > { %v8825_v43 = vpop.eup %5932  ;;  %v3317_v10 = vadd.f32 %v8822_v52, %v8818_v7  ;;  %v3987_v47 = vadd.f32 %v3971_v30, %v3955_v63  ;;  %v3590_v15 = vmax.f32 %v2726_v35, %v2998_v20  ;;  %v2663_v18 = vmul.f32 0.17677669, %v2643_v6 }
 0x49e   : > { %v8831_v51 = vpop.eup %5934  ;;  %v3222_v34 = vsub.f32 %v8758_v25, %v3206_v28  ;;  %v3270_v33 = vsub.f32 %v2870_v58, %v3206_v28  ;;  %v3015_v32 = vmax.f32 %v2535_v41, %v2807_v22  ;;  %v2915_v42 = vpop.xlane.xlu1 %2914  ;;  %v3891_v54 = vmul.f32 %v3875_v56, %v9547_v21 }
 0x49f   : > { %v8834_v23 = vpop.eup %5936  ;;  %5948 = vrcp.f32 %v3317_v10  ;;  %v4019_v27 = vadd.f32 %v4003_v19, %v3987_v47  ;;  %v3606_v55 = vsub.f32 %v2726_v35, %v3590_v15  ;;  %v3654_v61 = vsub.f32 %v2998_v20, %v3590_v15 }
 0x4a0   : > { %v8837_v59 = vpop.eup %5938  ;;  %v3701_v45 = vadd.f32 %v8834_v23, %v8825_v43  ;;  %v3248_v31 = vmul.f32 1.442695, %v3222_v34  ;;  %v3296_v38 = vmul.f32 1.442695, %v3270_v33  ;;  %v2851_v25 = vpop.xlane.xlu0 %2850  ;;  %v3031_v6 = vsub.f32 %v2535_v41, %v3015_v32 }
 0x4a1   : > { %v8841_v0 = vpop.eup %5940  ;;  %v4035_v3 = vmul.f32 %v4019_v27, %v9548_v12  ;;  %v3079_v13 = vsub.f32 %v2807_v22, %v3015_v32  ;;  %v8844_v60 = vmul.f32 0.17677669, %v2707_v44  ;;  %v3632_v35 = vmul.f32 1.442695, %v3606_v55 }
 0x4a2   : > { %v8846_v50 = vpop.eup %5942  ;;  %5950 = vrcp.f32 %v3701_v45  ;;  %v3680_v2 = vmul.f32 1.442695, %v3654_v61  ;;  %v2935_v58 = vmul.f32 0.17677669, %v2915_v42  ;;  %v2979_v9 = vpop.xlane.xlu1 %2978  ;;  %v3172_v20 = vmul.f32 %v8767_v46, %v8708_v53 }
 0x4a3   : > { %v8848_v63 = vpop.eup %5944  ;;  %v3126_v30 = vadd.f32 %v8846_v50, %v8841_v0  ;;  %v4051_v19 = vadd.f32 %v4035_v3, %v3891_v54  ;;  %5952 = vpow2.f32 %v3248_v31  ;;  %v3058_v28 = vmul.f32 1.442695, %v3031_v6 }
 0x4a4   : > { %v8854_v56 = vpop.eup %5946  ;;  %5954 = vpow2.f32 %v3296_v38  ;;  %v3399_v41 = vmax.f32 %v2663_v18, %v2935_v58  ;;  %v3364_v22 = vmul.f32 %v8804_v48, %v8749_v62  ;;  %v2517_v44 = vpop.xlane.xlu0 %2516  ;;  %v3106_v47 = vmul.f32 1.442695, %v3079_v13 }
 0x4a5   : > { %5956 = vrcp.f32 %v3126_v30  ;;  %v3510_v10 = vadd.f32 %v8854_v56, %v8848_v63  ;;  %4866 = vmatmul.mubr.f32.gmra.mrb[86].mxu1 %v4051_v19  ;;  %v3556_v15 = vmul.f32 %v8777_v14, %v8722_v40  ;;  %v3748_v34 = vmul.f32 %v8812_v26, %v8760_v36 }
 0x4a6   : > { %5958 = vpow2.f32 %v3632_v35  ;;  %v3415_v53 = vsub.f32 %v2663_v18, %v3399_v41  ;;  %v3463_v46 = vsub.f32 %v2935_v58, %v3399_v41  ;;  %v2581_v33 = vpop.xlane.xlu1 %2580  ;;  %v8866_v62 = vmul.f32 %v8831_v51, %v8780_v8 }
 0x4a7   : > { %5960 = vrcp.f32 %v3510_v10  ;;  %v3780_v48 = vmul.f32 %v7471_v39, %v3172_v20  ;;  %v3796_v32 = vmul.f32 %v7500_v37, %v3364_v22  ;;  %v3572_v40 = vmul.f32 %v8777_v14, %v8728_v49 }
 0x4a8   : > { %5962 = vpow2.f32 %v3680_v2  ;;  %v3442_v42 = vmul.f32 1.442695, %v3415_v53  ;;  %v3490_v21 = vmul.f32 1.442695, %v3463_v46  ;;  %v2645_v18 = vpop.xlane.xlu0 %2644  ;;  %v3764_v36 = vmul.f32 %v8812_v26, %v8764_v29 }
 0x4a9   : > { %v8872_v54 = vpop.eup %5948  ;;  %5964 = vpow2.f32 %v3058_v28  ;;  %v3812_v8 = vadd.f32 %v3796_v32, %v3780_v48  ;;  %v3828_v27 = vmul.f32 %v7537_v1, %v3556_v15  ;;  %v3860_v55 = vmul.f32 %v7504_v17, %v3748_v34 }
 0x4aa   : > { %5966 = vpow2.f32 %v3106_v47  ;;  %v3924_v45 = vmul.f32 %v7471_v39, %v8790_v4  ;;  %v3940_v31 = vmul.f32 %v7500_v37, %v8816_v24  ;;  %v2789_v49 = vpop.xlane.xlu1 %2788  ;;  %v8884_v14 = vmul.f32 %v8872_v54, %v8822_v52 }
 0x4ab   : > { %5968 = vpow2.f32 %v3442_v42  ;;  %v3844_v38 = vadd.f32 %v3828_v27, %v3812_v8  ;;  %v2871_v29 = vmul.f32 0.17677669, %v2851_v25  ;;  %v3972_v12 = vmul.f32 %v7537_v1, %v3572_v40 }
 0x4ac   : > { %v8886_v26 = vpop.eup %5950  ;;  %5970 = vpow2.f32 %v3490_v21  ;;  %v3956_v61 = vadd.f32 %v3940_v31, %v3924_v45  ;;  %v2999_v3 = vmul.f32 0.17677669, %v2979_v9  ;;  %v2709_v6 = vpop.xlane.xlu0 %2708  ;;  %v4004_v24 = vmul.f32 %v7504_v17, %v3764_v36 }
 0x4ad   : > { %v8889_v4 = vpop.eup %5952  ;;  %v3876_v13 = vadd.f32 %v3860_v55, %v3844_v38  ;;  %v3207_v35 = vmax.f32 %v8829_v11, %v2871_v29  ;;  %v2536_v52 = vmul.f32 0.17677669, %v2517_v44  ;;  %v8896_v30 = vmul.f32 0.17677669, %v2581_v33  ;;  %v9549_v44 = vld [vmem:[#allocation46_spill] sm:$0xff] }
 0x4ae   : > { %v8893_v2 = vpop.eup %5954  ;;  %v3988_v58 = vadd.f32 %v3972_v12, %v3956_v61  ;;  %v3591_v25 = vmax.f32 %v8844_v60, %v2999_v3  ;;  %v2808_v19 = vmul.f32 0.17677669, %v2789_v49  ;;  %v2917_v20 = vpop.xlane.xlu1 %2916  ;;  %v2664_v10 = vmul.f32 0.17677669, %v2645_v18 }
 0x4af   : > { %v8898_v28 = vpop.eup %5956  ;;  %v3318_v9 = vadd.f32 %v8893_v2, %v8889_v4  ;;  %v3223_v41 = vsub.f32 %v8829_v11, %v3207_v35  ;;  %v3271_v22 = vsub.f32 %v2871_v29, %v3207_v35  ;;  %v3892_v15 = vmul.f32 %v3876_v13, %v9549_v44  ;;  %v9550_v11 = vld [vmem:[#allocation47_spill] sm:$0xff] }
 0x4b0   : > { %v8903_v47 = vpop.eup %5958  ;;  %v4020_v53 = vadd.f32 %v4004_v24, %v3988_v58  ;;  %v3607_v46 = vsub.f32 %v8844_v60, %v3591_v25  ;;  %v3655_v34 = vsub.f32 %v2999_v3, %v3591_v25  ;;  %v2853_v33 = vpop.xlane.xlu0 %2852  ;;  %v3016_v21 = vmax.f32 %v2536_v52, %v2808_v19 }
 0x4b1   : > { %v8907_v48 = vpop.eup %5960  ;;  %5972 = vrcp.f32 %v3318_v9  ;;  %v3250_v32 = vmul.f32 1.442695, %v3223_v41  ;;  %v3298_v42 = vmul.f32 1.442695, %v3271_v22  ;;  %v8912_v8 = vmul.f32 0.17677669, %v2709_v6 }
 0x4b2   : > { %v8909_v40 = vpop.eup %5962  ;;  %v4036_v36 = vmul.f32 %v4020_v53, %v9550_v11  ;;  %v3634_v18 = vmul.f32 1.442695, %v3607_v46  ;;  %v2936_v27 = vmul.f32 0.17677669, %v2917_v20  ;;  %v2981_v55 = vpop.xlane.xlu1 %2980  ;;  %v3032_v31 = vsub.f32 %v2536_v52, %v3016_v21 }
 0x4b3   : > { %v8914_v45 = vpop.eup %5964  ;;  %v3702_v60 = vadd.f32 %v8909_v40, %v8903_v47  ;;  %5974 = vpow2.f32 %v3250_v32  ;;  %v3080_v49 = vsub.f32 %v2808_v19, %v3016_v21  ;;  %v3682_v61 = vmul.f32 1.442695, %v3655_v34 }
 0x4b4   : > { %v8918_v38 = vpop.eup %5966  ;;  %v4052_v29 = vadd.f32 %v4036_v36, %v3892_v15  ;;  %5976 = vpow2.f32 %v3298_v42  ;;  %v3400_v12 = vmax.f32 %v2664_v10, %v2936_v27  ;;  %v2519_v3 = vpop.xlane.xlu0 %2518  ;;  %v3060_v24 = vmul.f32 1.442695, %v3032_v31 }
 0x4b5   : > { %v8920_v13 = vpop.eup %5968  ;;  %5978 = vrcp.f32 %v3702_v60  ;;  %v3127_v6 = vadd.f32 %v8918_v38, %v8914_v45  ;;  %v3173_v35 = vmul.f32 %v8831_v51, %v8772_v5  ;;  %v3365_v19 = vmul.f32 %v8872_v54, %v8818_v7 }
 0x4b6   : > { %v8926_v58 = vpop.eup %5970  ;;  %4868 = vmatprep.mubr.f32.mxu1 %v4052_v29  ;;  %5980 = vpow2.f32 %v3634_v18  ;;  %v3416_v52 = vsub.f32 %v2664_v10, %v3400_v12  ;;  %v3464_v25 = vsub.f32 %v2936_v27, %v3400_v12  ;;  %v2583_v20 = vpop.xlane.xlu1 %2582  ;;  %v3108_v41 = vmul.f32 1.442695, %v3080_v49 }
 0x4b7   : > { %5982 = vrcp.f32 %v3127_v6  ;;  %v3511_v9 = vadd.f32 %v8926_v58, %v8920_v13  ;;  %v3557_v22 = vmul.f32 %v8837_v59, %v8782_v16  ;;  %v3573_v51 = vmul.f32 %v8837_v59, %v8786_v57 }
 0x4b8   : > { %5984 = vpow2.f32 %v3682_v61  ;;  %v3444_v5 = vmul.f32 1.442695, %v3416_v52  ;;  %v3749_v10 = vmul.f32 %v8886_v26, %v8825_v43  ;;  %v2647_v44 = vpop.xlane.xlu0 %2646  ;;  %v3492_v7 = vmul.f32 1.442695, %v3464_v25 }
 0x4b9   : > { %5986 = vrcp.f32 %v3511_v9  ;;  %v3781_v54 = vmul.f32 %v7471_v39, %v3173_v35  ;;  %v3797_v15 = vmul.f32 %v7500_v37, %v3365_v19  ;;  %v8942_v53 = vmul.f32 %v8898_v28, %v8846_v50  ;;  %v9551_v19 = vld [vmem:[#allocation48_spill] sm:$0xff] }
 0x4ba   : > { %5988 = vpow2.f32 %v3060_v24  ;;  %v3765_v16 = vmul.f32 %v8886_v26, %v8834_v23  ;;  %v3829_v57 = vmul.f32 %v7537_v1, %v3557_v22  ;;  %v2791_v59 = vpop.xlane.xlu1 %2790  ;;  %v3925_v34 = vmul.f32 %v7471_v39, %v8866_v62 }
 0x4bb   : > { %v8947_v46 = vpop.eup %5972  ;;  %5990 = vpow2.f32 %v3108_v41  ;;  %v3813_v43 = vadd.f32 %v3797_v15, %v3781_v54  ;;  %v3941_v32 = vmul.f32 %v7500_v37, %v8884_v14  ;;  %v3861_v50 = vmul.f32 %v7504_v17, %v3749_v10 }
 0x4bc   : > { %5992 = vpow2.f32 %v3444_v5  ;;  %v3973_v42 = vmul.f32 %v7537_v1, %v3573_v51  ;;  %v2872_v21 = vmul.f32 0.17677669, %v2853_v33  ;;  %v8955_v23 = vpop.xlane.xlu0 %2710  ;;  %v3000_v18 = vmul.f32 0.17677669, %v2981_v55 }
 0x4bd   : > { %v8957_v26 = vpop.eup %5974  ;;  %5994 = vpow2.f32 %v3492_v7  ;;  %v3845_v11 = vadd.f32 %v3829_v57, %v3813_v43  ;;  %v3957_v36 = vadd.f32 %v3941_v32, %v3925_v34  ;;  %v8963_v62 = vmul.f32 %v8947_v46, %v8893_v2 }
 0x4be   : > { %v8959_v27 = vpop.eup %5976  ;;  %v4005_v14 = vmul.f32 %v7504_v17, %v3765_v16  ;;  %v3208_v60 = vmax.f32 %v8896_v30, %v2872_v21  ;;  %v2537_v31 = vmul.f32 0.17677669, %v2519_v3  ;;  %v2919_v33 = vpop.xlane.xlu1 %2918  ;;  %v3592_v55 = vmax.f32 %v8912_v8, %v3000_v18  ;;  %v9552_v16 = vld [vmem:[#allocation49_spill] sm:$0xff] }
 0x4bf   : > { %v8967_v49 = vpop.eup %5978  ;;  %v3319_v29 = vadd.f32 %v8959_v27, %v8957_v26  ;;  %v3877_v61 = vadd.f32 %v3861_v50, %v3845_v11  ;;  %v3989_v12 = vadd.f32 %v3973_v42, %v3957_v36  ;;  %v8975_v35 = vmul.f32 0.17677669, %v2583_v20 }
 0x4c0   : > { %v8972_v6 = vpop.eup %5980  ;;  %v3224_v2 = vsub.f32 %v8896_v30, %v3208_v60  ;;  %v3272_v24 = vsub.f32 %v2872_v21, %v3208_v60  ;;  %v2809_v52 = vmul.f32 0.17677669, %v2791_v59  ;;  %v8977_v25 = vpop.xlane.xlu0 %2854  ;;  %v3608_v22 = vsub.f32 %v8912_v8, %v3592_v55 }
 0x4c1   : > { %v8979_v3 = vpop.eup %5982  ;;  %v3893_v9 = vmul.f32 %v3877_v61, %v9551_v19  ;;  %v4021_v41 = vadd.f32 %v4005_v14, %v3989_v12  ;;  %v2665_v5 = vmul.f32 0.17677669, %v2647_v44  ;;  %5996 = vrcp.f32 %v3319_v29 }
 0x4c2   : > { %v8983_v51 = vpop.eup %5984  ;;  %v3252_v10 = vmul.f32 1.442695, %v3224_v2  ;;  %v3300_v7 = vmul.f32 1.442695, %v3272_v24  ;;  %v3656_v30 = vsub.f32 %v3000_v18, %v3592_v55  ;;  %v2983_v54 = vpop.xlane.xlu1 %2982  ;;  %v3636_v59 = vmul.f32 1.442695, %v3608_v22 }
 0x4c3   : > { %v8985_v20 = vpop.eup %5986  ;;  %v3703_v15 = vadd.f32 %v8983_v51, %v8972_v6  ;;  %v4037_v57 = vmul.f32 %v4021_v41, %v9552_v16  ;;  %v3017_v43 = vmax.f32 %v2537_v31, %v2809_v52  ;;  %v2937_v44 = vmul.f32 0.17677669, %v2919_v33 }
 0x4c4   : > { %v8990_v34 = vpop.eup %5988  ;;  %5998 = vpow2.f32 %v3252_v10  ;;  %v3684_v8 = vmul.f32 1.442695, %v3656_v30  ;;  %v3174_v32 = vmul.f32 %v8898_v28, %v8841_v0  ;;  %v2521_v50 = vpop.xlane.xlu0 %2520  ;;  %v3366_v33 = vmul.f32 %v8947_v46, %v8889_v4 }
 0x4c5   : > { %v8994_v42 = vpop.eup %5990  ;;  %6000 = vrcp.f32 %v3703_v15  ;;  %v4053_v21 = vadd.f32 %v4037_v57, %v3893_v9  ;;  %v3033_v11 = vsub.f32 %v2537_v31, %v3017_v43  ;;  %v3081_v36 = vsub.f32 %v2809_v52, %v3017_v43 }
 0x4c6   : > { %v8996_v18 = vpop.eup %5992  ;;  %v3128_v14 = vadd.f32 %v8994_v42, %v8990_v34  ;;  %6002 = vpow2.f32 %v3300_v7  ;;  %v3401_v60 = vmax.f32 %v2665_v5, %v2937_v44  ;;  %v2585_v29 = vpop.xlane.xlu1 %2584  ;;  %v3558_v31 = vmul.f32 %v8907_v48, %v8848_v63 }
 0x4c7   : > { %v9002_v61 = vpop.eup %5994  ;;  %4869 = vmatmul.mubr.f32.gmra.mrb[88].mxu1 %v4053_v21  ;;  %6004 = vpow2.f32 %v3636_v59  ;;  %v3062_v0 = vmul.f32 1.442695, %v3033_v11  ;;  %v3110_v28 = vmul.f32 1.442695, %v3081_v36  ;;  %v9009_v4 = vmul.f32 0.17677669, %v8955_v23 }
 0x4c8   : > { %6006 = vrcp.f32 %v3128_v14  ;;  %v3512_v12 = vadd.f32 %v9002_v61, %v8996_v18  ;;  %v3417_v55 = vsub.f32 %v2665_v5, %v3401_v60  ;;  %v3465_v2 = vsub.f32 %v2937_v44, %v3401_v60  ;;  %v2649_v24 = vpop.xlane.xlu0 %2648 }
 0x4c9   : > { %6008 = vpow2.f32 %v3684_v8  ;;  %v3574_v46 = vmul.f32 %v8907_v48, %v8854_v56  ;;  %v3750_v52 = vmul.f32 %v8967_v49, %v8903_v47  ;;  %v9017_v63 = vmul.f32 %v8979_v3, %v8918_v38 }
 0x4ca   : > { %6010 = vrcp.f32 %v3512_v12  ;;  %v3446_v19 = vmul.f32 1.442695, %v3417_v55  ;;  %v3494_v9 = vmul.f32 1.442695, %v3465_v2  ;;  %v2793_v41 = vpop.xlane.xlu1 %2792  ;;  %v3766_v22 = vmul.f32 %v8967_v49, %v8909_v40 }
 0x4cb   : > { %6012 = vpow2.f32 %v3062_v0  ;;  %v3782_v23 = vmul.f32 %v7471_v39, %v3174_v32  ;;  %v3798_v5 = vmul.f32 %v7500_v37, %v3366_v33  ;;  %v9023_v56 = vpop.eup %5996  ;;  %v3830_v47 = vmul.f32 %v7537_v1, %v3558_v31 }
 0x4cc   : > { %6014 = vpow2.f32 %v3110_v28  ;;  %v3926_v48 = vmul.f32 %v7471_v39, %v8942_v53  ;;  %v3942_v38 = vmul.f32 %v7500_v37, %v8963_v62  ;;  %v2713_v10 = vpop.xlane.xlu0 %2712  ;;  %v3862_v40 = vmul.f32 %v7504_v17, %v3750_v52 }
 0x4cd   : > { %6016 = vpow2.f32 %v3446_v19  ;;  %v3814_v7 = vadd.f32 %v3798_v5, %v3782_v23  ;;  %v3974_v49 = vmul.f32 %v7537_v1, %v3574_v46  ;;  %v2873_v16 = vmul.f32 0.17677669, %v8977_v25  ;;  %v9553_v46 = vld [vmem:[#allocation50_spill] sm:$0xff]  ;;  %v9554_v5 = vld [vmem:[#allocation51_spill] sm:$0xff] }
 0x4ce   : > { %v9032_v30 = vpop.eup %5998  ;;  %6018 = vpow2.f32 %v3494_v9  ;;  %v3958_v15 = vadd.f32 %v3942_v38, %v3926_v48  ;;  %v3001_v57 = vmul.f32 0.17677669, %v2983_v54  ;;  %v2921_v59 = vpop.xlane.xlu1 %2920  ;;  %v9039_v53 = vmul.f32 %v9023_v56, %v8959_v27 }
 0x4cf   : > { %v9035_v43 = vpop.eup %6000  ;;  %v3846_v62 = vadd.f32 %v3830_v47, %v3814_v7  ;;  %v4006_v8 = vmul.f32 %v7504_v17, %v3766_v22  ;;  %v2538_v44 = vmul.f32 0.17677669, %v2521_v50  ;;  %v3209_v11 = vmax.f32 %v8975_v35, %v2873_v16 }
 0x4d0   : > { %v9042_v32 = vpop.eup %6002  ;;  %v3990_v21 = vadd.f32 %v3974_v49, %v3958_v15  ;;  %v3593_v36 = vmax.f32 %v9009_v4, %v3001_v57  ;;  %v9046_v25 = vmul.f32 0.17677669, %v2585_v29  ;;  %v9048_v54 = vpop.xlane.xlu0 %2856  ;;  %v2810_v33 = vmul.f32 0.17677669, %v2793_v41 }
 0x4d1   : > { %v9050_v14 = vpop.eup %6004  ;;  %v3320_v27 = vadd.f32 %v9042_v32, %v9032_v30  ;;  %v3878_v60 = vadd.f32 %v3862_v40, %v3846_v62  ;;  %v2938_v0 = vmul.f32 0.17677669, %v2921_v59  ;;  %v3225_v31 = vsub.f32 %v8975_v35, %v3209_v11 }
 0x4d2   : > { %v9054_v50 = vpop.eup %6006  ;;  %v4022_v28 = vadd.f32 %v4006_v8, %v3990_v21  ;;  %v3273_v12 = vsub.f32 %v2873_v16, %v3209_v11  ;;  %v3609_v55 = vsub.f32 %v9009_v4, %v3593_v36  ;;  %v9058_v29 = vpop.xlane.xlu1 %2984  ;;  %v3657_v19 = vsub.f32 %v3001_v57, %v3593_v36 }
 0x4d3   : > { %v9060_v2 = vpop.eup %6008  ;;  %v3894_v52 = vmul.f32 %v3878_v60, %v9553_v46  ;;  %v2666_v9 = vmul.f32 0.17677669, %v2649_v24  ;;  %v9063_v22 = vmul.f32 0.17677669, %v2713_v10  ;;  %v3254_v47 = vmul.f32 1.442695, %v3225_v31 }
 0x4d4   : > { %v9065_v41 = vpop.eup %6010  ;;  %v3704_v23 = vadd.f32 %v9060_v2, %v9050_v14  ;;  %v4038_v35 = vmul.f32 %v4022_v28, %v9554_v5  ;;  %v3302_v48 = vmul.f32 1.442695, %v3273_v12  ;;  %v2523_v4 = vpop.xlane.xlu0 %2522  ;;  %6020 = vrcp.f32 %v3320_v27 }
 0x4d5   : > { %v9070_v38 = vpop.eup %6012  ;;  %v3638_v7 = vmul.f32 1.442695, %v3609_v55  ;;  %v3018_v40 = vmax.f32 %v2538_v44, %v2810_v33  ;;  %v3402_v49 = vmax.f32 %v2666_v9, %v2938_v0  ;;  %v3686_v10 = vmul.f32 1.442695, %v3657_v19 }
 0x4d6   : > { %v9072_v15 = vpop.eup %6014  ;;  %6022 = vrcp.f32 %v3704_v23  ;;  %v4054_v24 = vadd.f32 %v4038_v35, %v3894_v52  ;;  %v3175_v16 = vmul.f32 %v8979_v3, %v8914_v45  ;;  %v2587_v57 = vpop.xlane.xlu1 %2586  ;;  %v3367_v60 = vmul.f32 %v9023_v56, %v8957_v26 }
 0x4d7   : > { %v9076_v59 = vpop.eup %6016  ;;  %v3129_v62 = vadd.f32 %v9072_v15, %v9070_v38  ;;  %6024 = vpow2.f32 %v3254_v47  ;;  %v3034_v8 = vsub.f32 %v2538_v44, %v3018_v40  ;;  %v3082_v21 = vsub.f32 %v2810_v33, %v3018_v40 }
 0x4d8   : > { %v9080_v11 = vpop.eup %6018  ;;  %4871 = vmatprep.mubr.f32.mxu1 %v4054_v24  ;;  %6026 = vpow2.f32 %v3302_v48  ;;  %v3418_v36 = vsub.f32 %v2666_v9, %v3402_v49  ;;  %v3466_v27 = vsub.f32 %v2938_v0, %v3402_v49  ;;  %v3559_v28 = vmul.f32 %v8985_v20, %v8920_v13  ;;  %v2651_v31 = vpop.xlane.xlu0 %2650 }
 0x4d9   : > { %6028 = vrcp.f32 %v3129_v62  ;;  %v3513_v45 = vadd.f32 %v9080_v11, %v9076_v59  ;;  %v3064_v3 = vmul.f32 1.442695, %v3034_v8  ;;  %v9090_v44 = vmul.f32 %v9054_v50, %v8994_v42 }
 0x4da   : > { %6030 = vpow2.f32 %v3638_v7  ;;  %v3112_v33 = vmul.f32 1.442695, %v3082_v21  ;;  %v3575_v0 = vmul.f32 %v8985_v20, %v8926_v58  ;;  %v2795_v12 = vpop.xlane.xlu1 %2794  ;;  %v3448_v26 = vmul.f32 1.442695, %v3418_v36 }
 0x4db   : > { %6032 = vrcp.f32 %v3513_v45  ;;  %v3496_v56 = vmul.f32 1.442695, %v3466_v27  ;;  %v3751_v55 = vmul.f32 %v9035_v43, %v8972_v6  ;;  %v3767_v13 = vmul.f32 %v9035_v43, %v8983_v51 }
 0x4dc   : > { %6034 = vpow2.f32 %v3686_v10  ;;  %v3783_v46 = vmul.f32 %v7471_v39, %v3175_v16  ;;  %v3799_v42 = vmul.f32 %v7500_v37, %v3367_v60  ;;  %v3831_v52 = vmul.f32 %v7537_v1, %v3559_v28  ;;  %v2859_v35 = vpop.xlane.xlu0 %2858  ;;  %v9555_v28 = vld [vmem:[#allocation52_spill] sm:$0xff] }
 0x4dd   : > { %6036 = vpow2.f32 %v3064_v3  ;;  %v3927_v58 = vmul.f32 %v7471_v39, %v9017_v63  ;;  %v3943_v20 = vmul.f32 %v7500_v37, %v9039_v53  ;;  %v3863_v6 = vmul.f32 %v7504_v17, %v3751_v55 }
 0x4de   : > { %6038 = vpow2.f32 %v3112_v33  ;;  %v3815_v19 = vadd.f32 %v3799_v42, %v3783_v46  ;;  %v3975_v9 = vmul.f32 %v7537_v1, %v3575_v0  ;;  %v9107_v51 = vpop.eup %6020  ;;  %v2874_v23 = vmul.f32 0.17677669, %v9048_v54  ;;  %v2923_v47 = vpop.xlane.xlu1 %2922 }
 0x4df   : > { %6040 = vpow2.f32 %v3448_v26  ;;  %v3959_v43 = vadd.f32 %v3943_v20, %v3927_v58  ;;  %v3002_v5 = vmul.f32 0.17677669, %v9058_v29  ;;  %v4007_v48 = vmul.f32 %v7504_v17, %v3767_v13 }
 0x4e0   : > { %v9111_v63 = vpop.eup %6022  ;;  %6042 = vpow2.f32 %v3496_v56  ;;  %v3847_v53 = vadd.f32 %v3831_v52, %v3815_v19  ;;  %v2539_v7 = vmul.f32 0.17677669, %v2523_v4  ;;  %v3210_v24 = vmax.f32 %v9046_v25, %v2874_v23  ;;  %v9556_v56 = vld [vmem:[#allocation53_spill] sm:$0xff] }
 0x4e1   : > { %v9114_v40 = vpop.eup %6024  ;;  %v3991_v49 = vadd.f32 %v3975_v9, %v3959_v43  ;;  %v3594_v10 = vmax.f32 %v9063_v22, %v3002_v5  ;;  %v2603_v16 = vmul.f32 0.17677669, %v2587_v57  ;;  %v2811_v62 = vmul.f32 0.17677669, %v2795_v12 }
 0x4e2   : > { %v9118_v54 = vpop.eup %6026  ;;  %v3879_v29 = vadd.f32 %v3863_v6, %v3847_v53  ;;  %v2875_v8 = vmul.f32 0.17677669, %v2859_v35  ;;  %v2939_v21 = vmul.f32 0.17677669, %v2923_v47  ;;  %v3226_v60 = vsub.f32 %v9046_v25, %v3210_v24 }
 0x4e3   : > { %v9120_v36 = vpop.eup %6028  ;;  %v3321_v27 = vadd.f32 %v9118_v54, %v9114_v40  ;;  %v4023_v4 = vadd.f32 %v4007_v48, %v3991_v49  ;;  %v3274_v45 = vsub.f32 %v2874_v23, %v3210_v24  ;;  %v3610_v57 = vsub.f32 %v9063_v22, %v3594_v10 }
 0x4e4   : > { %v9125_v3 = vpop.eup %6030  ;;  %v3895_v33 = vmul.f32 %v3879_v29, %v9555_v28  ;;  %v3658_v0 = vsub.f32 %v3002_v5, %v3594_v10  ;;  %v2667_v26 = vmul.f32 0.17677669, %v2651_v31  ;;  %v3256_v13 = vmul.f32 1.442695, %v3226_v60 }
 0x4e5   : > { %v9129_v12 = vpop.eup %6032  ;;  %6044 = vrcp.f32 %v3321_v27  ;;  %v4039_v55 = vmul.f32 %v4023_v4, %v9556_v56  ;;  %v3304_v46 = vmul.f32 1.442695, %v3274_v45  ;;  %v3640_v52 = vmul.f32 1.442695, %v3610_v57 }
 0x4e6   : > { %v9132_v42 = vpop.eup %6034  ;;  %v3688_v25 = vmul.f32 1.442695, %v3658_v0  ;;  %v3019_v58 = vmax.f32 %v2539_v7, %v2811_v62  ;;  %v3211_v20 = vmax.f32 %v2603_v16, %v2875_v8  ;;  %6046 = vpow2.f32 %v3256_v13 }
 0x4e7   : > { %v9134_v19 = vpop.eup %6036  ;;  %v3705_v22 = vadd.f32 %v9132_v42, %v9125_v3  ;;  %v4055_v6 = vadd.f32 %v4039_v55, %v3895_v33  ;;  %v3403_v31 = vmax.f32 %v2667_v26, %v2939_v21  ;;  %6048 = vpow2.f32 %v3304_v46 }
 0x4e8   : > { %v9138_v9 = vpop.eup %6038  ;;  %v3035_v43 = vsub.f32 %v2539_v7, %v3019_v58  ;;  %v3083_v23 = vsub.f32 %v2811_v62, %v3019_v58  ;;  %v3227_v5 = vsub.f32 %v2603_v16, %v3211_v20  ;;  %v3384_v47 = vmul.f32 %v9107_v51, %v9042_v32 }
 0x4e9   : > { %v9140_v35 = vpop.eup %6040  ;;  %6050 = vrcp.f32 %v3705_v22  ;;  %v3130_v53 = vadd.f32 %v9138_v9, %v9134_v19  ;;  %4872 = vmatmul.mubr.f32.gmra.mrb[90].mxu1 %v4055_v6  ;;  %v3275_v48 = vsub.f32 %v2875_v8, %v3211_v20  ;;  %v3419_v29 = vsub.f32 %v2667_v26, %v3403_v31 }
 0x4ea   : > { %v9146_v49 = vpop.eup %6042  ;;  %6052 = vpow2.f32 %v3640_v52  ;;  %v3066_v24 = vmul.f32 1.442695, %v3035_v43  ;;  %v3114_v10 = vmul.f32 1.442695, %v3083_v23  ;;  %v3258_v16 = vmul.f32 1.442695, %v3227_v5 }
 0x4eb   : > { %6054 = vrcp.f32 %v3130_v53  ;;  %v3514_v7 = vadd.f32 %v9146_v49, %v9140_v35  ;;  %v3306_v62 = vmul.f32 1.442695, %v3275_v48  ;;  %v3467_v32 = vsub.f32 %v2939_v21, %v3403_v31 }
 0x4ec   : > { %6056 = vpow2.f32 %v3688_v25  ;;  %v3176_v27 = vmul.f32 %v9054_v50, %v8990_v34  ;;  %v3368_v8 = vmul.f32 %v9107_v51, %v9032_v30  ;;  %v3560_v4 = vmul.f32 %v9065_v41, %v8996_v18  ;;  %v2715_v51 = vpop.xlane.xlu0 %2714  ;;  %v2987_v18 = vpop.xlane.xlu1 %2986 }
 0x4ed   : > { %6058 = vrcp.f32 %v3514_v7  ;;  %v3576_v60 = vmul.f32 %v9065_v41, %v9002_v61  ;;  %v3752_v45 = vmul.f32 %v9111_v63, %v9050_v14  ;;  %v3450_v28 = vmul.f32 1.442695, %v3419_v29  ;;  %v9557_v7 = vld [vmem:[#allocation54_spill] sm:$0xff] }
 0x4ee   : > { %6060 = vpow2.f32 %v3066_v24  ;;  %v3498_v33 = vmul.f32 1.442695, %v3467_v32  ;;  %v3768_v34 = vmul.f32 %v9111_v63, %v9060_v2  ;;  %v3784_v30 = vmul.f32 %v7471_v39, %v3176_v27 }
 0x4ef   : > { %v6045_v21 = vpop.eup %6044  ;;  %6062 = vpow2.f32 %v3114_v10  ;;  %v3800_v50 = vmul.f32 %v7500_v37, %v3368_v8  ;;  %v3832_v61 = vmul.f32 %v7537_v1, %v3560_v4  ;;  %v3928_v14 = vmul.f32 %v7471_v39, %v9090_v44 }
 0x4f0   : > { %6064 = vpow2.f32 %v3258_v16  ;;  %v3944_v41 = vmul.f32 %v7500_v37, %v3384_v47  ;;  %v9168_v57 = vpop.eup %6046  ;;  %v3864_v2 = vmul.f32 %v7504_v17, %v3752_v45  ;;  %v3976_v63 = vmul.f32 %v7537_v1, %v3576_v60 }
 0x4f1   : > { %6066 = vpow2.f32 %v3306_v62  ;;  %v3816_v0 = vadd.f32 %v3800_v50, %v3784_v30  ;;  %v9172_v26 = vpop.eup %6048  ;;  %v2731_v55 = vmul.f32 0.17677669, %v2715_v51  ;;  %v3003_v13 = vmul.f32 0.17677669, %v2987_v18 }
 0x4f2   : > { %6068 = vpow2.f32 %v3450_v28  ;;  %v3960_v56 = vadd.f32 %v3944_v41, %v3928_v14  ;;  %v3322_v44 = vadd.f32 %v9172_v26, %v9168_v57  ;;  %v3177_v25 = vmul.f32 %v9120_v36, %v9070_v38 }
 0x4f3   : > { %v6051_v46 = vpop.eup %6050  ;;  %6070 = vpow2.f32 %v3498_v33  ;;  %v3848_v52 = vadd.f32 %v3832_v61, %v3816_v0  ;;  %v4008_v22 = vmul.f32 %v7504_v17, %v3768_v34  ;;  %v3595_v6 = vmax.f32 %v2731_v55, %v3003_v13 }
 0x4f4   : > { %v9178_v58 = vpop.eup %6052  ;;  %v3992_v20 = vadd.f32 %v3976_v63, %v3960_v56  ;;  %v3369_v31 = vmul.f32 %v6045_v21, %v9114_v40  ;;  %v3193_v23 = vmul.f32 %v9120_v36, %v9072_v15  ;;  %6072 = vrcp.f32 %v3322_v44 }
 0x4f5   : > { %v6055_v43 = vpop.eup %6054  ;;  %v3880_v5 = vadd.f32 %v3864_v2, %v3848_v52  ;;  %v3561_v47 = vmul.f32 %v9129_v12, %v9076_v59  ;;  %v3385_v38 = vmul.f32 %v6045_v21, %v9118_v54  ;;  %v3611_v24 = vsub.f32 %v2731_v55, %v3595_v6  ;;  %v9558_v59 = vld [vmem:[#allocation55_spill] sm:$0xff] }
 0x4f6   : > { %v9186_v53 = vpop.eup %6056  ;;  %v4024_v48 = vadd.f32 %v4008_v22, %v3992_v20  ;;  %v3659_v10 = vsub.f32 %v3003_v13, %v3595_v6  ;;  %v3753_v15 = vmul.f32 %v6051_v46, %v9125_v3  ;;  %v3785_v36 = vmul.f32 %v7471_v39, %v3177_v25  ;;  %v9559_v20 = vld [vmem:[#allocation56_spill] sm:$0xff] }
 0x4f7   : > { %v6059_v29 = vpop.eup %6058  ;;  %v3706_v40 = vadd.f32 %v9186_v53, %v9178_v58  ;;  %v3896_v16 = vmul.f32 %v3880_v5, %v9557_v7  ;;  %v3642_v27 = vmul.f32 1.442695, %v3611_v24  ;;  %v3801_v54 = vmul.f32 %v7500_v37, %v3369_v31 }
 0x4f8   : > { %v9194_v62 = vpop.eup %6060  ;;  %v4040_v32 = vmul.f32 %v4024_v48, %v9558_v59  ;;  %v3690_v8 = vmul.f32 1.442695, %v3659_v10  ;;  %v3577_v60 = vmul.f32 %v9129_v12, %v9080_v11  ;;  %v3833_v45 = vmul.f32 %v7537_v1, %v3561_v47 }
 0x4f9   : > { %v6063_v4 = vpop.eup %6062  ;;  %6074 = vrcp.f32 %v3706_v40  ;;  %v3817_v21 = vadd.f32 %v3801_v54, %v3785_v36  ;;  %v3769_v30 = vmul.f32 %v6051_v46, %v9132_v42  ;;  %v3929_v50 = vmul.f32 %v7471_v39, %v3193_v23 }
 0x4fa   : > { %v9201_v28 = vpop.eup %6064  ;;  %v3131_v3 = vadd.f32 %v6063_v4, %v9194_v62  ;;  %v4056_v33 = vadd.f32 %v4040_v32, %v3896_v16  ;;  %6076 = vpow2.f32 %v3642_v27  ;;  %v3945_v51 = vmul.f32 %v7500_v37, %v3385_v38 }
 0x4fb   : > { %v6067_v34 = vpop.eup %6066  ;;  %6078 = vpow2.f32 %v3690_v8  ;;  %v3849_v12 = vadd.f32 %v3833_v45, %v3817_v21  ;;  %v3865_v61 = vmul.f32 %v7504_v17, %v3753_v15  ;;  %v3194_v41 = vmul.f32 %v6055_v43, %v9138_v9  ;;  %v9561_v21 = vld [vmem:[#allocation58_spill] sm:$0xff] }
 0x4fc   : > { %v6069_v18 = vpop.eup %6068  ;;  %6080 = vrcp.f32 %v3131_v3  ;;  %v3323_v11 = vadd.f32 %v6067_v34, %v9201_v28  ;;  %4874 = vmatprep.mubr.f32.mxu1 %v4056_v33  ;;  %v3961_v0 = vadd.f32 %v3945_v51, %v3929_v50  ;;  %v3977_v2 = vmul.f32 %v7537_v1, %v3577_v60  ;;  %v9562_v50 = vld [vmem:[#allocation62_spill] sm:$0xff] }
 0x4fd   : > { %v6071_v14 = vpop.eup %6070  ;;  %v3881_v63 = vadd.f32 %v3865_v61, %v3849_v12  ;;  %v3178_v56 = vmul.f32 %v6055_v43, %v9134_v19  ;;  %v4009_v46 = vmul.f32 %v7504_v17, %v3769_v30  ;;  %v3562_v44 = vmul.f32 %v6059_v29, %v9140_v35  ;;  %v9560_v35 = vld [vmem:[#allocation57_spill] sm:$0xff]  ;;  %v9563_v12 = vld [vmem:[#allocation59_spill] sm:$0xff] }
 0x4fe   : > { %6082 = vrcp.f32 %v3323_v11  ;;  %v3515_v42 = vadd.f32 %v6071_v14, %v6069_v18  ;;  %v6073_v55 = vpop.eup %6072  ;;  %v3993_v13 = vadd.f32 %v3977_v2, %v3961_v0  ;;  %v3578_v52 = vmul.f32 %v6059_v29, %v9146_v49 }
 0x4ff   : > { %v3386_v25 = vmul.f32 %v6073_v55, %v9172_v26  ;;  %v3370_v9 = vmul.f32 %v6073_v55, %v9168_v57  ;;  %v3897_v22 = vmul.f32 %v3881_v63, %v9559_v20  ;;  %v3786_v31 = vmul.f32 %v7471_v39, %v3178_v56 }
 0x500   : > { %6084 = vrcp.f32 %v3515_v42  ;;  %v4025_v6 = vadd.f32 %v4009_v46, %v3993_v13  ;;  %v3930_v43 = vmul.f32 %v7471_v39, %v3194_v41  ;;  %v3834_v49 = vmul.f32 %v7537_v1, %v3562_v44  ;;  %v9234_v41 = vld [vmem:[#allocation16] ss:$0 sm:$0xff] }
 0x501   : > { %v3802_v19 = vmul.f32 %v7500_v37, %v3370_v9  ;;  %v3946_v23 = vmul.f32 %v7500_v37, %v3386_v25  ;;  %v3978_v26 = vmul.f32 %v7537_v1, %v3578_v52 }
 0x502   : > { %v4041_v47 = vmul.f32 %v4025_v6, %v9560_v35  ;;  %v9566_v35 = vld [vmem:[#allocation61_spill] sm:$0xff] }
 0x503   : > { %v6075_v5 = vpop.eup %6074  ;;  %v3818_v24 = vadd.f32 %v3802_v19, %v3786_v31  ;;  %v3962_v10 = vadd.f32 %v3946_v23, %v3930_v43  ;;  %v9565_v23 = vld [vmem:[#allocation60_spill] sm:$0xff] }
 0x504   : > { %v6077_v38 = vpop.eup %6076  ;;  %v3754_v57 = vmul.f32 %v6075_v5, %v9178_v58  ;;  %v3770_v48 = vmul.f32 %v6075_v5, %v9186_v53  ;;  %v4057_v40 = vadd.f32 %v4041_v47, %v3897_v22 }
 0x505   : > { %v6079_v29 = vpop.eup %6078  ;;  %v3850_v15 = vadd.f32 %v3834_v49, %v3818_v24  ;;  %v3994_v59 = vadd.f32 %v3978_v26, %v3962_v10  ;;  %v9568_v26 = vld [vmem:[#allocation29_spill] sm:$0xff]  ;;  %v9574_v10 = vld [vmem:[#allocation24_spill] sm:$0xff] }
 0x506   : > { %v6081_v7 = vpop.eup %6080  ;;  %v3707_v16 = vadd.f32 %v6079_v29, %v6077_v38  ;;  %v3866_v36 = vmul.f32 %v7504_v17, %v3754_v57  ;;  %4875 = vmatmul.mubr.f32.gmra.mrb[92].mxu1 %v4057_v40  ;;  %v4010_v32 = vmul.f32 %v7504_v17, %v3770_v48  ;;  %v9570_v57 = vld [vmem:[#allocation31_spill] sm:$0xff]  ;;  %v9571_v48 = vld [vmem:[#allocation32_spill] sm:$0xff]  ;;  %v9572_v24 = vld [vmem:[#allocation33_spill] sm:$0xff] }
 0x507   : > { %v3195_v8 = vmul.f32 %v6081_v7, %v6063_v4  ;;  %v3179_v45 = vmul.f32 %v6081_v7, %v9194_v62  ;;  %v9564_v4 = vld [vmem:[#allocation63_spill] sm:$0xff]  ;;  %v9575_v40 = vld [vmem:[#allocation64_spill] sm:$0xff] }
 0x508   : > { %v6083_v27 = vpop.eup %6082  ;;  %6086 = vrcp.f32 %v3707_v16  ;;  %v3882_v54 = vadd.f32 %v3866_v36, %v3850_v15  ;;  %v4026_v60 = vadd.f32 %v4010_v32, %v3994_v59  ;;  %v9576_v15 = vld [vmem:[#allocation65_spill] sm:$0xff] }
 0x509   : > { %v3387_v58 = vmul.f32 %v6083_v27, %v6067_v34  ;;  %v4858_v53 = vpop.f32.mrb[80].mxu1  ;;  %v3371_v3 = vmul.f32 %v6083_v27, %v9201_v28  ;;  %v3787_v55 = vmul.f32 %v7471_v39, %v3179_v45  ;;  %v3931_v13 = vmul.f32 %v7471_v39, %v3195_v8  ;;  %v9578_v45 = vld [vmem:[#allocation67_spill] sm:$0xff] }
 0x50a   : > { %v6085_v33 = vpop.eup %6084  ;;  %v3898_v30 = vmul.f32 %v3882_v54, %v9561_v21  ;;  %v4309_v51 = vadd.f32 %v9562_v50, %v4858_v53  ;;  %v4158_v11 = vpop.f32.mrb[81].mxu1  ;;  %v4042_v61 = vmul.f32 %v4026_v60, %v9563_v12 }
 0x50b   : > { %v4304_v0 = vadd.f32 %v9564_v4, %v4158_v11  ;;  %v3563_v2 = vmul.f32 %v6085_v33, %v6069_v18  ;;  %v3579_v34 = vmul.f32 %v6085_v33, %v6071_v14  ;;  %v3803_v63 = vmul.f32 %v7500_v37, %v3371_v3  ;;  %v9579_v11 = vld [vmem:[#allocation68_spill] sm:$0xff]  ;;  %v9580_v4 = vld [vmem:[#allocation69_spill] sm:$0xff] }
 0x50c   : > { %v4383_v42 = vmax.f32 %v4309_v51, 0.0  ;;  %v3947_v62 = vmul.f32 %v7500_v37, %v3387_v58  ;;  %v4058_v28 = vadd.f32 %v4042_v61, %v3898_v30  ;;  %v9577_v58 = vld [vmem:[#allocation66_spill] sm:$0xff] }
 0x50d   : > { %v4382_v56 = vmax.f32 %v4304_v0, 0.0  ;;  %v3835_v44 = vmul.f32 %v7537_v1, %v3563_v2  ;;  %v3819_v18 = vadd.f32 %v3803_v63, %v3787_v55  ;;  %v3979_v25 = vmul.f32 %v7537_v1, %v3579_v34  ;;  %v9567_v1 = vld [vmem:[#allocation28_spill] sm:$0xff] }
 0x50e   : > { %v4406_v46 = vmul.f32 %v9234_v41, %v4383_v42  ;;  %4877 = vmatprep.mubr.f32.mxu1 %v4058_v28  ;;  %v3963_v14 = vadd.f32 %v3947_v62, %v3931_v13  ;;  %v9271_v62 = vld [vmem:[#allocation2] ss:$0 sm:$0xff] }
 0x50f   : > { %v4405_v52 = vmul.f32 %v9234_v41, %v4382_v56  ;;  %v3851_v22 = vadd.f32 %v3835_v44, %v3819_v18 }
 0x510   : > { %4423 = vadd.xlane.f32.xlu1 %v4406_v46  ;;  %v3995_v6 = vadd.f32 %v3979_v25, %v3963_v14 }
 0x511   : > { %4421 = vadd.xlane.f32.xlu0 %v4405_v52 }
 0x512   : > { %v6087_v37 = vpop.eup %6086 }
 0x513   : > { %v3755_v9 = vmul.f32 %v6087_v37, %v6077_v38  ;;  %v3771_v20 = vmul.f32 %v6087_v37, %v6079_v29  ;;  %v9569_v38 = vld [vmem:[#allocation30_spill] sm:$0xff] }
 0x515   : > { %v3867_v39 = vmul.f32 %v7504_v17, %v3755_v9  ;;  %v4011_v31 = vmul.f32 %v7504_v17, %v3771_v20  ;;  %v9573_v17 = vld [vmem:[#allocation23_spill] sm:$0xff] }
 0x517   : > { %v3883_v19 = vadd.f32 %v3867_v39, %v3851_v22  ;;  %v4027_v43 = vadd.f32 %v4011_v31, %v3995_v6 }
 0x519   : > { %v3899_v5 = vmul.f32 %v3883_v19, %v9565_v23  ;;  %v4043_v47 = vmul.f32 %v4027_v43, %v9566_v35 }
 0x51b   : > { %v4059_v49 = vadd.f32 %v4043_v47, %v3899_v5 }
 0x51d   : > { %4878 = vmatmul.mubr.f32.gmra.mrb[94].mxu1 %v4059_v49 }
 0x51e   : > { %4924 = vmatprep.mubr.f32.mxu1 %v9567_v1 }
 0x521   : > { %4925 = vmatmul.mubr.f32.vlgmr.msra.gmra.mrb[88].mxu1 %v9568_v26 }
 0x522   : > { %4927 = vmatprep.mubr.f32.mxu1 %v9569_v38 }
 0x525   : > { %4928 = vmatmul.mubr.f32.gmra.mrb[90].mxu1 %v9570_v57 }
 0x526   : > { %4930 = vmatprep.mubr.f32.mxu1 %v9571_v48 }
 0x529   : > { %4931 = vmatmul.mubr.f32.gmra.mrb[92].mxu1 %v9572_v24 }
 0x52a   : > { %4933 = vmatprep.mubr.f32.mxu1 %v9573_v17 }
 0x52d   : > { %4934 = vmatmul.mubr.f32.gmra.mrb[94].mxu1 %v9574_v10 }
 0x530   : > { %v4861_v29 = vpop.f32.mrb[82].mxu1 }
 0x531   : > { %v4319_v7 = vadd.f32 %v9575_v40, %v4861_v29  ;;  %v4168_v16 = vpop.f32.mrb[83].mxu1 }
 0x532   : > { %v4314_v36 = vadd.f32 %v9576_v15, %v4168_v16 }
 0x533   : > { %v4385_v59 = vmax.f32 %v4319_v7, 0.0 }
 0x534   : > { %v4384_v32 = vmax.f32 %v4314_v36, 0.0 }
 0x535   : > { %v4408_v27 = vmul.f32 %v9234_v41, %v4385_v59 }
 0x536   : > { %v4407_v8 = vmul.f32 %v9234_v41, %v4384_v32 }
 0x537   : > { %4427 = vadd.xlane.f32.xlu1 %v4408_v27 }
 0x538   : > { %4425 = vadd.xlane.f32.xlu0 %v4407_v8 }
 0x555   : > { %v4864_v54 = vpop.f32.mrb[84].mxu1 }
 0x556   : > { %v4329_v60 = vadd.f32 %v9577_v58, %v4864_v54  ;;  %v4178_v53 = vpop.f32.mrb[85].mxu1 }
 0x557   : > { %v4324_v3 = vadd.f32 %v9578_v45, %v4178_v53 }
 0x558   : > { %v4387_v33 = vmax.f32 %v4329_v60, 0.0 }
 0x559   : > { %v4386_v21 = vmax.f32 %v4324_v3, 0.0 }
 0x55a   : > { %v4410_v30 = vmul.f32 %v9234_v41, %v4387_v33 }
 0x55b   : > { %v4409_v50 = vmul.f32 %v9234_v41, %v4386_v21 }
 0x55c   : > { %4431 = vadd.xlane.f32.xlu1 %v4410_v30 }
 0x55d   : > { %4429 = vadd.xlane.f32.xlu0 %v4409_v50 }
 0x578   : > { %v4867_v51 = vpop.f32.mrb[86].mxu1 }
 0x579   : > { %v4339_v12 = vadd.f32 %v9579_v11, %v4867_v51  ;;  %v4188_v61 = vpop.f32.mrb[87].mxu1 }
 0x57a   : > { %v4334_v0 = vadd.f32 %v9580_v4, %v4188_v61 }
 0x57b   : > { %v4389_v2 = vmax.f32 %v4339_v12, 0.0 }
 0x57c   : > { %v4388_v34 = vmax.f32 %v4334_v0, 0.0 }
 0x57d   : > { %v4412_v42 = vmul.f32 %v9234_v41, %v4389_v2 }
 0x57e   : > { %v4411_v63 = vmul.f32 %v9234_v41, %v4388_v34 }
 0x57f   : > { %4435 = vadd.xlane.f32.xlu1 %v4412_v42 }
 0x580   : > { %4433 = vadd.xlane.f32.xlu0 %v4411_v63 }
 0x59d   : > { %v4424_v28 = vpop.xlane.xlu1 %4423 }
 0x59e   : > { %v4461_v56 = vadd.f32 %v9271_v62, %v4424_v28  ;;  %v4422_v55 = vpop.xlane.xlu0 %4421 }
 0x59f   : > { %v4460_v13 = vadd.f32 %v9271_v62, %v4422_v55 }
 0x5a0   : > { %4478 = vst.msk [vmem:[%s9276_s29 + $0x8] sm:$0xff] %vm4476_vm15, %v4461_v56 }
 0x5a1   : > { %4477 = vst.msk [vmem:[%s9276_s29] sm:$0xff] %vm4476_vm15, %v4460_v13 }
 0x5c4   : > { %v4428_v46 = vpop.xlane.xlu1 %4427 }
 0x5c5   : > { %v4463_v44 = vadd.f32 %v9271_v62, %v4428_v46  ;;  %v4426_v52 = vpop.xlane.xlu0 %4425 }
 0x5c6   : > { %v4462_v18 = vadd.f32 %v9271_v62, %v4426_v52 }
 0x5c7   : > { %4480 = vst.msk [vmem:[%s9276_s29 + $0x18] sm:$0xff] %vm4476_vm15, %v4463_v44 }
 0x5c8   : > { %4479 = vst.msk [vmem:[%s9276_s29 + $0x10] sm:$0xff] %vm4476_vm15, %v4462_v18 }
 0x5e9   : > { %v4432_v14 = vpop.xlane.xlu1 %4431 }
 0x5ea   : > { %v4465_v25 = vadd.f32 %v9271_v62, %v4432_v14  ;;  %v4430_v37 = vpop.xlane.xlu0 %4429 }
 0x5eb   : > { %v4464_v9 = vadd.f32 %v9271_v62, %v4430_v37 }
 0x5ec   : > { %4482 = vst.msk [vmem:[%s9276_s29 + $0x28] sm:$0xff] %vm4476_vm15, %v4465_v25 }
 0x5ed   : > { %4481 = vst.msk [vmem:[%s9276_s29 + $0x20] sm:$0xff] %vm4476_vm15, %v4464_v9 }
 0x5f4   : > { %v4926_v20 = vpop.f32.mrb[88].mxu1 }
 0x5f5   : > { %v4391_v22 = vmax.f32 %v4926_v20, 0.0  ;;  %v4343_v6 = vpop.f32.mrb[89].mxu1 }
 0x5f6   : > { %v4390_v39 = vmax.f32 %v4343_v6, 0.0 }
 0x5f7   : > { %v4414_v31 = vmul.f32 %v9234_v41, %v4391_v22 }
 0x5f8   : > { %v4413_v19 = vmul.f32 %v9234_v41, %v4390_v39  ;;  %v4929_v43 = vpop.f32.mrb[90].mxu1 }
 0x5f9   : > { %v4393_v23 = vmax.f32 %v4929_v43, 0.0  ;;  %v4353_v5 = vpop.f32.mrb[91].mxu1  ;;  %4439 = vadd.xlane.f32.xlu1 %v4414_v31 }
 0x5fa   : > { %v4392_v35 = vmax.f32 %v4353_v5, 0.0  ;;  %4437 = vadd.xlane.f32.xlu0 %v4413_v19 }
 0x5fb   : > { %v4416_v47 = vmul.f32 %v9234_v41, %v4393_v23 }
 0x5fc   : > { %v4415_v49 = vmul.f32 %v9234_v41, %v4392_v35  ;;  %v4932_v1 = vpop.f32.mrb[92].mxu1 }
 0x5fd   : > { %v4395_v26 = vmax.f32 %v4932_v1, 0.0  ;;  %v4363_v38 = vpop.f32.mrb[93].mxu1  ;;  %4443 = vadd.xlane.f32.xlu1 %v4416_v47 }
 0x5fe   : > { %v4394_v57 = vmax.f32 %v4363_v38, 0.0  ;;  %4441 = vadd.xlane.f32.xlu0 %v4415_v49 }
 0x5ff   : > { %v4418_v48 = vmul.f32 %v9234_v41, %v4395_v26 }
 0x600   : > { %v4417_v24 = vmul.f32 %v9234_v41, %v4394_v57  ;;  %v4935_v17 = vpop.f32.mrb[94].mxu1 }
 0x601   : > { %v4397_v10 = vmax.f32 %v4935_v17, 0.0  ;;  %v4373_v29 = vpop.f32.mrb[95].mxu1  ;;  %4447 = vadd.xlane.f32.xlu1 %v4418_v48 }
 0x602   : > { %v4396_v40 = vmax.f32 %v4373_v29, 0.0  ;;  %4445 = vadd.xlane.f32.xlu0 %v4417_v24 }
 0x603   : > { %v4420_v7 = vmul.f32 %v9234_v41, %v4397_v10 }
 0x604   : > { %v4419_v16 = vmul.f32 %v9234_v41, %v4396_v40 }
 0x605   : > { %4451 = vadd.xlane.f32.xlu1 %v4420_v7 }
 0x606   : > { %4449 = vadd.xlane.f32.xlu0 %v4419_v16 }
 0x60c   : > { %v4436_v15 = vpop.xlane.xlu1 %4435 }
 0x60d   : > { %v4467_v36 = vadd.f32 %v9271_v62, %v4436_v15  ;;  %v4434_v59 = vpop.xlane.xlu0 %4433 }
 0x60e   : > { %v4466_v32 = vadd.f32 %v9271_v62, %v4434_v59 }
 0x60f   : > { %4484 = vst.msk [vmem:[%s9276_s29 + $0x38] sm:$0xff] %vm4476_vm15, %v4467_v36 }
 0x610   : > { %4483 = vst.msk [vmem:[%s9276_s29 + $0x30] sm:$0xff] %vm4476_vm15, %v4466_v32 }
 0x686   : > { %v4440_v27 = vpop.xlane.xlu1 %4439 }
 0x687   : > { %v4469_v8 = vadd.f32 %v9271_v62, %v4440_v27  ;;  %v4438_v41 = vpop.xlane.xlu0 %4437 }
 0x688   : > { %v4468_v54 = vadd.f32 %v9271_v62, %v4438_v41 }
 0x689   : > { %4486 = vst.msk [vmem:[%s9276_s29 + $0x48] sm:$0xff] %vm4476_vm15, %v4469_v8 }
 0x68a   : > { %4485 = vst.msk [vmem:[%s9276_s29 + $0x40] sm:$0xff] %vm4476_vm15, %v4468_v54  ;;  %v4444_v58 = vpop.xlane.xlu1 %4443 }
 0x68b   : > { %v4471_v60 = vadd.f32 %v9271_v62, %v4444_v58  ;;  %v4442_v53 = vpop.xlane.xlu0 %4441 }
 0x68c   : > { %v4470_v45 = vadd.f32 %v9271_v62, %v4442_v53 }
 0x68d   : > { %4488 = vst.msk [vmem:[%s9276_s29 + $0x58] sm:$0xff] %vm4476_vm15, %v4471_v60 }
 0x68e   : > { %4487 = vst.msk [vmem:[%s9276_s29 + $0x50] sm:$0xff] %vm4476_vm15, %v4470_v45  ;;  %v4448_v3 = vpop.xlane.xlu1 %4447 }
 0x68f   : > { %v4473_v33 = vadd.f32 %v9271_v62, %v4448_v3  ;;  %v4446_v21 = vpop.xlane.xlu0 %4445 }
 0x690   : > { %v4472_v30 = vadd.f32 %v9271_v62, %v4446_v21 }
 0x691   : > { %4490 = vst.msk [vmem:[%s9276_s29 + $0x68] sm:$0xff] %vm4476_vm15, %v4473_v33 }
 0x692   : > { %4489 = vst.msk [vmem:[%s9276_s29 + $0x60] sm:$0xff] %vm4476_vm15, %v4472_v30  ;;  %v4452_v50 = vpop.xlane.xlu1 %4451 }
 0x693   : > { %v4475_v51 = vadd.f32 %v9271_v62, %v4452_v50  ;;  %v4450_v11 = vpop.xlane.xlu0 %4449 }
 0x694   : > { %v4474_v12 = vadd.f32 %v9271_v62, %v4450_v11 }
 0x695   : > { %4492 = vst.msk [vmem:[%s9276_s29 + $0x78] sm:$0xff] %vm4476_vm15, %v4475_v51 }
 0x696   : > { %4491 = vst.msk [vmem:[%s9276_s29 + $0x70] sm:$0xff] %vm4476_vm15, %v4474_v12 }
 0x697 PF: > { %p26_p5 = scmp.ge.s32.totalorder %s6684_s13, 4   ;;  %s9583_s15 = smov %s6384_s16 }
 0x698   : > { %s9584_s16 = smov %s6388_s17  ;;  %s9585_s17 = smov %s6696_s9 }
 0x699   : > { %s9586_s18 = smov %s6684_s13  ;;  %28 = sbr.rel (!%p26_p5) target bundleno = 10 (0xa), region = 132 }
 0x6a0   :  { %4515 = vsyncpa [#allocation4], 1 }
 0x6a1   :  { %4517 = vsyncpa [#allocation4 + $0x1], 1 }
 0x6a2   :  { %4518 = vsyncpa [#allocation6], 1 }
 0x6a3   :  { %4519 = vsyncpa [#allocation9], 1 }
 0x6a4   :  { %4520 = vsyncpa [#allocation12], 1 }
 0x6a5   :  { %4521 = vsyncpa [#allocation15], 1 }

</bundles_post_ra>
